<compile_context>
chip_gen: v7x
topology: tpu7x:2x2x1
jax: 0.10.0
libtpu: 0.0.40
codegen_flags: <defaults>
</compile_context>

<pallas_src>
import functools

import jax
import jax.numpy as jnp
from jax.experimental import pallas as pl
from jax.experimental.pallas import tpu as pltpu


_ROW_BYTES_BUDGET = 2 << 20          # pipeline bytes per grid step (~2 MiB)
_VMEM_LIMIT = 32 * 1024 * 1024       # explicit scoped-VMEM limit (v5e default is 16 MiB)


# ------------------------------ helpers -------------------------------------

def _pick_row_tile(rows, bytes_per_row, batch, budget=_ROW_BYTES_BUDGET):
    """Largest divisor of `rows` whose per-step bytes fit the budget.
    Keeps >= 2 total grid steps when batch == 1 (v7x has 2 TensorCores)."""
    cap = max(1, min(rows, budget // max(1, bytes_per_row)))
    if batch < 2 and rows > 1:
        cap = min(cap, max(1, rows // 2))
    for d in range(cap, 0, -1):
        if rows % d == 0:
            return d
    return 1


def _upsample_onehot(wc):
    """(wc, 2*wc) one-hot: fine column l <- coarse column l // 2 (nearest 2x)."""
    rows = jnp.arange(wc)[:, None]
    cols = jnp.arange(2 * wc)[None, :]
    return (cols // 2 == rows).astype(jnp.bfloat16)


def _downsample_onehot(w):
    """(w, w//2) one-hot: output column k <- input column 2k (stride-2)."""
    rows = jnp.arange(w)[:, None]
    cols = jnp.arange(w // 2)[None, :]
    return (rows == 2 * cols).astype(jnp.bfloat16)


# ------------------------------ Pallas kernels ------------------------------

def _row_conv_kernel(*refs, relu, sigmoid_rows, subsample):
    """1x1 conv over a row block in NHCW layout.

    x block: (RH, Cin, Wx).  Optional column subsample (stride-2 one-hot),
    then per-row batched matmul  W (Cout, Cin) @ x_row (Cin, W)  + bias,
    optional relu, optional sigmoid on a static row range."""
    if subsample:
        x_ref, s_ref, w_ref, b_ref, o_ref = refs
    else:
        x_ref, w_ref, b_ref, o_ref = refs

    x = x_ref[...]                                   # (RH, Cin, Wx) bf16
    if subsample:
        rh, cin, wx = x.shape
        xs = jnp.dot(x.reshape(rh * cin, wx), s_ref[...],
                     preferred_element_type=jnp.float32)
        x = xs.reshape(rh, cin, wx // 2).astype(x_ref.dtype)

    rh, cin, wo = x.shape
    cout = w_ref.shape[0]
    wb = jnp.broadcast_to(w_ref[...], (rh, cout, cin))
    y = jax.lax.dot_general(wb, x, (((2,), (1,)), ((0,), (0,))),
                            preferred_element_type=jnp.float32)
    y = y + b_ref[...]                               # (RH, Cout, Wo) f32
    if relu:
        y = jnp.maximum(y, 0.0)
    if sigmoid_rows is not None:
        lo, hi = sigmoid_rows
        rid = jax.lax.broadcasted_iota(jnp.int32, (cout, 1), 0)
        y = jnp.where((rid >= lo) & (rid < hi), jax.nn.sigmoid(y), y)
    o_ref[...] = y.astype(o_ref.dtype)


def _merge_kernel(*refs, with_head, sigmoid_rows):
    """Fused FPN merge (optionally + regression heads):

        out = lateral_conv(fine_feat) + nearest2x(coarse_p)      [ + heads ]

    fine block: (2*RC, Cin, wf), coarse block: (RC, Co, wc=wf/2).
    The upsampled / lateral / merged tensors never touch HBM."""
    if with_head:
        xf_ref, cp_ref, u_ref, wl_ref, bl_ref, wh_ref, bh_ref, o_ref = refs
    else:
        xf_ref, cp_ref, u_ref, wl_ref, bl_ref, o_ref = refs

    xf = xf_ref[...]                                 # (2RC, Cin, wf) bf16
    nrow, cin, wf = xf.shape
    co = wl_ref.shape[0]

    # lateral 1x1 conv, batched over fine rows
    wb = jnp.broadcast_to(wl_ref[...], (nrow, co, cin))
    lat = jax.lax.dot_general(wb, xf, (((2,), (1,)), ((0,), (0,))),
                              preferred_element_type=jnp.float32)
    lat = lat + bl_ref[...]                          # (2RC, Co, wf) f32

    # nearest-2x upsample of the coarse map: column duplication via a
    # precomputed one-hot (2D matmul), row duplication via leading-dim views.
    cp = cp_ref[...]                                 # (RC, Co, wc) bf16
    rc, _, wc = cp.shape
    up = jnp.dot(cp.reshape(rc * co, wc), u_ref[...],
                 preferred_element_type=jnp.float32)
    up = up.reshape(rc, co, wf)
    up = jnp.broadcast_to(up[:, None], (rc, 2, co, wf)).reshape(rc * 2, co, wf)

    p = lat + up                                     # (2RC, Co, wf) f32

    if with_head:
        cht = wh_ref.shape[0]
        whb = jnp.broadcast_to(wh_ref[...], (nrow, cht, co))
        y = jax.lax.dot_general(whb, p.astype(wh_ref.dtype),
                                (((2,), (1,)), ((0,), (0,))),
                                preferred_element_type=jnp.float32)
        y = y + bh_ref[...]                          # (2RC, Cht, wf) f32
        if sigmoid_rows is not None:
            lo, hi = sigmoid_rows
            rid = jax.lax.broadcasted_iota(jnp.int32, (cht, 1), 0)
            y = jnp.where((rid >= lo) & (rid < hi), jax.nn.sigmoid(y), y)
        o_ref[...] = y.astype(o_ref.dtype)
    else:
        o_ref[...] = p.astype(o_ref.dtype)


# ------------------------------ kernel wrappers ------------------------------

def row_conv(x, w, b, *, relu=False, sigmoid_rows=None, stride2=False,
             out_dtype=jnp.bfloat16):
    """nn.Conv2d(cin, cout, 1, bias=True) (optionally preceded by a stride-2
    2x2 subsample) on an NHCW tensor x: (N, H, Cin, W) -> (N, Ho, Cout, Wo)."""
    n, h, cin, wdt = x.shape
    cout = w.shape[0]

    if stride2:
        assert h % 2 == 0 and wdt % 2 == 0
        assert cin % 8 == 0, "stride-2 path assumes Cin % 8 == 0"
        h_out, w_out = h // 2, wdt // 2
        x_in = x.reshape(n, h_out, 2, cin, wdt)      # free view; even rows via BlockSpec
        s = _downsample_onehot(wdt)
    else:
        h_out, w_out = h, wdt
        x_in, s = x, None

    osz = jnp.dtype(out_dtype).itemsize
    bytes_per_row = cin * wdt * 2 + cout * w_out * (osz + 4)
    rh = _pick_row_tile(h_out, bytes_per_row, n)
    b2 = b.reshape(cout, 1).astype(jnp.float32)

    in_specs, inputs = [], []
    if stride2:
        in_specs.append(pl.BlockSpec((None, rh, None, cin, wdt),
                                     lambda i, j: (i, j, 0, 0, 0)))
        inputs.append(x_in)
        in_specs.append(pl.BlockSpec((wdt, w_out), lambda i, j: (0, 0)))
        inputs.append(s)
    else:
        in_specs.append(pl.BlockSpec((None, rh, cin, wdt),
                                     lambda i, j: (i, j, 0, 0)))
        inputs.append(x_in)
    in_specs += [pl.BlockSpec((cout, cin), lambda i, j: (0, 0)),
                 pl.BlockSpec((cout, 1), lambda i, j: (0, 0))]
    inputs += [w, b2]

    return pl.pallas_call(
        functools.partial(_row_conv_kernel, relu=relu,
                          sigmoid_rows=sigmoid_rows, subsample=stride2),
        out_shape=jax.ShapeDtypeStruct((n, h_out, cout, w_out), out_dtype),
        grid=(n, h_out // rh),
        in_specs=in_specs,
        out_specs=pl.BlockSpec((None, rh, cout, w_out),
                               lambda i, j: (i, j, 0, 0)),
        compiler_params=pltpu.CompilerParams(
            dimension_semantics=("parallel", "parallel"),
            vmem_limit_bytes=_VMEM_LIMIT),
    )(*inputs)


def fused_merge(fine_feat, coarse_p, wl, bl, head=None,
                out_dtype=jnp.bfloat16):
    """Fused lateral-conv + nearest-2x-upsample + add (+ fused reg heads).

    fine_feat: (N, hf, Cin, wf) NHCW backbone feature of the finer level.
    coarse_p : (N, hf/2, Co, wf/2) NHCW pyramid map of the coarser level.
    head     : optional (W_head (Cht, Co), b_head (Cht,), sigmoid_rows)."""
    n, hf, cin, wf = fine_feat.shape
    n2, hc, co, wc = coarse_p.shape
    assert n2 == n and hf == 2 * hc and wf == 2 * wc and co == wl.shape[0]
    assert co % 8 == 0, "head_ch must be a multiple of 8"

    u = _upsample_onehot(wc)
    bl2 = bl.reshape(co, 1).astype(jnp.float32)

    if head is None:
        cout_o, o_dtype, sig = co, out_dtype, None
    else:
        wh, bh, sig = head
        cht = wh.shape[0]
        bh2 = bh.reshape(cht, 1).astype(jnp.float32)
        cout_o, o_dtype = cht, jnp.float32

    osz = jnp.dtype(o_dtype).itemsize
    bytes_per_crow = (2 * cin * wf * 2 + co * wc * 2          # pipeline in-blocks
                      + 2 * cout_o * wf * osz                 # out block
                      + 4 * co * wf * 4)                      # f32 intermediates
    rc = _pick_row_tile(hc, bytes_per_crow, n)

    in_specs = [
        pl.BlockSpec((None, 2 * rc, cin, wf), lambda i, j: (i, j, 0, 0)),
        pl.BlockSpec((None, rc, co, wc), lambda i, j: (i, j, 0, 0)),
        pl.BlockSpec((wc, 2 * wc), lambda i, j: (0, 0)),
        pl.BlockSpec((co, cin), lambda i, j: (0, 0)),
        pl.BlockSpec((co, 1), lambda i, j: (0, 0)),
    ]
    inputs = [fine_feat, coarse_p, u, wl, bl2]
    if head is not None:
        in_specs += [pl.BlockSpec((cht, co), lambda i, j: (0, 0)),
                     pl.BlockSpec((cht, 1), lambda i, j: (0, 0))]
        inputs += [wh, bh2]

    return pl.pallas_call(
        functools.partial(_merge_kernel, with_head=head is not None,
                          sigmoid_rows=sig),
        out_shape=jax.ShapeDtypeStruct((n, hf, cout_o, wf), o_dtype),
        grid=(n, hc // rc),
        in_specs=in_specs,
        out_specs=pl.BlockSpec((None, 2 * rc, cout_o, wf),
                               lambda i, j: (i, j, 0, 0)),
        compiler_params=pltpu.CompilerParams(
            dimension_semantics=("parallel", "parallel"),
            vmem_limit_bytes=_VMEM_LIMIT),
    )(*inputs)


# ------------------------------- model (glue) --------------------------------

def _conv_params(key, cin, cout):
    kw, kb = jax.random.split(key)
    bound = 1.0 / float(cin) ** 0.5              # PyTorch default conv init
    w = jax.random.uniform(kw, (cout, cin), jnp.float32, -bound, bound)
    b = jax.random.uniform(kb, (cout,), jnp.float32, -bound, bound)
    return w.astype(jnp.bfloat16), b             # bf16 weights, f32 bias


def init_fpnnet_params(key, in_ch, feat_channels, head_ch, reg_dict):
    keys = iter(jax.random.split(key, 64))
    params = {}
    # TODO(synk): `backbone` is an external module argument in the reference;
    # a synthetic 1x1-conv(+relu) stride-2 pyramid stands in for it here.
    bb, prev = [], in_ch
    for c in feat_channels:
        bb.append(_conv_params(next(keys), prev, c))
        prev = c
    params["backbone"] = bb
    params["laterals"] = [_conv_params(next(keys), c, head_ch)
                          for c in feat_channels]
    ws, bs = [], []
    for _, nch in reg_dict.items():              # dict order preserved
        w, b = _conv_params(next(keys), head_ch, nch)
        ws.append(w)
        bs.append(b)
    # one_feat_map=True -> a single fused head (weights concatenated)
    params["reg_heads"] = [{"w": jnp.concatenate(ws, axis=0),
                            "b": jnp.concatenate(bs, axis=0)}]
    return params


def backbone_forward(params, x_nhcw):
    feats, f = [], x_nhcw
    for i, (w, b) in enumerate(params["backbone"]):
        f = row_conv(f, w, b, relu=True, stride2=(i > 0))
        feats.append(f)
    return feats


def fpnnet_forward(params, x_nchw, reg_dict, ret_feats=False):
    n, c, h, w = x_nchw.shape
    levels = len(params["backbone"])
    assert h % (1 << (levels - 1)) == 0 and w % (1 << (levels - 1)) == 0, (
        "spatial dims must be divisible by 2**(num_levels-1)")

    offs, cur = {}, 0
    for name, nch in reg_dict.items():
        offs[name] = (cur, cur + nch)
        cur += nch
    sig = offs.get("hm")

    # single transpose NCHW -> NHCW of the raw input; everything after stays NHCW
    x = jnp.transpose(x_nchw, (0, 2, 1, 3)).astype(jnp.bfloat16)
    feats = backbone_forward(params, x)

    # TODO(synk): FpnHead source not given; implemented as lateral 1x1 convs +
    # fused nearest-2x-upsample+add top-down path returning the finest map only
    # (one_feat_map=True, upsample_mode='interpolate').
    head = params["reg_heads"][0]
    wl, bl = params["laterals"][-1]
    p = row_conv(feats[-1], wl, bl)                       # coarsest lateral
    if len(feats) == 1:
        # TODO(synk): single-level FPN falls back to a separate head kernel.
        y = row_conv(p, head["w"], head["b"], sigmoid_rows=sig,
                     out_dtype=jnp.float32)
    else:
        for lvl in range(len(feats) - 2, -1, -1):
            wl, bl = params["laterals"][lvl]
            if lvl == 0:   # finest level: fuse heads + sigmoid into the merge
                y = fused_merge(feats[lvl], p, wl, bl,
                                head=(head["w"], head["b"], sig))
            else:
                p = fused_merge(feats[lvl], p, wl, bl)

    # split the fused head output per reg key and return NCHW like PyTorch
    outs_level = [jnp.transpose(y[:, :, lo:hi, :], (0, 2, 1, 3))
                  for _, (lo, hi) in offs.items()]
    outs = [outs_level]
    if ret_feats:
        feats_nchw = [jnp.transpose(f, (0, 2, 1, 3)) for f in feats]
        return outs, feats_nchw
    return outs


# --------------------------- pure-JAX reference ------------------------------

def _ref_forward(params, x_nchw, reg_dict):
    """Reference in plain jnp (NCHW) with the same bf16 storage points."""
    f32 = jnp.float32

    def conv(x, w, b):
        return (jnp.einsum('oc,nchw->nohw', w.astype(f32), x.astype(f32))
                + b.astype(f32)[None, :, None, None])

    f = x_nchw.astype(jnp.bfloat16)
    feats = []
    for i, (w, b) in enumerate(params["backbone"]):
        if i > 0:
            f = f[:, :, ::2, ::2]
        f = jnp.maximum(conv(f, w, b), 0.0).astype(jnp.bfloat16)
        feats.append(f)

    wl, bl = params["laterals"][-1]
    p = conv(feats[-1], wl, bl).astype(jnp.bfloat16)
    pf = p.astype(f32)
    for lvl in range(len(feats) - 2, -1, -1):
        wl, bl = params["laterals"][lvl]
        lat = conv(feats[lvl], wl, bl)
        up = jnp.repeat(jnp.repeat(p.astype(f32), 2, axis=2), 2, axis=3)
        pf = lat + up
        if lvl > 0:
            p = pf.astype(jnp.bfloat16)

    head = params["reg_heads"][0]
    y = conv(pf.astype(jnp.bfloat16), head["w"], head["b"])
    outs, cur = [], 0
    for name, nch in reg_dict.items():
        seg = y[:, cur:cur + nch]
        if name == "hm":
            seg = jax.nn.sigmoid(seg)
        outs.append(seg)
        cur += nch
    return outs


# ----------------------------------- main ------------------------------------

if __name__ == "__main__":
    key = jax.random.PRNGKey(0)
    kx, kp = jax.random.split(key)

    N, in_ch, H, W = 2, 4, 16, 16
    feat_channels = [8, 16, 32]
    head_ch = 32
    reg_dict = {"hm": 2, "wh": 2, "reg": 2}

    x = jax.random.normal(kx, (N, in_ch, H, W), jnp.float32)
    params = init_fpnnet_params(kp, in_ch, feat_channels, head_ch, reg_dict)

    fwd = jax.jit(lambda p, xx: fpnnet_forward(p, xx, reg_dict))
    outs = fwd(params, x)
    jax.block_until_ready(outs)

    # shape / dtype / sigmoid-range checks
    assert len(outs) == 1 and len(outs[0]) == len(reg_dict)
    for o, nch in zip(outs[0], reg_dict.values()):
        assert o.shape == (N, nch, H, W) and o.dtype == jnp.float32
    hm = outs[0][0]
    assert bool(jnp.all(hm >= 0.0)) and bool(jnp.all(hm <= 1.0))

    # numerics vs. a pure-JAX reference with matching bf16 storage points
    refs = _ref_forward(params, x, reg_dict)
    for o, r in zip(outs[0], refs):
        err = float(jnp.max(jnp.abs(o - r.astype(jnp.float32))))
        assert err < 1e-2, f"kernel/reference mismatch: max abs err {err}"

    print("KERNEL_OK")
</pallas_src>

<mosaic_0001>
module attributes {stable_mosaic.version = 11 : i64} {
  func.func @_row_conv_kernel(%arg0: i32, %arg1: i32, %arg2: memref<1x4x32x4xbf16, #tpu.memory_space<vmem>>, %arg3: memref<32x32xbf16, #tpu.memory_space<vmem>>, %arg4: memref<32x1xf32, #tpu.memory_space<vmem>>, %arg5: memref<1x4x32x4xbf16, #tpu.memory_space<vmem>>) attributes {dimension_semantics = [#tpu.dimension_semantics<parallel>, #tpu.dimension_semantics<parallel>], iteration_bounds = array<i64: 2, 1>, scalar_prefetch = 0 : i64, scratch_operands = 0 : i64, tpu.core_type = #tpu.core_type<tc>, window_params = [{transform_indices = @transform_0, window_bounds = array<i64: 1, 4, 32, 4>}, {pipeline_mode = #tpu.pipeline_mode<synchronous>, transform_indices = @transform_1, window_bounds = array<i64: 32, 32>}, {pipeline_mode = #tpu.pipeline_mode<synchronous>, transform_indices = @transform_2, window_bounds = array<i64: 32, 1>}, {transform_indices = @transform_3, window_bounds = array<i64: 1, 4, 32, 4>}]} {
    %c0 = arith.constant 0 : index
    %c0_0 = arith.constant 0 : index
    %c0_1 = arith.constant 0 : index
    %c0_2 = arith.constant 0 : index
    %0 = vector.load %arg2[%c0, %c0_0, %c0_1, %c0_2] : memref<1x4x32x4xbf16, #tpu.memory_space<vmem>>, vector<1x4x32x4xbf16>
    %1 = vector.shape_cast %0 : vector<1x4x32x4xbf16> to vector<4x32x4xbf16>
    %c0_3 = arith.constant 0 : index
    %c0_4 = arith.constant 0 : index
    %2 = vector.load %arg3[%c0_3, %c0_4] : memref<32x32xbf16, #tpu.memory_space<vmem>>, vector<32x32xbf16>
    %3 = vector.shape_cast %2 : vector<32x32xbf16> to vector<1x32x32xbf16>
    %4 = vector.broadcast %3 : vector<1x32x32xbf16> to vector<4x32x32xbf16>
    %cst = arith.constant dense<0.000000e+00> : vector<4x32x4xf32>
    %5 = tpu.matmul %4, %1, %cst {dimension_numbers = #tpu.dot_dimension_numbers<[2], [1], [1], [2], [0, 0, 0, 1, 1, 2], [0], [0]>} : vector<4x32x32xbf16>, vector<4x32x4xbf16>, vector<4x32x4xf32> -> vector<4x32x4xf32>
    %c0_5 = arith.constant 0 : index
    %c0_6 = arith.constant 0 : index
    %6 = vector.load %arg4[%c0_5, %c0_6] : memref<32x1xf32, #tpu.memory_space<vmem>>, vector<32x1xf32>
    %7 = vector.shape_cast %6 : vector<32x1xf32> to vector<1x32x1xf32>
    %8 = vector.broadcast %7 : vector<1x32x1xf32> to vector<4x32x4xf32>
    %9 = arith.addf %5, %8 : vector<4x32x4xf32>
    %10 = arith.truncf %9 : vector<4x32x4xf32> to vector<4x32x4xbf16>
    %c0_7 = arith.constant 0 : index
    %c0_8 = arith.constant 0 : index
    %c0_9 = arith.constant 0 : index
    %c0_10 = arith.constant 0 : index
    %11 = vector.load %arg5[%c0_7, %c0_8, %c0_9, %c0_10] : memref<1x4x32x4xbf16, #tpu.memory_space<vmem>>, vector<1x4x32x4xbf16>
    %12 = vector.shape_cast %11 : vector<1x4x32x4xbf16> to vector<4x32x4xbf16>
    %13 = vector.shape_cast %10 : vector<4x32x4xbf16> to vector<1x4x32x4xbf16>
    tpu.vector_store %arg5[%c0_7, %c0_8, %c0_9, %c0_10], %13 {strides = array<i32>} : memref<1x4x32x4xbf16, #tpu.memory_space<vmem>>, vector<1x4x32x4xbf16>,
    return
  }
  func.func @transform_0(%arg0: i32, %arg1: i32) -> (i32, i32, i32, i32) {
    %c0_i32 = arith.constant 0 : i32
    %c0_i32_0 = arith.constant 0 : i32
    %c0_i32_1 = arith.constant 0 : i32
    return %arg0, %arg1, %c0_i32, %c0_i32_0 : i32, i32, i32, i32
  }
  func.func @transform_1(%arg0: i32, %arg1: i32) -> (i32, i32) {
    %c0_i32 = arith.constant 0 : i32
    %c0_i32_0 = arith.constant 0 : i32
    %c0_i32_1 = arith.constant 0 : i32
    return %c0_i32, %c0_i32_0 : i32, i32
  }
  func.func @transform_2(%arg0: i32, %arg1: i32) -> (i32, i32) {
    %c0_i32 = arith.constant 0 : i32
    %c0_i32_0 = arith.constant 0 : i32
    %c0_i32_1 = arith.constant 0 : i32
    return %c0_i32, %c0_i32_0 : i32, i32
  }
  func.func @transform_3(%arg0: i32, %arg1: i32) -> (i32, i32, i32, i32) {
    %c0_i32 = arith.constant 0 : i32
    %c0_i32_0 = arith.constant 0 : i32
    %c0_i32_1 = arith.constant 0 : i32
    return %arg0, %arg1, %c0_i32, %c0_i32_0 : i32, i32, i32, i32
  }
}

module attributes {stable_mosaic.version = 11 : i64} {
  func.func @_row_conv_kernel(%arg0: i32, %arg1: i32, %arg2: memref<1x16x4x16xbf16, #tpu.memory_space<vmem>>, %arg3: memref<8x4xbf16, #tpu.memory_space<vmem>>, %arg4: memref<8x1xf32, #tpu.memory_space<vmem>>, %arg5: memref<1x16x8x16xbf16, #tpu.memory_space<vmem>>) attributes {dimension_semantics = [#tpu.dimension_semantics<parallel>, #tpu.dimension_semantics<parallel>], iteration_bounds = array<i64: 2, 1>, scalar_prefetch = 0 : i64, scratch_operands = 0 : i64, tpu.core_type = #tpu.core_type<tc>, window_params = [{transform_indices = @transform_0, window_bounds = array<i64: 1, 16, 4, 16>}, {pipeline_mode = #tpu.pipeline_mode<synchronous>, transform_indices = @transform_1, window_bounds = array<i64: 8, 4>}, {pipeline_mode = #tpu.pipeline_mode<synchronous>, transform_indices = @transform_2, window_bounds = array<i64: 8, 1>}, {transform_indices = @transform_3, window_bounds = array<i64: 1, 16, 8, 16>}]} {
    %c0 = arith.constant 0 : index
    %c0_0 = arith.constant 0 : index
    %c0_1 = arith.constant 0 : index
    %c0_2 = arith.constant 0 : index
    %0 = vector.load %arg2[%c0, %c0_0, %c0_1, %c0_2] : memref<1x16x4x16xbf16, #tpu.memory_space<vmem>>, vector<1x16x4x16xbf16>
    %1 = vector.shape_cast %0 : vector<1x16x4x16xbf16> to vector<16x4x16xbf16>
    %c0_3 = arith.constant 0 : index
    %c0_4 = arith.constant 0 : index
    %2 = vector.load %arg3[%c0_3, %c0_4] : memref<8x4xbf16, #tpu.memory_space<vmem>>, vector<8x4xbf16>
    %3 = vector.shape_cast %2 : vector<8x4xbf16> to vector<1x8x4xbf16>
    %4 = vector.broadcast %3 : vector<1x8x4xbf16> to vector<16x8x4xbf16>
    %cst = arith.constant dense<0.000000e+00> : vector<16x8x16xf32>
    %5 = tpu.matmul %4, %1, %cst {dimension_numbers = #tpu.dot_dimension_numbers<[2], [1], [1], [2], [0, 0, 0, 1, 1, 2], [0], [0]>} : vector<16x8x4xbf16>, vector<16x4x16xbf16>, vector<16x8x16xf32> -> vector<16x8x16xf32>
    %c0_5 = arith.constant 0 : index
    %c0_6 = arith.constant 0 : index
    %6 = vector.load %arg4[%c0_5, %c0_6] : memref<8x1xf32, #tpu.memory_space<vmem>>, vector<8x1xf32>
    %7 = vector.shape_cast %6 : vector<8x1xf32> to vector<1x8x1xf32>
    %8 = vector.broadcast %7 : vector<1x8x1xf32> to vector<16x8x16xf32>
    %9 = arith.addf %5, %8 : vector<16x8x16xf32>
    %cst_7 = arith.constant 0.000000e+00 : f32
    %10 = vector.broadcast %cst_7 : f32 to vector<16x8x16xf32>
    %11 = arith.maximumf %9, %10 : vector<16x8x16xf32>
    %12 = arith.truncf %11 : vector<16x8x16xf32> to vector<16x8x16xbf16>
    %c0_8 = arith.constant 0 : index
    %c0_9 = arith.constant 0 : index
    %c0_10 = arith.constant 0 : index
    %c0_11 = arith.constant 0 : index
    %13 = vector.load %arg5[%c0_8, %c0_9, %c0_10, %c0_11] : memref<1x16x8x16xbf16, #tpu.memory_space<vmem>>, vector<1x16x8x16xbf16>
    %14 = vector.shape_cast %13 : vector<1x16x8x16xbf16> to vector<16x8x16xbf16>
    %15 = vector.shape_cast %12 : vector<16x8x16xbf16> to vector<1x16x8x16xbf16>
    tpu.vector_store %arg5[%c0_8, %c0_9, %c0_10, %c0_11], %15 {strides = array<i32>} : memref<1x16x8x16xbf16, #tpu.memory_space<vmem>>, vector<1x16x8x16xbf16>,
    return
  }
  func.func @transform_0(%arg0: i32, %arg1: i32) -> (i32, i32, i32, i32) {
    %c0_i32 = arith.constant 0 : i32
    %c0_i32_0 = arith.constant 0 : i32
    %c0_i32_1 = arith.constant 0 : i32
    return %arg0, %arg1, %c0_i32, %c0_i32_0 : i32, i32, i32, i32
  }
  func.func @transform_1(%arg0: i32, %arg1: i32) -> (i32, i32) {
    %c0_i32 = arith.constant 0 : i32
    %c0_i32_0 = arith.constant 0 : i32
    %c0_i32_1 = arith.constant 0 : i32
    return %c0_i32, %c0_i32_0 : i32, i32
  }
  func.func @transform_2(%arg0: i32, %arg1: i32) -> (i32, i32) {
    %c0_i32 = arith.constant 0 : i32
    %c0_i32_0 = arith.constant 0 : i32
    %c0_i32_1 = arith.constant 0 : i32
    return %c0_i32, %c0_i32_0 : i32, i32
  }
  func.func @transform_3(%arg0: i32, %arg1: i32) -> (i32, i32, i32, i32) {
    %c0_i32 = arith.constant 0 : i32
    %c0_i32_0 = arith.constant 0 : i32
    %c0_i32_1 = arith.constant 0 : i32
    return %arg0, %arg1, %c0_i32, %c0_i32_0 : i32, i32, i32, i32
  }
}

module attributes {stable_mosaic.version = 11 : i64} {
  func.func @_row_conv_kernel(%arg0: i32, %arg1: i32, %arg2: memref<1x8x1x8x16xbf16, #tpu.memory_space<vmem>>, %arg3: memref<16x8xbf16, #tpu.memory_space<vmem>>, %arg4: memref<16x8xbf16, #tpu.memory_space<vmem>>, %arg5: memref<16x1xf32, #tpu.memory_space<vmem>>, %arg6: memref<1x8x16x8xbf16, #tpu.memory_space<vmem>>) attributes {dimension_semantics = [#tpu.dimension_semantics<parallel>, #tpu.dimension_semantics<parallel>], iteration_bounds = array<i64: 2, 1>, scalar_prefetch = 0 : i64, scratch_operands = 0 : i64, tpu.core_type = #tpu.core_type<tc>, window_params = [{transform_indices = @transform_0, window_bounds = array<i64: 1, 8, 1, 8, 16>}, {pipeline_mode = #tpu.pipeline_mode<synchronous>, transform_indices = @transform_1, window_bounds = array<i64: 16, 8>}, {pipeline_mode = #tpu.pipeline_mode<synchronous>, transform_indices = @transform_2, window_bounds = array<i64: 16, 8>}, {pipeline_mode = #tpu.pipeline_mode<synchronous>, transform_indices = @transform_3, window_bounds = array<i64: 16, 1>}, {transform_indices = @transform_4, window_bounds = array<i64: 1, 8, 16, 8>}]} {
    %c0 = arith.constant 0 : index
    %c0_0 = arith.constant 0 : index
    %c0_1 = arith.constant 0 : index
    %c0_2 = arith.constant 0 : index
    %c0_3 = arith.constant 0 : index
    %0 = vector.load %arg2[%c0, %c0_0, %c0_1, %c0_2, %c0_3] : memref<1x8x1x8x16xbf16, #tpu.memory_space<vmem>>, vector<1x8x1x8x16xbf16>
    %1 = vector.shape_cast %0 : vector<1x8x1x8x16xbf16> to vector<8x8x16xbf16>
    %2 = vector.shape_cast %1 : vector<8x8x16xbf16> to vector<64x16xbf16>
    %c0_4 = arith.constant 0 : index
    %c0_5 = arith.constant 0 : index
    %3 = vector.load %arg3[%c0_4, %c0_5] : memref<16x8xbf16, #tpu.memory_space<vmem>>, vector<16x8xbf16>
    %cst = arith.constant dense<0.000000e+00> : vector<64x8xf32>
    %4 = tpu.matmul %2, %3, %cst {dimension_numbers = #tpu.dot_dimension_numbers<[1], [0], [0], [1], [0, 0, 1, 1], [], []>} : vector<64x16xbf16>, vector<16x8xbf16>, vector<64x8xf32> -> vector<64x8xf32>
    %5 = vector.shape_cast %4 : vector<64x8xf32> to vector<8x8x8xf32>
    %6 = arith.truncf %5 : vector<8x8x8xf32> to vector<8x8x8xbf16>
    %c0_6 = arith.constant 0 : index
    %c0_7 = arith.constant 0 : index
    %7 = vector.load %arg4[%c0_6, %c0_7] : memref<16x8xbf16, #tpu.memory_space<vmem>>, vector<16x8xbf16>
    %8 = vector.shape_cast %7 : vector<16x8xbf16> to vector<1x16x8xbf16>
    %9 = vector.broadcast %8 : vector<1x16x8xbf16> to vector<8x16x8xbf16>
    %cst_8 = arith.constant dense<0.000000e+00> : vector<8x16x8xf32>
    %10 = tpu.matmul %9, %6, %cst_8 {dimension_numbers = #tpu.dot_dimension_numbers<[2], [1], [1], [2], [0, 0, 0, 1, 1, 2], [0], [0]>} : vector<8x16x8xbf16>, vector<8x8x8xbf16>, vector<8x16x8xf32> -> vector<8x16x8xf32>
    %c0_9 = arith.constant 0 : index
    %c0_10 = arith.constant 0 : index
    %11 = vector.load %arg5[%c0_9, %c0_10] : memref<16x1xf32, #tpu.memory_space<vmem>>, vector<16x1xf32>
    %12 = vector.shape_cast %11 : vector<16x1xf32> to vector<1x16x1xf32>
    %13 = vector.broadcast %12 : vector<1x16x1xf32> to vector<8x16x8xf32>
    %14 = arith.addf %10, %13 : vector<8x16x8xf32>
    %cst_11 = arith.constant 0.000000e+00 : f32
    %15 = vector.broadcast %cst_11 : f32 to vector<8x16x8xf32>
    %16 = arith.maximumf %14, %15 : vector<8x16x8xf32>
    %17 = arith.truncf %16 : vector<8x16x8xf32> to vector<8x16x8xbf16>
    %c0_12 = arith.constant 0 : index
    %c0_13 = arith.constant 0 : index
    %c0_14 = arith.constant 0 : index
    %c0_15 = arith.constant 0 : index
    %18 = vector.load %arg6[%c0_12, %c0_13, %c0_14, %c0_15] : memref<1x8x16x8xbf16, #tpu.memory_space<vmem>>, vector<1x8x16x8xbf16>
    %19 = vector.shape_cast %18 : vector<1x8x16x8xbf16> to vector<8x16x8xbf16>
    %20 = vector.shape_cast %17 : vector<8x16x8xbf16> to vector<1x8x16x8xbf16>
    tpu.vector_store %arg6[%c0_12, %c0_13, %c0_14, %c0_15], %20 {strides = array<i32>} : memref<1x8x16x8xbf16, #tpu.memory_space<vmem>>, vector<1x8x16x8xbf16>,
    return
  }
  func.func @transform_0(%arg0: i32, %arg1: i32) -> (i32, i32, i32, i32, i32) {
    %c0_i32 = arith.constant 0 : i32
    %c0_i32_0 = arith.constant 0 : i32
    %c0_i32_1 = arith.constant 0 : i32
    %c0_i32_2 = arith.constant 0 : i32
    return %arg0, %arg1, %c0_i32, %c0_i32_0, %c0_i32_1 : i32, i32, i32, i32, i32
  }
  func.func @transform_1(%arg0: i32, %arg1: i32) -> (i32, i32) {
    %c0_i32 = arith.constant 0 : i32
    %c0_i32_0 = arith.constant 0 : i32
    %c0_i32_1 = arith.constant 0 : i32
    return %c0_i32, %c0_i32_0 : i32, i32
  }
  func.func @transform_2(%arg0: i32, %arg1: i32) -> (i32, i32) {
    %c0_i32 = arith.constant 0 : i32
    %c0_i32_0 = arith.constant 0 : i32
    %c0_i32_1 = arith.constant 0 : i32
    return %c0_i32, %c0_i32_0 : i32, i32
  }
  func.func @transform_3(%arg0: i32, %arg1: i32) -> (i32, i32) {
    %c0_i32 = arith.constant 0 : i32
    %c0_i32_0 = arith.constant 0 : i32
    %c0_i32_1 = arith.constant 0 : i32
    return %c0_i32, %c0_i32_0 : i32, i32
  }
  func.func @transform_4(%arg0: i32, %arg1: i32) -> (i32, i32, i32, i32) {
    %c0_i32 = arith.constant 0 : i32
    %c0_i32_0 = arith.constant 0 : i32
    %c0_i32_1 = arith.constant 0 : i32
    return %arg0, %arg1, %c0_i32, %c0_i32_0 : i32, i32, i32, i32
  }
}

module attributes {stable_mosaic.version = 11 : i64} {
  func.func @_row_conv_kernel(%arg0: i32, %arg1: i32, %arg2: memref<1x4x1x16x8xbf16, #tpu.memory_space<vmem>>, %arg3: memref<8x4xbf16, #tpu.memory_space<vmem>>, %arg4: memref<32x16xbf16, #tpu.memory_space<vmem>>, %arg5: memref<32x1xf32, #tpu.memory_space<vmem>>, %arg6: memref<1x4x32x4xbf16, #tpu.memory_space<vmem>>) attributes {dimension_semantics = [#tpu.dimension_semantics<parallel>, #tpu.dimension_semantics<parallel>], iteration_bounds = array<i64: 2, 1>, scalar_prefetch = 0 : i64, scratch_operands = 0 : i64, tpu.core_type = #tpu.core_type<tc>, window_params = [{transform_indices = @transform_0, window_bounds = array<i64: 1, 4, 1, 16, 8>}, {pipeline_mode = #tpu.pipeline_mode<synchronous>, transform_indices = @transform_1, window_bounds = array<i64: 8, 4>}, {pipeline_mode = #tpu.pipeline_mode<synchronous>, transform_indices = @transform_2, window_bounds = array<i64: 32, 16>}, {pipeline_mode = #tpu.pipeline_mode<synchronous>, transform_indices = @transform_3, window_bounds = array<i64: 32, 1>}, {transform_indices = @transform_4, window_bounds = array<i64: 1, 4, 32, 4>}]} {
    %c0 = arith.constant 0 : index
    %c0_0 = arith.constant 0 : index
    %c0_1 = arith.constant 0 : index
    %c0_2 = arith.constant 0 : index
    %c0_3 = arith.constant 0 : index
    %0 = vector.load %arg2[%c0, %c0_0, %c0_1, %c0_2, %c0_3] : memref<1x4x1x16x8xbf16, #tpu.memory_space<vmem>>, vector<1x4x1x16x8xbf16>
    %1 = vector.shape_cast %0 : vector<1x4x1x16x8xbf16> to vector<4x16x8xbf16>
    %2 = vector.shape_cast %1 : vector<4x16x8xbf16> to vector<64x8xbf16>
    %c0_4 = arith.constant 0 : index
    %c0_5 = arith.constant 0 : index
    %3 = vector.load %arg3[%c0_4, %c0_5] : memref<8x4xbf16, #tpu.memory_space<vmem>>, vector<8x4xbf16>
    %cst = arith.constant dense<0.000000e+00> : vector<64x4xf32>
    %4 = tpu.matmul %2, %3, %cst {dimension_numbers = #tpu.dot_dimension_numbers<[1], [0], [0], [1], [0, 0, 1, 1], [], []>} : vector<64x8xbf16>, vector<8x4xbf16>, vector<64x4xf32> -> vector<64x4xf32>
    %5 = vector.shape_cast %4 : vector<64x4xf32> to vector<4x16x4xf32>
    %6 = arith.truncf %5 : vector<4x16x4xf32> to vector<4x16x4xbf16>
    %c0_6 = arith.constant 0 : index
    %c0_7 = arith.constant 0 : index
    %7 = vector.load %arg4[%c0_6, %c0_7] : memref<32x16xbf16, #tpu.memory_space<vmem>>, vector<32x16xbf16>
    %8 = vector.shape_cast %7 : vector<32x16xbf16> to vector<1x32x16xbf16>
    %9 = vector.broadcast %8 : vector<1x32x16xbf16> to vector<4x32x16xbf16>
    %cst_8 = arith.constant dense<0.000000e+00> : vector<4x32x4xf32>
    %10 = tpu.matmul %9, %6, %cst_8 {dimension_numbers = #tpu.dot_dimension_numbers<[2], [1], [1], [2], [0, 0, 0, 1, 1, 2], [0], [0]>} : vector<4x32x16xbf16>, vector<4x16x4xbf16>, vector<4x32x4xf32> -> vector<4x32x4xf32>
    %c0_9 = arith.constant 0 : index
    %c0_10 = arith.constant 0 : index
    %11 = vector.load %arg5[%c0_9, %c0_10] : memref<32x1xf32, #tpu.memory_space<vmem>>, vector<32x1xf32>
    %12 = vector.shape_cast %11 : vector<32x1xf32> to vector<1x32x1xf32>
    %13 = vector.broadcast %12 : vector<1x32x1xf32> to vector<4x32x4xf32>
    %14 = arith.addf %10, %13 : vector<4x32x4xf32>
    %cst_11 = arith.constant 0.000000e+00 : f32
    %15 = vector.broadcast %cst_11 : f32 to vector<4x32x4xf32>
    %16 = arith.maximumf %14, %15 : vector<4x32x4xf32>
    %17 = arith.truncf %16 : vector<4x32x4xf32> to vector<4x32x4xbf16>
    %c0_12 = arith.constant 0 : index
    %c0_13 = arith.constant 0 : index
    %c0_14 = arith.constant 0 : index
    %c0_15 = arith.constant 0 : index
    %18 = vector.load %arg6[%c0_12, %c0_13, %c0_14, %c0_15] : memref<1x4x32x4xbf16, #tpu.memory_space<vmem>>, vector<1x4x32x4xbf16>
    %19 = vector.shape_cast %18 : vector<1x4x32x4xbf16> to vector<4x32x4xbf16>
    %20 = vector.shape_cast %17 : vector<4x32x4xbf16> to vector<1x4x32x4xbf16>
    tpu.vector_store %arg6[%c0_12, %c0_13, %c0_14, %c0_15], %20 {strides = array<i32>} : memref<1x4x32x4xbf16, #tpu.memory_space<vmem>>, vector<1x4x32x4xbf16>,
    return
  }
  func.func @transform_0(%arg0: i32, %arg1: i32) -> (i32, i32, i32, i32, i32) {
    %c0_i32 = arith.constant 0 : i32
    %c0_i32_0 = arith.constant 0 : i32
    %c0_i32_1 = arith.constant 0 : i32
    %c0_i32_2 = arith.constant 0 : i32
    return %arg0, %arg1, %c0_i32, %c0_i32_0, %c0_i32_1 : i32, i32, i32, i32, i32
  }
  func.func @transform_1(%arg0: i32, %arg1: i32) -> (i32, i32) {
    %c0_i32 = arith.constant 0 : i32
    %c0_i32_0 = arith.constant 0 : i32
    %c0_i32_1 = arith.constant 0 : i32
    return %c0_i32, %c0_i32_0 : i32, i32
  }
  func.func @transform_2(%arg0: i32, %arg1: i32) -> (i32, i32) {
    %c0_i32 = arith.constant 0 : i32
    %c0_i32_0 = arith.constant 0 : i32
    %c0_i32_1 = arith.constant 0 : i32
    return %c0_i32, %c0_i32_0 : i32, i32
  }
  func.func @transform_3(%arg0: i32, %arg1: i32) -> (i32, i32) {
    %c0_i32 = arith.constant 0 : i32
    %c0_i32_0 = arith.constant 0 : i32
    %c0_i32_1 = arith.constant 0 : i32
    return %c0_i32, %c0_i32_0 : i32, i32
  }
  func.func @transform_4(%arg0: i32, %arg1: i32) -> (i32, i32, i32, i32) {
    %c0_i32 = arith.constant 0 : i32
    %c0_i32_0 = arith.constant 0 : i32
    %c0_i32_1 = arith.constant 0 : i32
    return %arg0, %arg1, %c0_i32, %c0_i32_0 : i32, i32, i32, i32
  }
}

module attributes {stable_mosaic.version = 11 : i64} {
  func.func @_merge_kernel(%arg0: i32, %arg1: i32, %arg2: memref<1x8x16x8xbf16, #tpu.memory_space<vmem>>, %arg3: memref<1x4x32x4xbf16, #tpu.memory_space<vmem>>, %arg4: memref<4x8xbf16, #tpu.memory_space<vmem>>, %arg5: memref<32x16xbf16, #tpu.memory_space<vmem>>, %arg6: memref<32x1xf32, #tpu.memory_space<vmem>>, %arg7: memref<1x8x32x8xbf16, #tpu.memory_space<vmem>>) attributes {dimension_semantics = [#tpu.dimension_semantics<parallel>, #tpu.dimension_semantics<parallel>], iteration_bounds = array<i64: 2, 1>, scalar_prefetch = 0 : i64, scratch_operands = 0 : i64, tpu.core_type = #tpu.core_type<tc>, window_params = [{transform_indices = @transform_0, window_bounds = array<i64: 1, 8, 16, 8>}, {transform_indices = @transform_1, window_bounds = array<i64: 1, 4, 32, 4>}, {pipeline_mode = #tpu.pipeline_mode<synchronous>, transform_indices = @transform_2, window_bounds = array<i64: 4, 8>}, {pipeline_mode = #tpu.pipeline_mode<synchronous>, transform_indices = @transform_3, window_bounds = array<i64: 32, 16>}, {pipeline_mode = #tpu.pipeline_mode<synchronous>, transform_indices = @transform_4, window_bounds = array<i64: 32, 1>}, {transform_indices = @transform_5, window_bounds = array<i64: 1, 8, 32, 8>}]} {
    %c0 = arith.constant 0 : index
    %c0_0 = arith.constant 0 : index
    %c0_1 = arith.constant 0 : index
    %c0_2 = arith.constant 0 : index
    %0 = vector.load %arg2[%c0, %c0_0, %c0_1, %c0_2] : memref<1x8x16x8xbf16, #tpu.memory_space<vmem>>, vector<1x8x16x8xbf16>
    %1 = vector.shape_cast %0 : vector<1x8x16x8xbf16> to vector<8x16x8xbf16>
    %c0_3 = arith.constant 0 : index
    %c0_4 = arith.constant 0 : index
    %2 = vector.load %arg5[%c0_3, %c0_4] : memref<32x16xbf16, #tpu.memory_space<vmem>>, vector<32x16xbf16>
    %3 = vector.shape_cast %2 : vector<32x16xbf16> to vector<1x32x16xbf16>
    %4 = vector.broadcast %3 : vector<1x32x16xbf16> to vector<8x32x16xbf16>
    %cst = arith.constant dense<0.000000e+00> : vector<8x32x8xf32>
    %5 = tpu.matmul %4, %1, %cst {dimension_numbers = #tpu.dot_dimension_numbers<[2], [1], [1], [2], [0, 0, 0, 1, 1, 2], [0], [0]>} : vector<8x32x16xbf16>, vector<8x16x8xbf16>, vector<8x32x8xf32> -> vector<8x32x8xf32>
    %c0_5 = arith.constant 0 : index
    %c0_6 = arith.constant 0 : index
    %6 = vector.load %arg6[%c0_5, %c0_6] : memref<32x1xf32, #tpu.memory_space<vmem>>, vector<32x1xf32>
    %7 = vector.shape_cast %6 : vector<32x1xf32> to vector<1x32x1xf32>
    %8 = vector.broadcast %7 : vector<1x32x1xf32> to vector<8x32x8xf32>
    %9 = arith.addf %5, %8 : vector<8x32x8xf32>
    %c0_7 = arith.constant 0 : index
    %c0_8 = arith.constant 0 : index
    %c0_9 = arith.constant 0 : index
    %c0_10 = arith.constant 0 : index
    %10 = vector.load %arg3[%c0_7, %c0_8, %c0_9, %c0_10] : memref<1x4x32x4xbf16, #tpu.memory_space<vmem>>, vector<1x4x32x4xbf16>
    %11 = vector.shape_cast %10 : vector<1x4x32x4xbf16> to vector<4x32x4xbf16>
    %12 = vector.shape_cast %11 : vector<4x32x4xbf16> to vector<128x4xbf16>
    %c0_11 = arith.constant 0 : index
    %c0_12 = arith.constant 0 : index
    %13 = vector.load %arg4[%c0_11, %c0_12] : memref<4x8xbf16, #tpu.memory_space<vmem>>, vector<4x8xbf16>
    %cst_13 = arith.constant dense<0.000000e+00> : vector<128x8xf32>
    %14 = tpu.matmul %12, %13, %cst_13 {dimension_numbers = #tpu.dot_dimension_numbers<[1], [0], [0], [1], [0, 0, 1, 1], [], []>} : vector<128x4xbf16>, vector<4x8xbf16>, vector<128x8xf32> -> vector<128x8xf32>
    %15 = vector.shape_cast %14 : vector<128x8xf32> to vector<4x32x8xf32>
    %16 = vector.shape_cast %15 : vector<4x32x8xf32> to vector<4x1x32x8xf32>
    %17 = vector.shape_cast %16 : vector<4x1x32x8xf32> to vector<4x1x32x8xf32>
    %18 = vector.broadcast %17 : vector<4x1x32x8xf32> to vector<4x2x32x8xf32>
    %19 = vector.shape_cast %18 : vector<4x2x32x8xf32> to vector<8x32x8xf32>
    %20 = arith.addf %9, %19 : vector<8x32x8xf32>
    %21 = arith.truncf %20 : vector<8x32x8xf32> to vector<8x32x8xbf16>
    %c0_14 = arith.constant 0 : index
    %c0_15 = arith.constant 0 : index
    %c0_16 = arith.constant 0 : index
    %c0_17 = arith.constant 0 : index
    %22 = vector.load %arg7[%c0_14, %c0_15, %c0_16, %c0_17] : memref<1x8x32x8xbf16, #tpu.memory_space<vmem>>, vector<1x8x32x8xbf16>
    %23 = vector.shape_cast %22 : vector<1x8x32x8xbf16> to vector<8x32x8xbf16>
    %24 = vector.shape_cast %21 : vector<8x32x8xbf16> to vector<1x8x32x8xbf16>
    tpu.vector_store %arg7[%c0_14, %c0_15, %c0_16, %c0_17], %24 {strides = array<i32>} : memref<1x8x32x8xbf16, #tpu.memory_space<vmem>>, vector<1x8x32x8xbf16>,
    return
  }
  func.func @transform_0(%arg0: i32, %arg1: i32) -> (i32, i32, i32, i32) {
    %c0_i32 = arith.constant 0 : i32
    %c0_i32_0 = arith.constant 0 : i32
    %c0_i32_1 = arith.constant 0 : i32
    return %arg0, %arg1, %c0_i32, %c0_i32_0 : i32, i32, i32, i32
  }
  func.func @transform_1(%arg0: i32, %arg1: i32) -> (i32, i32, i32, i32) {
    %c0_i32 = arith.constant 0 : i32
    %c0_i32_0 = arith.constant 0 : i32
    %c0_i32_1 = arith.constant 0 : i32
    return %arg0, %arg1, %c0_i32, %c0_i32_0 : i32, i32, i32, i32
  }
  func.func @transform_2(%arg0: i32, %arg1: i32) -> (i32, i32) {
    %c0_i32 = arith.constant 0 : i32
    %c0_i32_0 = arith.constant 0 : i32
    %c0_i32_1 = arith.constant 0 : i32
    return %c0_i32, %c0_i32_0 : i32, i32
  }
  func.func @transform_3(%arg0: i32, %arg1: i32) -> (i32, i32) {
    %c0_i32 = arith.constant 0 : i32
    %c0_i32_0 = arith.constant 0 : i32
    %c0_i32_1 = arith.constant 0 : i32
    return %c0_i32, %c0_i32_0 : i32, i32
  }
  func.func @transform_4(%arg0: i32, %arg1: i32) -> (i32, i32) {
    %c0_i32 = arith.constant 0 : i32
    %c0_i32_0 = arith.constant 0 : i32
    %c0_i32_1 = arith.constant 0 : i32
    return %c0_i32, %c0_i32_0 : i32, i32
  }
  func.func @transform_5(%arg0: i32, %arg1: i32) -> (i32, i32, i32, i32) {
    %c0_i32 = arith.constant 0 : i32
    %c0_i32_0 = arith.constant 0 : i32
    %c0_i32_1 = arith.constant 0 : i32
    return %arg0, %arg1, %c0_i32, %c0_i32_0 : i32, i32, i32, i32
  }
}

module attributes {stable_mosaic.version = 11 : i64} {
  func.func @_merge_kernel(%arg0: i32, %arg1: i32, %arg2: memref<1x16x8x16xbf16, #tpu.memory_space<vmem>>, %arg3: memref<1x8x32x8xbf16, #tpu.memory_space<vmem>>, %arg4: memref<8x16xbf16, #tpu.memory_space<vmem>>, %arg5: memref<32x8xbf16, #tpu.memory_space<vmem>>, %arg6: memref<32x1xf32, #tpu.memory_space<vmem>>, %arg7: memref<6x32xbf16, #tpu.memory_space<vmem>>, %arg8: memref<6x1xf32, #tpu.memory_space<vmem>>, %arg9: memref<1x16x6x16xf32, #tpu.memory_space<vmem>>) attributes {dimension_semantics = [#tpu.dimension_semantics<parallel>, #tpu.dimension_semantics<parallel>], iteration_bounds = array<i64: 2, 1>, scalar_prefetch = 0 : i64, scratch_operands = 0 : i64, tpu.core_type = #tpu.core_type<tc>, window_params = [{transform_indices = @transform_0, window_bounds = array<i64: 1, 16, 8, 16>}, {transform_indices = @transform_1, window_bounds = array<i64: 1, 8, 32, 8>}, {pipeline_mode = #tpu.pipeline_mode<synchronous>, transform_indices = @transform_2, window_bounds = array<i64: 8, 16>}, {pipeline_mode = #tpu.pipeline_mode<synchronous>, transform_indices = @transform_3, window_bounds = array<i64: 32, 8>}, {pipeline_mode = #tpu.pipeline_mode<synchronous>, transform_indices = @transform_4, window_bounds = array<i64: 32, 1>}, {pipeline_mode = #tpu.pipeline_mode<synchronous>, transform_indices = @transform_5, window_bounds = array<i64: 6, 32>}, {pipeline_mode = #tpu.pipeline_mode<synchronous>, transform_indices = @transform_6, window_bounds = array<i64: 6, 1>}, {transform_indices = @transform_7, window_bounds = array<i64: 1, 16, 6, 16>}]} {
    %c0 = arith.constant 0 : index
    %c0_0 = arith.constant 0 : index
    %c0_1 = arith.constant 0 : index
    %c0_2 = arith.constant 0 : index
    %0 = vector.load %arg2[%c0, %c0_0, %c0_1, %c0_2] : memref<1x16x8x16xbf16, #tpu.memory_space<vmem>>, vector<1x16x8x16xbf16>
    %1 = vector.shape_cast %0 : vector<1x16x8x16xbf16> to vector<16x8x16xbf16>
    %c0_3 = arith.constant 0 : index
    %c0_4 = arith.constant 0 : index
    %2 = vector.load %arg5[%c0_3, %c0_4] : memref<32x8xbf16, #tpu.memory_space<vmem>>, vector<32x8xbf16>
    %3 = vector.shape_cast %2 : vector<32x8xbf16> to vector<1x32x8xbf16>
    %4 = vector.broadcast %3 : vector<1x32x8xbf16> to vector<16x32x8xbf16>
    %cst = arith.constant dense<0.000000e+00> : vector<16x32x16xf32>
    %5 = tpu.matmul %4, %1, %cst {dimension_numbers = #tpu.dot_dimension_numbers<[2], [1], [1], [2], [0, 0, 0, 1, 1, 2], [0], [0]>} : vector<16x32x8xbf16>, vector<16x8x16xbf16>, vector<16x32x16xf32> -> vector<16x32x16xf32>
    %c0_5 = arith.constant 0 : index
    %c0_6 = arith.constant 0 : index
    %6 = vector.load %arg6[%c0_5, %c0_6] : memref<32x1xf32, #tpu.memory_space<vmem>>, vector<32x1xf32>
    %7 = vector.shape_cast %6 : vector<32x1xf32> to vector<1x32x1xf32>
    %8 = vector.broadcast %7 : vector<1x32x1xf32> to vector<16x32x16xf32>
    %9 = arith.addf %5, %8 : vector<16x32x16xf32>
    %c0_7 = arith.constant 0 : index
    %c0_8 = arith.constant 0 : index
    %c0_9 = arith.constant 0 : index
    %c0_10 = arith.constant 0 : index
    %10 = vector.load %arg3[%c0_7, %c0_8, %c0_9, %c0_10] : memref<1x8x32x8xbf16, #tpu.memory_space<vmem>>, vector<1x8x32x8xbf16>
    %11 = vector.shape_cast %10 : vector<1x8x32x8xbf16> to vector<8x32x8xbf16>
    %12 = vector.shape_cast %11 : vector<8x32x8xbf16> to vector<256x8xbf16>
    %c0_11 = arith.constant 0 : index
    %c0_12 = arith.constant 0 : index
    %13 = vector.load %arg4[%c0_11, %c0_12] : memref<8x16xbf16, #tpu.memory_space<vmem>>, vector<8x16xbf16>
    %cst_13 = arith.constant dense<0.000000e+00> : vector<256x16xf32>
    %14 = tpu.matmul %12, %13, %cst_13 {dimension_numbers = #tpu.dot_dimension_numbers<[1], [0], [0], [1], [0, 0, 1, 1], [], []>} : vector<256x8xbf16>, vector<8x16xbf16>, vector<256x16xf32> -> vector<256x16xf32>
    %15 = vector.shape_cast %14 : vector<256x16xf32> to vector<8x32x16xf32>
    %16 = vector.shape_cast %15 : vector<8x32x16xf32> to vector<8x1x32x16xf32>
    %17 = vector.shape_cast %16 : vector<8x1x32x16xf32> to vector<8x1x32x16xf32>
    %18 = vector.broadcast %17 : vector<8x1x32x16xf32> to vector<8x2x32x16xf32>
    %19 = vector.shape_cast %18 : vector<8x2x32x16xf32> to vector<16x32x16xf32>
    %20 = arith.addf %9, %19 : vector<16x32x16xf32>
    %c0_14 = arith.constant 0 : index
    %c0_15 = arith.constant 0 : index
    %21 = vector.load %arg7[%c0_14, %c0_15] : memref<6x32xbf16, #tpu.memory_space<vmem>>, vector<6x32xbf16>
    %22 = vector.shape_cast %21 : vector<6x32xbf16> to vector<1x6x32xbf16>
    %23 = vector.broadcast %22 : vector<1x6x32xbf16> to vector<16x6x32xbf16>
    %24 = arith.truncf %20 : vector<16x32x16xf32> to vector<16x32x16xbf16>
    %cst_16 = arith.constant dense<0.000000e+00> : vector<16x6x16xf32>
    %25 = tpu.matmul %23, %24, %cst_16 {dimension_numbers = #tpu.dot_dimension_numbers<[2], [1], [1], [2], [0, 0, 0, 1, 1, 2], [0], [0]>} : vector<16x6x32xbf16>, vector<16x32x16xbf16>, vector<16x6x16xf32> -> vector<16x6x16xf32>
    %c0_17 = arith.constant 0 : index
    %c0_18 = arith.constant 0 : index
    %26 = vector.load %arg8[%c0_17, %c0_18] : memref<6x1xf32, #tpu.memory_space<vmem>>, vector<6x1xf32>
    %27 = vector.shape_cast %26 : vector<6x1xf32> to vector<1x6x1xf32>
    %28 = vector.broadcast %27 : vector<1x6x1xf32> to vector<16x6x16xf32>
    %29 = arith.addf %25, %28 : vector<16x6x16xf32>
    %30 = tpu.iota {dimensions = array<i32: 0>} : vector<6x1xi32>
    %c0_i32 = arith.constant 0 : i32
    %31 = vector.broadcast %c0_i32 : i32 to vector<6x1xi32>
    %32 = arith.cmpi sge, %30, %31 : vector<6x1xi32>
    %c2_i32 = arith.constant 2 : i32
    %33 = vector.broadcast %c2_i32 : i32 to vector<6x1xi32>
    %34 = arith.cmpi slt, %30, %33 : vector<6x1xi32>
    %35 = arith.andi %32, %34 : vector<6x1xi1>
    %36 = arith.negf %29 : vector<16x6x16xf32>
    %37 = math.exp %36 : vector<16x6x16xf32>
    %cst_19 = arith.constant 1.000000e+00 : f32
    %38 = vector.broadcast %cst_19 : f32 to vector<16x6x16xf32>
    %39 = arith.addf %38, %37 : vector<16x6x16xf32>
    %40 = arith.divf %38, %39 : vector<16x6x16xf32>
    %41 = vector.shape_cast %35 : vector<6x1xi1> to vector<1x6x1xi1>
    %42 = vector.broadcast %41 : vector<1x6x1xi1> to vector<16x6x16xi1>
    %43 = arith.select %42, %40, %29 : vector<16x6x16xi1>, vector<16x6x16xf32>
    %c0_20 = arith.constant 0 : index
    %c0_21 = arith.constant 0 : index
    %c0_22 = arith.constant 0 : index
    %c0_23 = arith.constant 0 : index
    %44 = vector.load %arg9[%c0_20, %c0_21, %c0_22, %c0_23] : memref<1x16x6x16xf32, #tpu.memory_space<vmem>>, vector<1x16x6x16xf32>
    %45 = vector.shape_cast %44 : vector<1x16x6x16xf32> to vector<16x6x16xf32>
    %46 = vector.shape_cast %43 : vector<16x6x16xf32> to vector<1x16x6x16xf32>
    tpu.vector_store %arg9[%c0_20, %c0_21, %c0_22, %c0_23], %46 {strides = array<i32>} : memref<1x16x6x16xf32, #tpu.memory_space<vmem>>, vector<1x16x6x16xf32>,
    return
  }
  func.func @transform_0(%arg0: i32, %arg1: i32) -> (i32, i32, i32, i32) {
    %c0_i32 = arith.constant 0 : i32
    %c0_i32_0 = arith.constant 0 : i32
    %c0_i32_1 = arith.constant 0 : i32
    return %arg0, %arg1, %c0_i32, %c0_i32_0 : i32, i32, i32, i32
  }
  func.func @transform_1(%arg0: i32, %arg1: i32) -> (i32, i32, i32, i32) {
    %c0_i32 = arith.constant 0 : i32
    %c0_i32_0 = arith.constant 0 : i32
    %c0_i32_1 = arith.constant 0 : i32
    return %arg0, %arg1, %c0_i32, %c0_i32_0 : i32, i32, i32, i32
  }
  func.func @transform_2(%arg0: i32, %arg1: i32) -> (i32, i32) {
    %c0_i32 = arith.constant 0 : i32
    %c0_i32_0 = arith.constant 0 : i32
    %c0_i32_1 = arith.constant 0 : i32
    return %c0_i32, %c0_i32_0 : i32, i32
  }
  func.func @transform_3(%arg0: i32, %arg1: i32) -> (i32, i32) {
    %c0_i32 = arith.constant 0 : i32
    %c0_i32_0 = arith.constant 0 : i32
    %c0_i32_1 = arith.constant 0 : i32
    return %c0_i32, %c0_i32_0 : i32, i32
  }
  func.func @transform_4(%arg0: i32, %arg1: i32) -> (i32, i32) {
    %c0_i32 = arith.constant 0 : i32
    %c0_i32_0 = arith.constant 0 : i32
    %c0_i32_1 = arith.constant 0 : i32
    return %c0_i32, %c0_i32_0 : i32, i32
  }
  func.func @transform_5(%arg0: i32, %arg1: i32) -> (i32, i32) {
    %c0_i32 = arith.constant 0 : i32
    %c0_i32_0 = arith.constant 0 : i32
    %c0_i32_1 = arith.constant 0 : i32
    return %c0_i32, %c0_i32_0 : i32, i32
  }
  func.func @transform_6(%arg0: i32, %arg1: i32) -> (i32, i32) {
    %c0_i32 = arith.constant 0 : i32
    %c0_i32_0 = arith.constant 0 : i32
    %c0_i32_1 = arith.constant 0 : i32
    return %c0_i32, %c0_i32_0 : i32, i32
  }
  func.func @transform_7(%arg0: i32, %arg1: i32) -> (i32, i32, i32, i32) {
    %c0_i32 = arith.constant 0 : i32
    %c0_i32_0 = arith.constant 0 : i32
    %c0_i32_1 = arith.constant 0 : i32
    return %arg0, %arg1, %c0_i32, %c0_i32_0 : i32, i32, i32, i32
  }
}

</mosaic_0001>

<bundles_post_ra>
// kernel: _lambda_.9
= control target key start
LH: loop header
LB: loop body
LE: loop exit
PB: predicated region body
PF: predicated region fallthrough
CT: control target
= control target key end

     0   :  { %s891_s12 = smov 0   ;;  %s893_s13 = smov 0   ;;  %s991_s0 = inlined_call_operand.vmem [shape: bf16[2,4,32,4], index: 0, kind: input, shape index: {}]   ;;  %s992_s1 = inlined_call_operand.vmem [shape: bf16[32,32], index: 1, kind: input, shape index: {}]   ;;  %s993_s2 = inlined_call_operand.vmem [shape: f32[32,1], index: 2, kind: input, shape index: {}]   ;;  %s994_s3 = inlined_call_operand.vmem [shape: bf16[2,4,32,4], index: 3, kind: output, shape index: {}]  }
   0x1   :  { %s895_s14 = smov 0  }
   0x2 LB: > { %s25_s15 = sadd.s32 1, %s864_s13  ;;  %p702_p0 = scmp.ge.s32.totalorder %s868_s14, 1  ;;  %s868_s14 = sphi %s895_s14, %s13_s14   ;;  %s864_s13 = sphi %s893_s13, %s996_s13   ;;  %s860_s12 = sphi %s891_s12, %s995_s12  }
   0x3   : > { %p27_p1 = scmp.ge.s32.totalorder %s25_s15, 2  ;;  %p159_p2 = scmp.lt.s32.totalorder %s868_s14, 3 }
   0x5   : > { %s998_s15 = smov (%p27_p1, %s25_s15), 0  ;;  %p160_p3 = pnand %p702_p0, %p159_p2 }
   0x6   : > { %p194_p4 = scmp.lt.s32.totalorder (!%p160_p3), %s860_s12, 1  ;;  %v840_v0 = vld [vmem:[%s992_s1] sm:$0xff] (!%p160_p3)   ;;  %vm282_vm0 = vcmask (!%p160_p3), 261120   ;;  %v238_v1 = vld [vmem:[%s993_s2 + $0x10] sm:$0xff] (!%p160_p3)  ;;  %v870_v3 = vmov (!%p160_p3), 0   ;;  %v239_v4 = vld [vmem:[%s993_s2 + $0x18] sm:$0xff] (!%p160_p3) }
   0x7   : > { %163 = sbr.rel (%p160_p3) target bundleno = 254 (0xfe), region = 32  ;;  %781 = vmatprep.mubr.msk.bf16.mxu0 (!%p160_p3), %vm282_vm0, %v840_v0  ;;  %789 = vmatprep.mubr.msk.bf16.mxu1 (!%p160_p3), %vm282_vm0, %v840_v0  ;;  %v236_v2 = vld [vmem:[%s993_s2] sm:$0xff] (!%p160_p3)  ;;  %v237_v6 = vld [vmem:[%s993_s2 + $0x8] sm:$0xff] (!%p160_p3)  ;;  %vm585_vm1 = vcmask (!%p160_p3), 27648  }
   0x8   : > { %835 = vset.pattern.permute.xlu1 (!%p160_p3), %v870_v3  ;;  %834 = vset.pattern.permute.xlu0 (!%p160_p3), %v870_v3  ;;  %v841_v12 = vld [vmem:[%s992_s1 + $0x8] sm:$0xff] (!%p160_p3)  }
   0x9   : > { %252 = vperm.xlu1 (!%p160_p3), %835, %v238_v1   ;;  %242 = vperm.xlu0 (!%p160_p3), %834, %v236_v2  }
   0xd   : > { %257 = vperm.xlu1 (!%p160_p3), %835, %v239_v4   ;;  %247 = vperm.xlu0 (!%p160_p3), %834, %v237_v6  }
   0xe   : > { %s1000_s12 = smov (!%p194_p4, %s860_s12), 1 }
   0xf   : > { %s743_s22 = sshll.u32 %s1000_s12, 6 }
  0x10   : > { %s202_s25 = scalar_lea.vmem %s991_s0, %s743_s22  ;;  %s948_s7 = scalar_lea.vmem %s994_s3, %s743_s22 }
  0x11   : > { %v836_v5 = vld [vmem:[%s202_s25] sm:$0xff]   ;;  %v837_v7 = vld [vmem:[%s202_s25 + $0x10] sm:$0xff]   ;;  %v838_v8 = vld [vmem:[%s202_s25 + $0x8] sm:$0xff]  }
  0x12   : > { %777 = vmatprep.subr.bf16.mxu0 %v836_v5  ;;  %785 = vmatprep.subr.bf16.mxu1 %v837_v7  ;;  %v839_v9 = vld [vmem:[%s202_s25 + $0x18] sm:$0xff]   ;;  %v842_v10 = vld [vmem:[%s202_s25 + $0x20] sm:$0xff]   ;;  %v843_v11 = vld [vmem:[%s202_s25 + $0x30] sm:$0xff]  }
  0x13   : > { %778 = vmatpush3.bf16.msra.mxu0 %v836_v5  ;;  %786 = vmatpush3.bf16.msra.mxu1 %v837_v7  ;;  %v844_v13 = vld [vmem:[%s202_s25 + $0x28] sm:$0xff]   ;;  %v845_v14 = vld [vmem:[%s202_s25 + $0x38] sm:$0xff]  }
  0x14   : > { %779 = vmatprep.subr.bf16.mxu0 %v838_v8  ;;  %787 = vmatprep.subr.bf16.mxu1 %v839_v9 }
  0x17   : > { %780 = vmatpush3.bf16.msra.mxu0 %v838_v8  ;;  %788 = vmatpush3.bf16.msra.mxu1 %v839_v9 }
  0x18   : > { %793 = vmatprep.subr.bf16.mxu0 %v842_v10  ;;  %801 = vmatprep.subr.bf16.mxu1 %v843_v11 }
  0x1a   : > { %782 = vmatmul.mubr.msk.bf16.vlgmr.msra.gmra.mrb[0].mxu0 %vm282_vm0, %v841_v12  ;;  %790 = vmatmul.mubr.msk.bf16.vlgmr.msra.gmra.mrb[0].mxu1 %vm282_vm0, %v841_v12 }
  0x1b   : > { %794 = vmatpush3.bf16.msra.mxu0 %v842_v10  ;;  %802 = vmatpush3.bf16.msra.mxu1 %v843_v11 }
  0x1c   : > { %795 = vmatprep.subr.bf16.mxu0 %v844_v13  ;;  %803 = vmatprep.subr.bf16.mxu1 %v845_v14 }
  0x1d   : > { %797 = vmatprep.mubr.msk.bf16.mxu0 %vm282_vm0, %v840_v0  ;;  %805 = vmatprep.mubr.msk.bf16.mxu1 %vm282_vm0, %v840_v0 }
  0x1f   : > { %796 = vmatpush3.bf16.msra.mxu0 %v844_v13  ;;  %804 = vmatpush3.bf16.msra.mxu1 %v845_v14 }
  0x22   : > { %798 = vmatmul.mubr.msk.bf16.vlgmr.msra.gmra.mrb[4].mxu0 %vm282_vm0, %v841_v12  ;;  %806 = vmatmul.mubr.msk.bf16.vlgmr.msra.gmra.mrb[4].mxu1 %vm282_vm0, %v841_v12 }
  0x88   : > { %v253_v15 = vpop.permute.xlu1 %252  ;;  %v243_v16 = vpop.permute.xlu0 %242 }
  0x8c   : > { %v258_v17 = vpop.permute.xlu1 %257  ;;  %v248_v19 = vpop.permute.xlu0 %247 }
  0xed   : > { %v783_v18 = vpop.f32.mrb[0].mxu0  ;;  %v791_v21 = vpop.f32.mrb[0].mxu1 }
  0xee   : > { %v332_v20 = vadd.f32 %v783_v18, %v253_v15  ;;  %v323_v22 = vpop.f32.mrb[1].mxu0  ;;  %v393_v23 = vadd.f32 %v791_v21, %v253_v15  ;;  %v384_v25 = vpop.f32.mrb[1].mxu1 }
  0xef   : > { %v324_v24 = vadd.f32 %v323_v22, %v243_v16  ;;  %v784_v26 = vpop.f32.mrb[2].mxu0  ;;  %v385_v28 = vadd.f32 %v384_v25, %v243_v16  ;;  %v792_v30 = vpop.f32.mrb[2].mxu1 }
  0xf0   : > { %v747_v27 = vpack.c.bf16 %v332_v20, %v332_v20  ;;  %v335_v29 = vadd.f32 %v784_v26, %v258_v17  ;;  %v326_v31 = vpop.f32.mrb[3].mxu0  ;;  %v751_v32 = vpack.c.bf16 %v393_v23, %v393_v23  ;;  %v396_v34 = vadd.f32 %v792_v30, %v258_v17  ;;  %v387_v36 = vpop.f32.mrb[3].mxu1 }
  0xf1   : > { %v745_v33 = vpack.c.bf16 %v324_v24, %v324_v24  ;;  %v327_v35 = vadd.f32 %v326_v31, %v248_v19  ;;  %v749_v37 = vpack.c.bf16 %v385_v28, %v385_v28  ;;  %v388_v39 = vadd.f32 %v387_v36, %v248_v19 }
  0xf2   : > { %588 = vst.msk [vmem:[%s948_s7 + $0x8] sm:$0xf] %vm585_vm1, %v747_v27  ;;  %v748_v38 = vpack.c.bf16 %v335_v29, %v335_v29  ;;  %592 = vst.msk [vmem:[%s948_s7 + $0x18] sm:$0xf] %vm585_vm1, %v751_v32  ;;  %v752_v40 = vpack.c.bf16 %v396_v34, %v396_v34 }
  0xf3   : > { %586 = vst.msk [vmem:[%s948_s7] sm:$0xf] %vm585_vm1, %v745_v33  ;;  %v746_v41 = vpack.c.bf16 %v327_v35, %v327_v35  ;;  %590 = vst.msk [vmem:[%s948_s7 + $0x10] sm:$0xf] %vm585_vm1, %v749_v37  ;;  %v750_v42 = vpack.c.bf16 %v388_v39, %v388_v39 }
  0xf4   : > { %589 = vst.msk [vmem:[%s948_s7 + $0xc] sm:$0xf] %vm585_vm1, %v748_v38  ;;  %593 = vst.msk [vmem:[%s948_s7 + $0x1c] sm:$0xf] %vm585_vm1, %v752_v40 }
  0xf5   : > { %587 = vst.msk [vmem:[%s948_s7 + $0x4] sm:$0xf] %vm585_vm1, %v746_v41  ;;  %v799_v43 = vpop.f32.mrb[4].mxu0  ;;  %591 = vst.msk [vmem:[%s948_s7 + $0x14] sm:$0xf] %vm585_vm1, %v750_v42  ;;  %v807_v45 = vpop.f32.mrb[4].mxu1 }
  0xf6   : > { %v454_v44 = vadd.f32 %v799_v43, %v253_v15  ;;  %v445_v46 = vpop.f32.mrb[5].mxu0  ;;  %v515_v47 = vadd.f32 %v807_v45, %v253_v15  ;;  %v506_v49 = vpop.f32.mrb[5].mxu1 }
  0xf7   : > { %v446_v48 = vadd.f32 %v445_v46, %v243_v16  ;;  %v800_v50 = vpop.f32.mrb[6].mxu0  ;;  %v507_v52 = vadd.f32 %v506_v49, %v243_v16  ;;  %v808_v54 = vpop.f32.mrb[6].mxu1 }
  0xf8   : > { %v755_v51 = vpack.c.bf16 %v454_v44, %v454_v44  ;;  %v457_v53 = vadd.f32 %v800_v50, %v258_v17  ;;  %v448_v55 = vpop.f32.mrb[7].mxu0  ;;  %v759_v56 = vpack.c.bf16 %v515_v47, %v515_v47  ;;  %v518_v58 = vadd.f32 %v808_v54, %v258_v17  ;;  %v509_v60 = vpop.f32.mrb[7].mxu1 }
  0xf9   : > { %v753_v57 = vpack.c.bf16 %v446_v48, %v446_v48  ;;  %v449_v59 = vadd.f32 %v448_v55, %v248_v19  ;;  %v757_v61 = vpack.c.bf16 %v507_v52, %v507_v52  ;;  %v510_v63 = vadd.f32 %v509_v60, %v248_v19 }
  0xfa   : > { %596 = vst.msk [vmem:[%s948_s7 + $0x28] sm:$0xf] %vm585_vm1, %v755_v51  ;;  %v756_v62 = vpack.c.bf16 %v457_v53, %v457_v53  ;;  %600 = vst.msk [vmem:[%s948_s7 + $0x38] sm:$0xf] %vm585_vm1, %v759_v56  ;;  %v760_v0 = vpack.c.bf16 %v518_v58, %v518_v58 }
  0xfb   : > { %594 = vst.msk [vmem:[%s948_s7 + $0x20] sm:$0xf] %vm585_vm1, %v753_v57  ;;  %v754_v1 = vpack.c.bf16 %v449_v59, %v449_v59  ;;  %598 = vst.msk [vmem:[%s948_s7 + $0x30] sm:$0xf] %vm585_vm1, %v757_v61  ;;  %v758_v2 = vpack.c.bf16 %v510_v63, %v510_v63 }
  0xfc   : > { %597 = vst.msk [vmem:[%s948_s7 + $0x2c] sm:$0xf] %vm585_vm1, %v756_v62  ;;  %601 = vst.msk [vmem:[%s948_s7 + $0x3c] sm:$0xf] %vm585_vm1, %v760_v0 }
  0xfd   : > { %595 = vst.msk [vmem:[%s948_s7 + $0x24] sm:$0xf] %vm585_vm1, %v754_v1  ;;  %599 = vst.msk [vmem:[%s948_s7 + $0x34] sm:$0xf] %vm585_vm1, %v758_v2 }
  0xfe PF: > { %s13_s14 = sadd.s32 1, %s868_s14   ;;  %s995_s12 = smov %s864_s13 }
  0xff   : > { %p10_p5 = scmp.ge.s32.totalorder %s13_s14, 4   ;;  %s996_s13 = smov %s998_s15 }
 0x101   :  { %12 = sbr.rel (!%p10_p5) target bundleno = 2 (0x2), region = 62 }

// kernel: _lambda_.7
= control target key start
LH: loop header
LB: loop body
LE: loop exit
PB: predicated region body
PF: predicated region fallthrough
CT: control target
= control target key end

     0   :  { %s1253_s15 = smov 0   ;;  %s1255_s16 = smov 0   ;;  %s1425_s0 = inlined_call_operand.vmem [shape: bf16[2,8,2,8,16], index: 0, kind: input, shape index: {}]   ;;  %s1426_s1 = inlined_call_operand.vmem [shape: bf16[16,8], index: 1, kind: input, shape index: {}]   ;;  %s1427_s2 = inlined_call_operand.vmem [shape: bf16[16,8], index: 2, kind: input, shape index: {}]   ;;  %s1428_s3 = inlined_call_operand.vmem [shape: f32[16,1], index: 3, kind: input, shape index: {}]   ;;  %s1429_s4 = inlined_call_operand.vmem [shape: bf16[2,8,16,8], index: 4, kind: output, shape index: {}]  }
   0x1   :  { %s1257_s17 = smov 0   ;;  %s1259_s18 = smov 0  }
   0x2   :  { %s1261_s19 = smov 0  }
   0x3 LB: > { %s26_s20 = sadd.s32 1, %s1219_s18  ;;  %p42_p1 = scmp.ne.s32.totalorder %s1211_s16, %s1207_s15  ;;  %s1223_s19 = sphi %s1261_s19, %s14_s19   ;;  %s1219_s18 = sphi %s1259_s18, %s1433_s18   ;;  %s1215_s17 = sphi %s1257_s17, %s1432_s17   ;;  %s1211_s16 = sphi %s1255_s16, %s1431_s16   ;;  %s1207_s15 = sphi %s1253_s15, %s1430_s15  }
   0x4   : > { %p28_p0 = scmp.ge.s32.totalorder %s26_s20, 2  ;;  %p43_p2 = scmp.eq.s32.totalorder %s1223_s19, 0 }
   0x5   : > { %s35_s22 = sadd.s32 1, %s1211_s16  ;;  %p994_p5 = scmp.ge.s32.totalorder %s1223_s19, 2 }
   0x6   : > { %s1435_s20 = smov (%p28_p0, %s26_s20), 0  ;;  %p44_p3 = por %p43_p2, %p42_p1 }
   0x7   : > { %s30_s21 = ssub.s32 %s1219_s18, %s1435_s20  ;;  %168 = sbr.rel (%p994_p5) target bundleno = 23 (0x17), region = 28 }
   0x8   : > { %p33_p4 = scmp.eq.s32.totalorder %s30_s21, 0 }
   0xa   : > { %s1288_s23 = scalar_select %p33_p4, %s1211_s16, %s35_s22  }
   0xe   : > { %171 = sbr.rel (!%p44_p3) target bundleno = 23 (0x17), region = 32  ;;  %s173_s24 = sand.u32 (%p44_p3), 1, %s1211_s16  }
   0xf   : > { %s1038_s25 = sshll.u32 (%p44_p3), %s1219_s18, 6  ;;  %s995_s26 = sshll.u32 (%p44_p3), %s173_s24, 5 }
  0x10   : > { %s181_s29 = scalar_lea.vmem (%p44_p3), %s1425_s0, %s1038_s25  ;;  %s175_s30 = scalar_lea.vmem (%p44_p3), [#allocation2], %s995_s26 }
  0x11   : > { %v197_v0 = vld [vmem:[%s181_s29] sm:$0xf] (%p44_p3)  ;;  %v199_v1 = vld [vmem:[%s181_s29 + $0x8] sm:$0xf] (%p44_p3)  ;;  %v201_v2 = vld [vmem:[%s181_s29 + $0x10] sm:$0xf] (%p44_p3) }
  0x12   : > { %198 = vst [vmem:[%s175_s30] sm:$0xf] (%p44_p3), %v197_v0  ;;  %200 = vst [vmem:[%s175_s30 + $0x4] sm:$0xf] (%p44_p3), %v199_v1  ;;  %v203_v3 = vld [vmem:[%s181_s29 + $0x18] sm:$0xf] (%p44_p3) }
  0x13   : > { %v205_v4 = vld [vmem:[%s181_s29 + $0x20] sm:$0xf] (%p44_p3)  ;;  %202 = vst [vmem:[%s175_s30 + $0x8] sm:$0xf] (%p44_p3), %v201_v2  ;;  %204 = vst [vmem:[%s175_s30 + $0xc] sm:$0xf] (%p44_p3), %v203_v3 }
  0x14   : > { %206 = vst [vmem:[%s175_s30 + $0x10] sm:$0xf] (%p44_p3), %v205_v4  ;;  %v207_v5 = vld [vmem:[%s181_s29 + $0x28] sm:$0xf] (%p44_p3)  ;;  %v209_v6 = vld [vmem:[%s181_s29 + $0x30] sm:$0xf] (%p44_p3) }
  0x15   : > { %v211_v7 = vld [vmem:[%s181_s29 + $0x38] sm:$0xf]  ;;  %208 = vst [vmem:[%s175_s30 + $0x14] sm:$0xf] %v207_v5  ;;  %210 = vst [vmem:[%s175_s30 + $0x18] sm:$0xf] %v209_v6 }
  0x16   : > { %212 = vst [vmem:[%s175_s30 + $0x1c] sm:$0xf] %v211_v7 }
  0x17 PF: > { %p998_p6 = scmp.ge.s32.totalorder %s1223_s19, 1  ;;  %p250_p7 = scmp.lt.s32.totalorder %s1223_s19, 3 }
  0x19   : > { %p251_p8 = pnand %p998_p6, %p250_p7 }
  0x1a   : > { %v1179_v8 = vld [vmem:[%s1426_s1] sm:$0xff] (!%p251_p8)   ;;  %s257_s7 = sand.u32 (!%p251_p8), 1, %s1207_s15   ;;  %vm336_vm0 = vcmask (!%p251_p8), 130048   ;;  %v1225_v13 = vmov (!%p251_p8), 0.0   ;;  %vm1226_vm1 = vmmov (!%p251_p8), 0   ;;  %v1227_v15 = vmov (!%p251_p8), 0  }
  0x1b   : > { %254 = sbr.rel (%p251_p8) target bundleno = 503 (0x1f7), region = 73  ;;  %s999_s8 = sshll.u32 (!%p251_p8), %s257_s7, 5  ;;  %1077 = vmatprep.subr.bf16.mxu0 (!%p251_p8), %v1179_v8  ;;  %1087 = vmatprep.subr.bf16.mxu1 (!%p251_p8), %v1225_v13  ;;  %v424_v14 = vld [vmem:[%s1428_s3] sm:$0xff] (!%p251_p8)  ;;  %v425_v16 = vld [vmem:[%s1428_s3 + $0x8] sm:$0xff] (!%p251_p8)  ;;  %vm445_vm2 = vcmask (!%p251_p8), 1043456   ;;  %vm441_vm3 = vcmask (!%p251_p8), 64512  }
  0x1c   : > { %1078 = vmatpush3.bf16.msra.mxu0 (!%p251_p8), %v1179_v8  ;;  %s259_s9 = scalar_lea.vmem (!%p251_p8), [#allocation2], %s999_s8  ;;  %1089 = vmatprep.mubr.msk.bf16.mxu1 (!%p251_p8), %vm1226_vm1, %v1225_v13  ;;  %v1184_v26 = vld [vmem:[%s1427_s2] sm:$0xff] (!%p251_p8)   ;;  %p289_p9 = scmp.lt.s32.totalorder (!%p251_p8), %s1215_s17, 1  ;;  %vm878_vm4 = vcmask (!%p251_p8), 60416  }
  0x1d   : > { %v1180_v9 = vld [vmem:[%s259_s9] sm:$0xff] (!%p251_p8)   ;;  %v1181_v10 = vld [vmem:[%s259_s9 + $0x8] sm:$0xff] (!%p251_p8)   ;;  %v1182_v11 = vld [vmem:[%s259_s9 + $0x10] sm:$0xff] (!%p251_p8)   ;;  %1099 = vmatprep.subr.bf16.mxu0 (!%p251_p8), %v1225_v13  ;;  %1178 = vset.pattern.permute.xlu0 (!%p251_p8), %v1227_v15 }
  0x1e   : > { %1079 = vmatprep.mubr.msk.bf16.mxu0 (!%p251_p8), %vm336_vm0, %v1180_v9  ;;  %v1183_v12 = vld [vmem:[%s259_s9 + $0x18] sm:$0xff] (!%p251_p8)   ;;  %428 = vperm.xlu0 (!%p251_p8), %1178, %v424_v14  }
  0x1f   : > { %1080 = vmatmul.mubr.msk.bf16.vlgmr.msra.gmra.mrb[0].mxu0 (!%p251_p8), %vm336_vm0, %v1181_v10 }
  0x20   : > { %1083 = vmatprep.mubr.msk.bf16.mxu0 (!%p251_p8), %vm336_vm0, %v1182_v11 }
  0x22   : > { %433 = vperm.xlu0 %1178, %v425_v16   ;;  %s1437_s17 = smov (!%p289_p9, %s1215_s17), 1 }
  0x23   : > { %s1039_s21 = sshll.u32 %s1437_s17, 6 }
  0x24   : > { %s1364_s25 = scalar_lea.vmem %s1429_s4, %s1039_s21 }
  0x27   : > { %1084 = vmatmul.mubr.msk.bf16.gmra.mrb[4].mxu0 %vm336_vm0, %v1183_v12 }
  0x28   : > { %1101 = vmatprep.mubr.msk.bf16.mxu0 %vm1226_vm1, %v1225_v13 }
  0x9d   : > { %v1351_v42 = vpop.permute.xlu0 %428 }
  0xa1   : > { %v1355_v43 = vpop.permute.xlu0 %433 }
  0xf2   : > { %v1081_v17 = vpop.f32.mrb[0].mxu0 }
  0xf3   : > { %v416_v18 = vpack.c.bf16 %v1081_v17, %v1081_v17  ;;  %v383_v19 = vpop.f32.mrb[1].mxu0 }
  0xf4   : > { %v414_v20 = vpack.c.bf16 %v383_v19, %v383_v19  ;;  %v1082_v21 = vpop.f32.mrb[2].mxu0 }
  0xf5   : > { %v535_v22 = vsel %vm445_vm2, %v416_v18, 0  ;;  %v386_v23 = vpop.f32.mrb[3].mxu0  ;;  %v417_v34 = vpack.c.bf16 %v1082_v21, %v1082_v21 }
  0xf6   : > { %v415_v24 = vpack.c.bf16 %v386_v23, %v386_v23  ;;  %1100 = vmatpush3.bf16.msra.mxu0 %v535_v22  ;;  %v447_v25 = vsel %vm445_vm2, %v414_v20, 0 }
  0xf7   : > { %1088 = vmatpush3.bf16.msra.mxu1 %v447_v25  ;;  %1111 = vmatprep.subr.bf16.mxu0 %v1225_v13  ;;  %v579_v37 = vsel %vm445_vm2, %v417_v34, 0 }
  0xf8   : > { %1093 = vmatprep.subr.bf16.mxu1 %v1225_v13  ;;  %v491_v27 = vsel %vm445_vm2, %v415_v24, 0 }
  0xf9   : > { %1102 = vmatmul.mubr.msk.bf16.vlgmr.msra.gmra.mrb[8].mxu0 %vm441_vm3, %v1184_v26 }
  0xfa   : > { %1090 = vmatmul.mubr.msk.bf16.vlgmr.msra.gmra.mrb[0].mxu1 %vm441_vm3, %v1184_v26  ;;  %v1085_v28 = vpop.f32.mrb[4].mxu0  ;;  %1113 = vmatprep.mubr.msk.bf16.mxu0 %vm1226_vm1, %v1225_v13 }
  0xfb   : > { %1094 = vmatpush3.bf16.msra.mxu1 %v491_v27  ;;  %v399_v29 = vpop.f32.mrb[5].mxu0  ;;  %1095 = vmatprep.mubr.msk.bf16.mxu1 %vm1226_vm1, %v1225_v13  ;;  %v420_v30 = vpack.c.bf16 %v1085_v28, %v1085_v28 }
  0xfc   : > { %v418_v31 = vpack.c.bf16 %v399_v29, %v399_v29  ;;  %1105 = vmatprep.subr.bf16.mxu1 %v1225_v13  ;;  %v1086_v32 = vpop.f32.mrb[6].mxu0 }
  0xfd   : > { %v402_v33 = vpop.f32.mrb[7].mxu0  ;;  %v711_v36 = vsel %vm445_vm2, %v420_v30, 0  ;;  %v421_v40 = vpack.c.bf16 %v1086_v32, %v1086_v32 }
  0xfe   : > { %v623_v35 = vsel %vm445_vm2, %v418_v31, 0  ;;  %v419_v38 = vpack.c.bf16 %v402_v33, %v402_v33 }
  0xff   : > { %1112 = vmatpush3.bf16.msra.mxu0 %v623_v35  ;;  %v755_v41 = vsel %vm445_vm2, %v421_v40, 0 }
 0x100   : > { %1123 = vmatprep.subr.bf16.mxu0 %v1225_v13  ;;  %v667_v39 = vsel %vm445_vm2, %v419_v38, 0 }
 0x102   : > { %1096 = vmatmul.mubr.msk.bf16.vlgmr.msra.gmra.mrb[4].mxu1 %vm441_vm3, %v1184_v26  ;;  %1114 = vmatmul.mubr.msk.bf16.vlgmr.msra.gmra.mrb[12].mxu0 %vm441_vm3, %v1184_v26 }
 0x103   : > { %1106 = vmatpush3.bf16.msra.mxu1 %v579_v37  ;;  %1124 = vmatpush3.bf16.msra.mxu0 %v711_v36 }
 0x104   : > { %1107 = vmatprep.mubr.msk.bf16.mxu1 %vm1226_vm1, %v1225_v13  ;;  %1117 = vmatprep.subr.bf16.mxu1 %v1225_v13 }
 0x105   : > { %1125 = vmatprep.mubr.msk.bf16.mxu0 %vm1226_vm1, %v1225_v13 }
 0x10a   : > { %1108 = vmatmul.mubr.msk.bf16.vlgmr.msra.gmra.mrb[8].mxu1 %vm441_vm3, %v1184_v26  ;;  %1126 = vmatmul.mubr.msk.bf16.vlgmr.msra.gmra.mrb[16].mxu0 %vm441_vm3, %v1184_v26 }
 0x10b   : > { %1118 = vmatpush3.bf16.msra.mxu1 %v667_v39  ;;  %1119 = vmatprep.mubr.msk.bf16.mxu1 %vm1226_vm1, %v1225_v13 }
 0x10c   : > { %1129 = vmatprep.subr.bf16.mxu1 %v1225_v13 }
 0x112   : > { %1120 = vmatmul.mubr.msk.bf16.vlgmr.msra.gmra.mrb[12].mxu1 %vm441_vm3, %v1184_v26 }
 0x113   : > { %1130 = vmatpush3.bf16.msra.mxu1 %v755_v41  ;;  %1131 = vmatprep.mubr.msk.bf16.mxu1 %vm1226_vm1, %v1225_v13 }
 0x11a   : > { %1132 = vmatmul.mubr.msk.bf16.vlgmr.msra.gmra.mrb[16].mxu1 %vm441_vm3, %v1184_v26 }
 0x1cc   : > { %v571_v44 = vpop.f32.mrb[8].mxu0 }
 0x1cd   : > { %v483_v45 = vpop.f32.mrb[0].mxu1  ;;  %v572_v46 = vadd.f32 %v571_v44, %v1351_v42  ;;  %v1103_v47 = vpop.f32.mrb[9].mxu0 }
 0x1ce   : > { %v484_v48 = vadd.f32 %v483_v45, %v1351_v42  ;;  %v1091_v49 = vpop.f32.mrb[1].mxu1  ;;  %v574_v50 = vpop.f32.mrb[10].mxu0 }
 0x1cf   : > { %v486_v51 = vpop.f32.mrb[2].mxu1  ;;  %v802_v52 = vmax.f32 %v572_v46, 0.0  ;;  %v575_v53 = vadd.f32 %v574_v50, %v1355_v43  ;;  %v1104_v54 = vpop.f32.mrb[11].mxu0 }
 0x1d0   : > { %v798_v55 = vmax.f32 %v484_v48, 0.0  ;;  %v487_v56 = vadd.f32 %v486_v51, %v1355_v43  ;;  %v1092_v57 = vpop.f32.mrb[3].mxu1 }
 0x1d1   : > { %v1044_v58 = vpack.c.bf16 %v802_v52, %v802_v52  ;;  %v803_v59 = vmax.f32 %v575_v53, 0.0 }
 0x1d2   : > { %v1040_v60 = vpack.c.bf16 %v798_v55, %v798_v55  ;;  %v799_v61 = vmax.f32 %v487_v56, 0.0 }
 0x1d3   : > { %883 = vst.msk [vmem:[%s1364_s25 + $0x10] sm:$0xf] %vm878_vm4, %v1044_v58  ;;  %v1045_v62 = vpack.c.bf16 %v803_v59, %v803_v59 }
 0x1d4   : > { %879 = vst.msk [vmem:[%s1364_s25] sm:$0xf] %vm878_vm4, %v1040_v60  ;;  %v1041_v63 = vpack.c.bf16 %v799_v61, %v799_v61 }
 0x1d5   : > { %v527_v0 = vpop.f32.mrb[4].mxu1  ;;  %884 = vst.msk [vmem:[%s1364_s25 + $0x14] sm:$0xf] %vm878_vm4, %v1045_v62  ;;  %v659_v1 = vpop.f32.mrb[12].mxu0 }
 0x1d6   : > { %880 = vst.msk [vmem:[%s1364_s25 + $0x4] sm:$0xf] %vm878_vm4, %v1041_v63  ;;  %v528_v2 = vadd.f32 %v527_v0, %v1351_v42  ;;  %v1097_v3 = vpop.f32.mrb[5].mxu1  ;;  %v660_v4 = vadd.f32 %v659_v1, %v1351_v42  ;;  %v1115_v5 = vpop.f32.mrb[13].mxu0 }
 0x1d7   : > { %v530_v6 = vpop.f32.mrb[6].mxu1  ;;  %v662_v7 = vpop.f32.mrb[14].mxu0 }
 0x1d8   : > { %v800_v8 = vmax.f32 %v528_v2, 0.0  ;;  %v531_v9 = vadd.f32 %v530_v6, %v1355_v43  ;;  %v1098_v10 = vpop.f32.mrb[7].mxu1  ;;  %v806_v11 = vmax.f32 %v660_v4, 0.0  ;;  %v663_v12 = vadd.f32 %v662_v7, %v1355_v43  ;;  %v1116_v13 = vpop.f32.mrb[15].mxu0 }
 0x1da   : > { %v1042_v14 = vpack.c.bf16 %v800_v8, %v800_v8  ;;  %v801_v15 = vmax.f32 %v531_v9, 0.0  ;;  %v1048_v16 = vpack.c.bf16 %v806_v11, %v806_v11  ;;  %v807_v17 = vmax.f32 %v663_v12, 0.0 }
 0x1dc   : > { %881 = vst.msk [vmem:[%s1364_s25 + $0x8] sm:$0xf] %vm878_vm4, %v1042_v14  ;;  %v1043_v18 = vpack.c.bf16 %v801_v15, %v801_v15  ;;  %887 = vst.msk [vmem:[%s1364_s25 + $0x20] sm:$0xf] %vm878_vm4, %v1048_v16  ;;  %v1049_v19 = vpack.c.bf16 %v807_v17, %v807_v17 }
 0x1dd   : > { %v615_v20 = vpop.f32.mrb[8].mxu1  ;;  %v747_v21 = vpop.f32.mrb[16].mxu0 }
 0x1de   : > { %882 = vst.msk [vmem:[%s1364_s25 + $0xc] sm:$0xf] %vm878_vm4, %v1043_v18  ;;  %v616_v22 = vadd.f32 %v615_v20, %v1351_v42  ;;  %v1109_v23 = vpop.f32.mrb[9].mxu1  ;;  %888 = vst.msk [vmem:[%s1364_s25 + $0x24] sm:$0xf] %vm878_vm4, %v1049_v19  ;;  %v748_v24 = vadd.f32 %v747_v21, %v1351_v42  ;;  %v1127_v25 = vpop.f32.mrb[17].mxu0 }
 0x1df   : > { %v618_v26 = vpop.f32.mrb[10].mxu1  ;;  %v750_v27 = vpop.f32.mrb[18].mxu0 }
 0x1e0   : > { %v804_v28 = vmax.f32 %v616_v22, 0.0  ;;  %v619_v29 = vadd.f32 %v618_v26, %v1355_v43  ;;  %v1110_v30 = vpop.f32.mrb[11].mxu1  ;;  %v810_v31 = vmax.f32 %v748_v24, 0.0  ;;  %v751_v32 = vadd.f32 %v750_v27, %v1355_v43  ;;  %v1128_v33 = vpop.f32.mrb[19].mxu0 }
 0x1e2   : > { %v1046_v34 = vpack.c.bf16 %v804_v28, %v804_v28  ;;  %v805_v35 = vmax.f32 %v619_v29, 0.0  ;;  %v1052_v36 = vpack.c.bf16 %v810_v31, %v810_v31  ;;  %v811_v37 = vmax.f32 %v751_v32, 0.0 }
 0x1e4   : > { %885 = vst.msk [vmem:[%s1364_s25 + $0x18] sm:$0xf] %vm878_vm4, %v1046_v34  ;;  %v1047_v38 = vpack.c.bf16 %v805_v35, %v805_v35  ;;  %891 = vst.msk [vmem:[%s1364_s25 + $0x30] sm:$0xf] %vm878_vm4, %v1052_v36  ;;  %v1053_v39 = vpack.c.bf16 %v811_v37, %v811_v37 }
 0x1e5   : > { %v703_v40 = vpop.f32.mrb[12].mxu1 }
 0x1e6   : > { %886 = vst.msk [vmem:[%s1364_s25 + $0x1c] sm:$0xf] %vm878_vm4, %v1047_v38  ;;  %v704_v41 = vadd.f32 %v703_v40, %v1351_v42  ;;  %v1121_v44 = vpop.f32.mrb[13].mxu1  ;;  %892 = vst.msk [vmem:[%s1364_s25 + $0x34] sm:$0xf] %vm878_vm4, %v1053_v39 }
 0x1e7   : > { %v706_v45 = vpop.f32.mrb[14].mxu1 }
 0x1e8   : > { %v808_v46 = vmax.f32 %v704_v41, 0.0  ;;  %v707_v47 = vadd.f32 %v706_v45, %v1355_v43  ;;  %v1122_v48 = vpop.f32.mrb[15].mxu1 }
 0x1ea   : > { %v1050_v49 = vpack.c.bf16 %v808_v46, %v808_v46  ;;  %v809_v50 = vmax.f32 %v707_v47, 0.0 }
 0x1ec   : > { %889 = vst.msk [vmem:[%s1364_s25 + $0x28] sm:$0xf] %vm878_vm4, %v1050_v49  ;;  %v1051_v51 = vpack.c.bf16 %v809_v50, %v809_v50 }
 0x1ed   : > { %v791_v52 = vpop.f32.mrb[16].mxu1 }
 0x1ee   : > { %890 = vst.msk [vmem:[%s1364_s25 + $0x2c] sm:$0xf] %vm878_vm4, %v1051_v51  ;;  %v792_v53 = vadd.f32 %v791_v52, %v1351_v42  ;;  %v1133_v54 = vpop.f32.mrb[17].mxu1 }
 0x1ef   : > { %v794_v55 = vpop.f32.mrb[18].mxu1 }
 0x1f0   : > { %v812_v56 = vmax.f32 %v792_v53, 0.0  ;;  %v795_v57 = vadd.f32 %v794_v55, %v1355_v43  ;;  %v1134_v58 = vpop.f32.mrb[19].mxu1 }
 0x1f2   : > { %v1054_v59 = vpack.c.bf16 %v812_v56, %v812_v56  ;;  %v813_v60 = vmax.f32 %v795_v57, 0.0 }
 0x1f4   : > { %893 = vst.msk [vmem:[%s1364_s25 + $0x38] sm:$0xf] %vm878_vm4, %v1054_v59  ;;  %v1055_v61 = vpack.c.bf16 %v813_v60, %v813_v60 }
 0x1f6   : > { %894 = vst.msk [vmem:[%s1364_s25 + $0x3c] sm:$0xf] %vm878_vm4, %v1055_v61 }
 0x1f7 PF: > { %s14_s19 = sadd.s32 1, %s1223_s19   ;;  %s1430_s15 = smov %s1211_s16 }
 0x1f8   : > { %p11_p10 = scmp.ge.s32.totalorder %s14_s19, 4   ;;  %s1431_s16 = smov %s1288_s23 }
 0x1f9   : > { %s1432_s17 = smov %s1219_s18  ;;  %s1433_s18 = smov %s1435_s20 }
 0x1fa   :  { %13 = sbr.rel (!%p11_p10) target bundleno = 3 (0x3), region = 112 }

// kernel: _lambda_.6
= control target key start
LH: loop header
LB: loop body
LE: loop exit
PB: predicated region body
PF: predicated region fallthrough
CT: control target
= control target key end

     0   :  { %s1295_s12 = smov 0   ;;  %s1297_s13 = smov 0   ;;  %s1506_s0 = inlined_call_operand.vmem [shape: bf16[2,16,4,16], index: 0, kind: input, shape index: {}]   ;;  %s1507_s1 = inlined_call_operand.vmem [shape: bf16[8,4], index: 1, kind: input, shape index: {}]   ;;  %s1508_s2 = inlined_call_operand.vmem [shape: f32[8,1], index: 2, kind: input, shape index: {}]   ;;  %s1509_s3 = inlined_call_operand.vmem [shape: bf16[2,16,8,16], index: 3, kind: output, shape index: {}]  }
   0x1   :  { %s1299_s14 = smov 0  }
   0x2 LB: > { %s25_s15 = sadd.s32 1, %s1266_s13  ;;  %p1067_p0 = scmp.ge.s32.totalorder %s1270_s14, 1  ;;  %s1270_s14 = sphi %s1299_s14, %s13_s14   ;;  %s1266_s13 = sphi %s1297_s13, %s1511_s13   ;;  %s1262_s12 = sphi %s1295_s12, %s1510_s12  }
   0x3   : > { %p27_p1 = scmp.ge.s32.totalorder %s25_s15, 2  ;;  %p158_p2 = scmp.lt.s32.totalorder %s1270_s14, 3 }
   0x5   : > { %s1513_s15 = smov (%p27_p1, %s25_s15), 0  ;;  %p159_p3 = pnand %p1067_p0, %p158_p2 }
   0x6   : > { %p191_p4 = scmp.lt.s32.totalorder (!%p159_p3), %s1262_s12, 1  ;;  %v1272_v0 = vmov (!%p159_p3), 0.0   ;;  %v228_v1 = vld [vmem:[%s1508_s2] sm:$0xff] (!%p159_p3)  ;;  %vm1273_vm0 = vmmov (!%p159_p3), 0   ;;  %v1274_v2 = vmov (!%p159_p3), 0   ;;  %vm238_vm1 = vcmask (!%p159_p3), 1041408  }
   0x7   : > { %162 = sbr.rel (%p159_p3) target bundleno = 297 (0x129), region = 32  ;;  %1124 = vmatprep.subr.bf16.mxu0 (!%p159_p3), %v1272_v0  ;;  %1130 = vmatprep.subr.bf16.mxu1 (!%p159_p3), %v1272_v0  ;;  %v1339_v9 = vld [vmem:[%s1507_s1] sm:$0xf] (!%p159_p3)  ;;  %vm234_vm2 = vcmask (!%p159_p3), 31744   ;;  %vm959_vm3 = vcmask (!%p159_p3), 125952  }
   0x8   : > { %1126 = vmatprep.mubr.msk.bf16.mxu0 (!%p159_p3), %vm1273_vm0, %v1272_v0  ;;  %1132 = vmatprep.mubr.msk.bf16.mxu1 (!%p159_p3), %vm1273_vm0, %v1272_v0 }
   0x9   : > { %1247 = vset.pattern.permute.xlu0 (!%p159_p3), %v1274_v2 }
   0xa   : > { %231 = vperm.xlu0 (!%p159_p3), %1247, %v228_v1  }
   0xe   : > { %s1515_s12 = smov (!%p191_p4, %s1262_s12), 1 }
   0xf   : > { %s1090_s18 = sshll.u32 %s1515_s12, 5  ;;  %s1091_s24 = sshll.u32 %s1515_s12, 6 }
  0x10   : > { %s1328_s21 = scalar_lea.vmem %s1506_s0, %s1090_s18  ;;  %s1449_s27 = scalar_lea.vmem %s1509_s3, %s1091_s24 }
  0x11   : > { %v211_v3 = vld [vmem:[%s1328_s21] sm:$0x3]  ;;  %v212_v4 = vld [vmem:[%s1328_s21 + $0x2] sm:$0x3]  ;;  %v213_v5 = vld [vmem:[%s1328_s21 + $0x4] sm:$0x3] }
  0x12   : > { %v240_v6 = vsel %vm238_vm1, %v211_v3, 0  ;;  %v283_v7 = vsel %vm238_vm1, %v212_v4, 0  ;;  %v214_v8 = vld [vmem:[%s1328_s21 + $0x6] sm:$0x3]  ;;  %v326_v10 = vsel %vm238_vm1, %v213_v5, 0 }
  0x13   : > { %1125 = vmatpush3.bf16.msra.mxu0 %v240_v6  ;;  %1131 = vmatpush3.bf16.msra.mxu1 %v283_v7  ;;  %v369_v11 = vsel %vm238_vm1, %v214_v8, 0  ;;  %v215_v12 = vld [vmem:[%s1328_s21 + $0x8] sm:$0x3]  ;;  %v216_v13 = vld [vmem:[%s1328_s21 + $0xa] sm:$0x3] }
  0x14   : > { %1136 = vmatprep.subr.bf16.mxu0 %v1272_v0  ;;  %1142 = vmatprep.subr.bf16.mxu1 %v1272_v0  ;;  %v412_v14 = vsel %vm238_vm1, %v215_v12, 0  ;;  %v455_v15 = vsel %vm238_vm1, %v216_v13, 0  ;;  %v217_v16 = vld [vmem:[%s1328_s21 + $0xc] sm:$0x3]  ;;  %v218_v17 = vld [vmem:[%s1328_s21 + $0xe] sm:$0x3] }
  0x15   : > { %v498_v18 = vsel %vm238_vm1, %v217_v16, 0  ;;  %v541_v19 = vsel %vm238_vm1, %v218_v17, 0  ;;  %v219_v20 = vld [vmem:[%s1328_s21 + $0x10] sm:$0x3]  ;;  %v220_v21 = vld [vmem:[%s1328_s21 + $0x12] sm:$0x3] }
  0x16   : > { %1127 = vmatmul.mubr.msk.bf16.vlgmr.msra.gmra.mrb[0].mxu0 %vm234_vm2, %v1339_v9  ;;  %1133 = vmatmul.mubr.msk.bf16.vlgmr.msra.gmra.mrb[0].mxu1 %vm234_vm2, %v1339_v9  ;;  %v584_v22 = vsel %vm238_vm1, %v219_v20, 0  ;;  %v627_v23 = vsel %vm238_vm1, %v220_v21, 0  ;;  %v221_v24 = vld [vmem:[%s1328_s21 + $0x14] sm:$0x3]  ;;  %v222_v25 = vld [vmem:[%s1328_s21 + $0x16] sm:$0x3] }
  0x17   : > { %1137 = vmatpush3.bf16.msra.mxu0 %v326_v10  ;;  %1143 = vmatpush3.bf16.msra.mxu1 %v369_v11  ;;  %v670_v26 = vsel %vm238_vm1, %v221_v24, 0  ;;  %v713_v27 = vsel %vm238_vm1, %v222_v25, 0  ;;  %v223_v28 = vld [vmem:[%s1328_s21 + $0x18] sm:$0x3]  ;;  %v224_v29 = vld [vmem:[%s1328_s21 + $0x1a] sm:$0x3] }
  0x18   : > { %1138 = vmatprep.mubr.msk.bf16.mxu0 %vm1273_vm0, %v1272_v0  ;;  %1144 = vmatprep.mubr.msk.bf16.mxu1 %vm1273_vm0, %v1272_v0  ;;  %v756_v30 = vsel %vm238_vm1, %v223_v28, 0  ;;  %v799_v31 = vsel %vm238_vm1, %v224_v29, 0  ;;  %v225_v32 = vld [vmem:[%s1328_s21 + $0x1c] sm:$0x3]  ;;  %v226_v33 = vld [vmem:[%s1328_s21 + $0x1e] sm:$0x3] }
  0x19   : > { %1148 = vmatprep.subr.bf16.mxu0 %v1272_v0  ;;  %1154 = vmatprep.subr.bf16.mxu1 %v1272_v0  ;;  %v842_v34 = vsel %vm238_vm1, %v225_v32, 0  ;;  %v885_v35 = vsel %vm238_vm1, %v226_v33, 0 }
  0x1e   : > { %1139 = vmatmul.mubr.msk.bf16.vlgmr.msra.gmra.mrb[4].mxu0 %vm234_vm2, %v1339_v9  ;;  %1145 = vmatmul.mubr.msk.bf16.vlgmr.msra.gmra.mrb[4].mxu1 %vm234_vm2, %v1339_v9 }
  0x1f   : > { %1149 = vmatpush3.bf16.msra.mxu0 %v412_v14  ;;  %1155 = vmatpush3.bf16.msra.mxu1 %v455_v15 }
  0x20   : > { %1150 = vmatprep.mubr.msk.bf16.mxu0 %vm1273_vm0, %v1272_v0  ;;  %1156 = vmatprep.mubr.msk.bf16.mxu1 %vm1273_vm0, %v1272_v0 }
  0x21   : > { %1160 = vmatprep.subr.bf16.mxu0 %v1272_v0  ;;  %1166 = vmatprep.subr.bf16.mxu1 %v1272_v0 }
  0x26   : > { %1151 = vmatmul.mubr.msk.bf16.vlgmr.msra.gmra.mrb[8].mxu0 %vm234_vm2, %v1339_v9  ;;  %1157 = vmatmul.mubr.msk.bf16.vlgmr.msra.gmra.mrb[8].mxu1 %vm234_vm2, %v1339_v9 }
  0x27   : > { %1161 = vmatpush3.bf16.msra.mxu0 %v498_v18  ;;  %1167 = vmatpush3.bf16.msra.mxu1 %v541_v19 }
  0x28   : > { %1162 = vmatprep.mubr.msk.bf16.mxu0 %vm1273_vm0, %v1272_v0  ;;  %1168 = vmatprep.mubr.msk.bf16.mxu1 %vm1273_vm0, %v1272_v0 }
  0x29   : > { %1172 = vmatprep.subr.bf16.mxu0 %v1272_v0  ;;  %1178 = vmatprep.subr.bf16.mxu1 %v1272_v0 }
  0x2e   : > { %1163 = vmatmul.mubr.msk.bf16.vlgmr.msra.gmra.mrb[12].mxu0 %vm234_vm2, %v1339_v9  ;;  %1169 = vmatmul.mubr.msk.bf16.vlgmr.msra.gmra.mrb[12].mxu1 %vm234_vm2, %v1339_v9 }
  0x2f   : > { %1173 = vmatpush3.bf16.msra.mxu0 %v584_v22  ;;  %1179 = vmatpush3.bf16.msra.mxu1 %v627_v23 }
  0x30   : > { %1174 = vmatprep.mubr.msk.bf16.mxu0 %vm1273_vm0, %v1272_v0  ;;  %1180 = vmatprep.mubr.msk.bf16.mxu1 %vm1273_vm0, %v1272_v0 }
  0x31   : > { %1184 = vmatprep.subr.bf16.mxu0 %v1272_v0  ;;  %1190 = vmatprep.subr.bf16.mxu1 %v1272_v0 }
  0x36   : > { %1175 = vmatmul.mubr.msk.bf16.vlgmr.msra.gmra.mrb[16].mxu0 %vm234_vm2, %v1339_v9  ;;  %1181 = vmatmul.mubr.msk.bf16.vlgmr.msra.gmra.mrb[16].mxu1 %vm234_vm2, %v1339_v9 }
  0x37   : > { %1185 = vmatpush3.bf16.msra.mxu0 %v670_v26  ;;  %1191 = vmatpush3.bf16.msra.mxu1 %v713_v27 }
  0x38   : > { %1186 = vmatprep.mubr.msk.bf16.mxu0 %vm1273_vm0, %v1272_v0  ;;  %1192 = vmatprep.mubr.msk.bf16.mxu1 %vm1273_vm0, %v1272_v0 }
  0x39   : > { %1196 = vmatprep.subr.bf16.mxu0 %v1272_v0  ;;  %1202 = vmatprep.subr.bf16.mxu1 %v1272_v0 }
  0x3e   : > { %1187 = vmatmul.mubr.msk.bf16.vlgmr.msra.gmra.mrb[20].mxu0 %vm234_vm2, %v1339_v9  ;;  %1193 = vmatmul.mubr.msk.bf16.vlgmr.msra.gmra.mrb[20].mxu1 %vm234_vm2, %v1339_v9 }
  0x3f   : > { %1197 = vmatpush3.bf16.msra.mxu0 %v756_v30  ;;  %1203 = vmatpush3.bf16.msra.mxu1 %v799_v31 }
  0x40   : > { %1198 = vmatprep.mubr.msk.bf16.mxu0 %vm1273_vm0, %v1272_v0  ;;  %1204 = vmatprep.mubr.msk.bf16.mxu1 %vm1273_vm0, %v1272_v0 }
  0x41   : > { %1208 = vmatprep.subr.bf16.mxu0 %v1272_v0  ;;  %1214 = vmatprep.subr.bf16.mxu1 %v1272_v0 }
  0x46   : > { %1199 = vmatmul.mubr.msk.bf16.vlgmr.msra.gmra.mrb[24].mxu0 %vm234_vm2, %v1339_v9  ;;  %1205 = vmatmul.mubr.msk.bf16.vlgmr.msra.gmra.mrb[24].mxu1 %vm234_vm2, %v1339_v9 }
  0x47   : > { %1209 = vmatpush3.bf16.msra.mxu0 %v842_v34  ;;  %1215 = vmatpush3.bf16.msra.mxu1 %v885_v35 }
  0x48   : > { %1210 = vmatprep.mubr.msk.bf16.mxu0 %vm1273_vm0, %v1272_v0  ;;  %1216 = vmatprep.mubr.msk.bf16.mxu1 %vm1273_vm0, %v1272_v0 }
  0x4e   : > { %1211 = vmatmul.mubr.msk.bf16.vlgmr.msra.gmra.mrb[28].mxu0 %vm234_vm2, %v1339_v9  ;;  %1217 = vmatmul.mubr.msk.bf16.vlgmr.msra.gmra.mrb[28].mxu1 %vm234_vm2, %v1339_v9 }
  0x89   : > { %v1441_v36 = vpop.permute.xlu0 %231 }
  0xe9   : > { %v276_v37 = vpop.f32.mrb[0].mxu0  ;;  %v319_v38 = vpop.f32.mrb[0].mxu1 }
  0xea   : > { %v277_v39 = vadd.f32 %v276_v37, %v1441_v36  ;;  %v320_v40 = vadd.f32 %v319_v38, %v1441_v36  ;;  %v1128_v41 = vpop.f32.mrb[1].mxu0  ;;  %v1134_v42 = vpop.f32.mrb[1].mxu1 }
  0xeb   : > { %v279_v43 = vpop.f32.mrb[2].mxu0  ;;  %v322_v44 = vpop.f32.mrb[2].mxu1 }
  0xec   : > { %v927_v45 = vmax.f32 %v277_v39, 0.0  ;;  %v928_v46 = vmax.f32 %v320_v40, 0.0  ;;  %v1129_v47 = vpop.f32.mrb[3].mxu0  ;;  %v1135_v48 = vpop.f32.mrb[3].mxu1 }
  0xee   : > { %v943_v49 = vpack.c.bf16 %v927_v45, %v927_v45  ;;  %v944_v50 = vpack.c.bf16 %v928_v46, %v928_v46 }
  0xf0   : > { %960 = vst.msk [vmem:[%s1449_s27] sm:$0xf] %vm959_vm3, %v943_v49  ;;  %961 = vst.msk [vmem:[%s1449_s27 + $0x4] sm:$0xf] %vm959_vm3, %v944_v50 }
  0xf1   : > { %v362_v51 = vpop.f32.mrb[4].mxu0  ;;  %v405_v52 = vpop.f32.mrb[4].mxu1 }
  0xf2   : > { %v363_v53 = vadd.f32 %v362_v51, %v1441_v36  ;;  %v406_v54 = vadd.f32 %v405_v52, %v1441_v36  ;;  %v1140_v55 = vpop.f32.mrb[5].mxu0  ;;  %v1146_v56 = vpop.f32.mrb[5].mxu1 }
  0xf3   : > { %v365_v57 = vpop.f32.mrb[6].mxu0  ;;  %v408_v58 = vpop.f32.mrb[6].mxu1 }
  0xf4   : > { %v929_v59 = vmax.f32 %v363_v53, 0.0  ;;  %v930_v60 = vmax.f32 %v406_v54, 0.0  ;;  %v1141_v61 = vpop.f32.mrb[7].mxu0  ;;  %v1147_v62 = vpop.f32.mrb[7].mxu1 }
  0xf6   : > { %v945_v63 = vpack.c.bf16 %v929_v59, %v929_v59  ;;  %v946_v0 = vpack.c.bf16 %v930_v60, %v930_v60 }
  0xf8   : > { %962 = vst.msk [vmem:[%s1449_s27 + $0x8] sm:$0xf] %vm959_vm3, %v945_v63  ;;  %963 = vst.msk [vmem:[%s1449_s27 + $0xc] sm:$0xf] %vm959_vm3, %v946_v0 }
  0xf9   : > { %v448_v1 = vpop.f32.mrb[8].mxu0  ;;  %v491_v2 = vpop.f32.mrb[8].mxu1 }
  0xfa   : > { %v449_v3 = vadd.f32 %v448_v1, %v1441_v36  ;;  %v492_v4 = vadd.f32 %v491_v2, %v1441_v36  ;;  %v1152_v5 = vpop.f32.mrb[9].mxu0  ;;  %v1158_v6 = vpop.f32.mrb[9].mxu1 }
  0xfb   : > { %v451_v7 = vpop.f32.mrb[10].mxu0  ;;  %v494_v8 = vpop.f32.mrb[10].mxu1 }
  0xfc   : > { %v931_v9 = vmax.f32 %v449_v3, 0.0  ;;  %v932_v10 = vmax.f32 %v492_v4, 0.0  ;;  %v1153_v11 = vpop.f32.mrb[11].mxu0  ;;  %v1159_v12 = vpop.f32.mrb[11].mxu1 }
  0xfe   : > { %v947_v13 = vpack.c.bf16 %v931_v9, %v931_v9  ;;  %v948_v14 = vpack.c.bf16 %v932_v10, %v932_v10 }
 0x100   : > { %964 = vst.msk [vmem:[%s1449_s27 + $0x10] sm:$0xf] %vm959_vm3, %v947_v13  ;;  %965 = vst.msk [vmem:[%s1449_s27 + $0x14] sm:$0xf] %vm959_vm3, %v948_v14 }
 0x101   : > { %v534_v15 = vpop.f32.mrb[12].mxu0  ;;  %v577_v16 = vpop.f32.mrb[12].mxu1 }
 0x102   : > { %v535_v17 = vadd.f32 %v534_v15, %v1441_v36  ;;  %v578_v18 = vadd.f32 %v577_v16, %v1441_v36  ;;  %v1164_v19 = vpop.f32.mrb[13].mxu0  ;;  %v1170_v20 = vpop.f32.mrb[13].mxu1 }
 0x103   : > { %v537_v21 = vpop.f32.mrb[14].mxu0  ;;  %v580_v22 = vpop.f32.mrb[14].mxu1 }
 0x104   : > { %v933_v23 = vmax.f32 %v535_v17, 0.0  ;;  %v934_v24 = vmax.f32 %v578_v18, 0.0  ;;  %v1165_v25 = vpop.f32.mrb[15].mxu0  ;;  %v1171_v26 = vpop.f32.mrb[15].mxu1 }
 0x106   : > { %v949_v27 = vpack.c.bf16 %v933_v23, %v933_v23  ;;  %v950_v28 = vpack.c.bf16 %v934_v24, %v934_v24 }
 0x108   : > { %966 = vst.msk [vmem:[%s1449_s27 + $0x18] sm:$0xf] %vm959_vm3, %v949_v27  ;;  %967 = vst.msk [vmem:[%s1449_s27 + $0x1c] sm:$0xf] %vm959_vm3, %v950_v28 }
 0x109   : > { %v620_v29 = vpop.f32.mrb[16].mxu0  ;;  %v663_v30 = vpop.f32.mrb[16].mxu1 }
 0x10a   : > { %v621_v31 = vadd.f32 %v620_v29, %v1441_v36  ;;  %v664_v32 = vadd.f32 %v663_v30, %v1441_v36  ;;  %v1176_v33 = vpop.f32.mrb[17].mxu0  ;;  %v1182_v34 = vpop.f32.mrb[17].mxu1 }
 0x10b   : > { %v623_v35 = vpop.f32.mrb[18].mxu0  ;;  %v666_v37 = vpop.f32.mrb[18].mxu1 }
 0x10c   : > { %v935_v38 = vmax.f32 %v621_v31, 0.0  ;;  %v936_v39 = vmax.f32 %v664_v32, 0.0  ;;  %v1177_v40 = vpop.f32.mrb[19].mxu0  ;;  %v1183_v41 = vpop.f32.mrb[19].mxu1 }
 0x10e   : > { %v951_v42 = vpack.c.bf16 %v935_v38, %v935_v38  ;;  %v952_v43 = vpack.c.bf16 %v936_v39, %v936_v39 }
 0x110   : > { %968 = vst.msk [vmem:[%s1449_s27 + $0x20] sm:$0xf] %vm959_vm3, %v951_v42  ;;  %969 = vst.msk [vmem:[%s1449_s27 + $0x24] sm:$0xf] %vm959_vm3, %v952_v43 }
 0x111   : > { %v706_v44 = vpop.f32.mrb[20].mxu0  ;;  %v749_v45 = vpop.f32.mrb[20].mxu1 }
 0x112   : > { %v707_v46 = vadd.f32 %v706_v44, %v1441_v36  ;;  %v750_v47 = vadd.f32 %v749_v45, %v1441_v36  ;;  %v1188_v48 = vpop.f32.mrb[21].mxu0  ;;  %v1194_v49 = vpop.f32.mrb[21].mxu1 }
 0x113   : > { %v709_v50 = vpop.f32.mrb[22].mxu0  ;;  %v752_v51 = vpop.f32.mrb[22].mxu1 }
 0x114   : > { %v937_v52 = vmax.f32 %v707_v46, 0.0  ;;  %v938_v53 = vmax.f32 %v750_v47, 0.0  ;;  %v1189_v54 = vpop.f32.mrb[23].mxu0  ;;  %v1195_v55 = vpop.f32.mrb[23].mxu1 }
 0x116   : > { %v953_v56 = vpack.c.bf16 %v937_v52, %v937_v52  ;;  %v954_v57 = vpack.c.bf16 %v938_v53, %v938_v53 }
 0x118   : > { %970 = vst.msk [vmem:[%s1449_s27 + $0x28] sm:$0xf] %vm959_vm3, %v953_v56  ;;  %971 = vst.msk [vmem:[%s1449_s27 + $0x2c] sm:$0xf] %vm959_vm3, %v954_v57 }
 0x119   : > { %v792_v58 = vpop.f32.mrb[24].mxu0  ;;  %v835_v59 = vpop.f32.mrb[24].mxu1 }
 0x11a   : > { %v793_v60 = vadd.f32 %v792_v58, %v1441_v36  ;;  %v836_v61 = vadd.f32 %v835_v59, %v1441_v36  ;;  %v1200_v62 = vpop.f32.mrb[25].mxu0  ;;  %v1206_v63 = vpop.f32.mrb[25].mxu1 }
 0x11b   : > { %v795_v0 = vpop.f32.mrb[26].mxu0  ;;  %v838_v1 = vpop.f32.mrb[26].mxu1 }
 0x11c   : > { %v939_v2 = vmax.f32 %v793_v60, 0.0  ;;  %v940_v3 = vmax.f32 %v836_v61, 0.0  ;;  %v1201_v4 = vpop.f32.mrb[27].mxu0  ;;  %v1207_v5 = vpop.f32.mrb[27].mxu1 }
 0x11e   : > { %v955_v6 = vpack.c.bf16 %v939_v2, %v939_v2  ;;  %v956_v7 = vpack.c.bf16 %v940_v3, %v940_v3 }
 0x120   : > { %972 = vst.msk [vmem:[%s1449_s27 + $0x30] sm:$0xf] %vm959_vm3, %v955_v6  ;;  %973 = vst.msk [vmem:[%s1449_s27 + $0x34] sm:$0xf] %vm959_vm3, %v956_v7 }
 0x121   : > { %v878_v8 = vpop.f32.mrb[28].mxu0  ;;  %v921_v9 = vpop.f32.mrb[28].mxu1 }
 0x122   : > { %v879_v10 = vadd.f32 %v878_v8, %v1441_v36  ;;  %v922_v11 = vadd.f32 %v921_v9, %v1441_v36  ;;  %v1212_v12 = vpop.f32.mrb[29].mxu0  ;;  %v1218_v13 = vpop.f32.mrb[29].mxu1 }
 0x123   : > { %v881_v14 = vpop.f32.mrb[30].mxu0  ;;  %v924_v15 = vpop.f32.mrb[30].mxu1 }
 0x124   : > { %v941_v16 = vmax.f32 %v879_v10, 0.0  ;;  %v942_v17 = vmax.f32 %v922_v11, 0.0  ;;  %v1213_v18 = vpop.f32.mrb[31].mxu0  ;;  %v1219_v19 = vpop.f32.mrb[31].mxu1 }
 0x126   : > { %v957_v20 = vpack.c.bf16 %v941_v16, %v941_v16  ;;  %v958_v21 = vpack.c.bf16 %v942_v17, %v942_v17 }
 0x128   : > { %974 = vst.msk [vmem:[%s1449_s27 + $0x38] sm:$0xf] %vm959_vm3, %v957_v20  ;;  %975 = vst.msk [vmem:[%s1449_s27 + $0x3c] sm:$0xf] %vm959_vm3, %v958_v21 }
 0x129 PF: > { %s13_s14 = sadd.s32 1, %s1270_s14   ;;  %s1510_s12 = smov %s1266_s13 }
 0x12a   : > { %p10_p5 = scmp.ge.s32.totalorder %s13_s14, 4   ;;  %s1511_s13 = smov %s1513_s15 }
 0x12c   :  { %12 = sbr.rel (!%p10_p5) target bundleno = 2 (0x2), region = 62 }

// kernel: _lambda_.8
= control target key start
LH: loop header
LB: loop body
LE: loop exit
PB: predicated region body
PF: predicated region fallthrough
CT: control target
= control target key end

     0   :  { %s1081_s15 = smov 0   ;;  %s1083_s16 = smov 0   ;;  %s1234_s0 = inlined_call_operand.vmem [shape: bf16[2,4,2,16,8], index: 0, kind: input, shape index: {}]   ;;  %s1235_s1 = inlined_call_operand.vmem [shape: bf16[8,4], index: 1, kind: input, shape index: {}]   ;;  %s1236_s2 = inlined_call_operand.vmem [shape: bf16[32,16], index: 2, kind: input, shape index: {}]   ;;  %s1237_s3 = inlined_call_operand.vmem [shape: f32[32,1], index: 3, kind: input, shape index: {}]   ;;  %s1238_s4 = inlined_call_operand.vmem [shape: bf16[2,4,32,4], index: 4, kind: output, shape index: {}]  }
   0x1   :  { %s1085_s17 = smov 0   ;;  %s1087_s18 = smov 0  }
   0x2   :  { %s1089_s19 = smov 0  }
   0x3 LB: > { %s26_s20 = sadd.s32 1, %s1049_s18  ;;  %p42_p1 = scmp.ne.s32.totalorder %s1041_s16, %s1037_s15  ;;  %s1053_s19 = sphi %s1089_s19, %s14_s19   ;;  %s1049_s18 = sphi %s1087_s18, %s1242_s18   ;;  %s1045_s17 = sphi %s1085_s17, %s1241_s17   ;;  %s1041_s16 = sphi %s1083_s16, %s1240_s16   ;;  %s1037_s15 = sphi %s1081_s15, %s1239_s15  }
   0x4   : > { %p28_p0 = scmp.ge.s32.totalorder %s26_s20, 2  ;;  %p43_p2 = scmp.eq.s32.totalorder %s1053_s19, 0 }
   0x5   : > { %s35_s22 = sadd.s32 1, %s1041_s16  ;;  %p852_p5 = scmp.ge.s32.totalorder %s1053_s19, 2 }
   0x6   : > { %s1244_s20 = smov (%p28_p0, %s26_s20), 0  ;;  %p44_p3 = por %p43_p2, %p42_p1 }
   0x7   : > { %s30_s21 = ssub.s32 %s1049_s18, %s1244_s20  ;;  %168 = sbr.rel (%p852_p5) target bundleno = 21 (0x15), region = 28 }
   0x8   : > { %p33_p4 = scmp.eq.s32.totalorder %s30_s21, 0 }
   0xa   : > { %s1116_s23 = scalar_select %p33_p4, %s1041_s16, %s35_s22  }
   0xe   : > { %171 = sbr.rel (!%p44_p3) target bundleno = 21 (0x15), region = 32  ;;  %s173_s24 = sand.u32 (%p44_p3), 1, %s1041_s16  }
   0xf   : > { %s896_s25 = sshll.u32 (%p44_p3), %s1049_s18, 6  ;;  %s853_s26 = sshll.u32 (%p44_p3), %s173_s24, 5 }
  0x10   : > { %s181_s29 = scalar_lea.vmem (%p44_p3), %s1234_s0, %s896_s25  ;;  %s175_s30 = scalar_lea.vmem (%p44_p3), [#allocation2], %s853_s26 }
  0x11   : > { %v197_v0 = vld [vmem:[%s181_s29] sm:$0xff] (%p44_p3)   ;;  %v201_v1 = vld [vmem:[%s181_s29 + $0x10] sm:$0xff] (%p44_p3)  }
  0x12   : > { %v205_v2 = vld [vmem:[%s181_s29 + $0x20] sm:$0xff] (%p44_p3)   ;;  %198 = vst [vmem:[%s175_s30] sm:$0xff] (%p44_p3), %v197_v0   ;;  %202 = vst [vmem:[%s175_s30 + $0x8] sm:$0xff] (%p44_p3), %v201_v1   ;;  %v209_v3 = vld [vmem:[%s181_s29 + $0x30] sm:$0xff] (%p44_p3)  }
  0x13   : > { %206 = vst [vmem:[%s175_s30 + $0x10] sm:$0xff] (%p44_p3), %v205_v2   ;;  %210 = vst [vmem:[%s175_s30 + $0x18] sm:$0xff] (%p44_p3), %v209_v3  }
  0x15 PF: > { %p856_p6 = scmp.ge.s32.totalorder %s1053_s19, 1  ;;  %p250_p7 = scmp.lt.s32.totalorder %s1053_s19, 3 }
  0x17   : > { %p251_p8 = pnand %p856_p6, %p250_p7 }
  0x18   : > { %v308_v4 = vld [vmem:[%s1235_s1] sm:$0xf] (!%p251_p8)  ;;  %vm342_vm0 = vcmask (!%p251_p8), 1043456   ;;  %s257_s7 = sand.u32 (!%p251_p8), 1, %s1037_s15   ;;  %vm329_vm1 = vcmask (!%p251_p8), 64512   ;;  %vm453_vm2 = vcmask (!%p251_p8), 130048  }
  0x19   : > { %254 = sbr.rel (%p251_p8) target bundleno = 488 (0x1e8), region = 73  ;;  %965 = vmatprep.subr.msk.bf16.mxu0 (!%p251_p8), %vm342_vm0, %v308_v4  ;;  %v344_v5 = vsel (!%p251_p8), %vm342_vm0, %v308_v4, 0  ;;  %s857_s8 = sshll.u32 (!%p251_p8), %s257_s7, 5  ;;  %v1013_v10 = vld [vmem:[%s1236_s2] sm:$0xff] (!%p251_p8)   ;;  %v421_v11 = vld [vmem:[%s1237_s3 + $0x10] sm:$0xff] (!%p251_p8)  ;;  %v1055_v13 = vmov (!%p251_p8), 0  }
  0x1a   : > { %932 = vmatpush3.bf16.msra.mxu0 (!%p251_p8), %v344_v5  ;;  %s259_s9 = scalar_lea.vmem (!%p251_p8), [#allocation2], %s857_s8  ;;  %943 = vmatprep.mubr.msk.bf16.mxu1 (!%p251_p8), %vm453_vm2, %v1013_v10  ;;  %v419_v12 = vld [vmem:[%s1237_s3] sm:$0xff] (!%p251_p8)  ;;  %v422_v14 = vld [vmem:[%s1237_s3 + $0x18] sm:$0xff] (!%p251_p8)  ;;  %v420_v15 = vld [vmem:[%s1237_s3 + $0x8] sm:$0xff] (!%p251_p8)  ;;  %p289_p9 = scmp.lt.s32.totalorder (!%p251_p8), %s1045_s17, 1  ;;  %vm736_vm3 = vcmask (!%p251_p8), 27648  }
  0x1b   : > { %v1009_v6 = vld [vmem:[%s259_s9] sm:$0xff] (!%p251_p8)   ;;  %v1010_v7 = vld [vmem:[%s259_s9 + $0x8] sm:$0xff] (!%p251_p8)   ;;  %v1011_v8 = vld [vmem:[%s259_s9 + $0x10] sm:$0xff] (!%p251_p8)   ;;  %1008 = vset.pattern.permute.xlu1 (!%p251_p8), %v1055_v13  ;;  %1007 = vset.pattern.permute.xlu0 (!%p251_p8), %v1055_v13 }
  0x1c   : > { %933 = vmatprep.mubr.msk.bf16.mxu0 (!%p251_p8), %vm329_vm1, %v1009_v6  ;;  %v1012_v9 = vld [vmem:[%s259_s9 + $0x18] sm:$0xff] (!%p251_p8)   ;;  %435 = vperm.xlu1 (!%p251_p8), %1008, %v421_v11   ;;  %v1014_v22 = vld [vmem:[%s1236_s2 + $0x8] sm:$0xff] (!%p251_p8)  }
  0x1d   : > { %934 = vmatmul.mubr.msk.bf16.vlgmr.msra.gmra.mrb[0].mxu0 (!%p251_p8), %vm329_vm1, %v1010_v7  ;;  %425 = vperm.xlu0 (!%p251_p8), %1007, %v419_v12  }
  0x1e   : > { %937 = vmatprep.mubr.msk.bf16.mxu0 (!%p251_p8), %vm329_vm1, %v1011_v8 }
  0x20   : > { %440 = vperm.xlu1 %1008, %v422_v14   ;;  %s1246_s17 = smov (!%p289_p9, %s1045_s17), 1 }
  0x21   : > { %430 = vperm.xlu0 %1007, %v420_v15   ;;  %s897_s28 = sshll.u32 %s1246_s17, 6 }
  0x22   : > { %s1172_s5 = scalar_lea.vmem %s1238_s4, %s897_s28 }
  0x25   : > { %938 = vmatmul.mubr.msk.bf16.gmra.mrb[4].mxu0 %vm329_vm1, %v1012_v9 }
  0x26   : > { %955 = vmatprep.mubr.msk.bf16.mxu0 %vm453_vm2, %v1013_v10 }
  0x9b   : > { %v1157_v29 = vpop.permute.xlu1 %435 }
  0x9c   : > { %v1159_v30 = vpop.permute.xlu0 %425 }
  0x9f   : > { %v1162_v32 = vpop.permute.xlu1 %440 }
  0xa0   : > { %v1165_v35 = vpop.permute.xlu0 %430 }
  0xf0   : > { %v935_v16 = vpop.f32.mrb[0].mxu0 }
  0xf1   : > { %v380_v17 = vpop.f32.mrb[1].mxu0 }
  0xf2   : > { %v936_v18 = vpop.f32.mrb[2].mxu0 }
  0xf3   : > { %v412_v19 = vpack.c.bf16 %v936_v18, %v935_v16  ;;  %v383_v20 = vpop.f32.mrb[3].mxu0 }
  0xf4   : > { %v411_v21 = vpack.c.bf16 %v383_v20, %v380_v17 }
  0xf6   : > { %941 = vmatprep.subr.bf16.mxu1 %v411_v21 }
  0xf7   : > { %942 = vmatpush3.bf16.msra.mxu1 %v411_v21 }
  0xf8   : > { %v939_v23 = vpop.f32.mrb[4].mxu0  ;;  %947 = vmatprep.subr.bf16.mxu1 %v412_v19 }
  0xf9   : > { %v396_v24 = vpop.f32.mrb[5].mxu0 }
  0xfa   : > { %v940_v25 = vpop.f32.mrb[6].mxu0  ;;  %944 = vmatmul.mubr.msk.bf16.vlgmr.msra.gmra.mrb[0].mxu1 %vm453_vm2, %v1014_v22 }
  0xfb   : > { %v414_v26 = vpack.c.bf16 %v940_v25, %v939_v23  ;;  %v399_v27 = vpop.f32.mrb[7].mxu0  ;;  %948 = vmatpush3.bf16.msra.mxu1 %v412_v19  ;;  %949 = vmatprep.mubr.msk.bf16.mxu1 %vm453_vm2, %v1013_v10 }
  0xfc   : > { %v413_v28 = vpack.c.bf16 %v399_v27, %v396_v24 }
  0xfd   : > { %959 = vmatprep.subr.bf16.mxu1 %v414_v26 }
  0xfe   : > { %953 = vmatprep.subr.bf16.mxu0 %v413_v28 }
  0xff   : > { %954 = vmatpush3.bf16.msra.mxu0 %v413_v28 }
 0x102   : > { %950 = vmatmul.mubr.msk.bf16.vlgmr.msra.gmra.mrb[4].mxu1 %vm453_vm2, %v1014_v22  ;;  %956 = vmatmul.mubr.msk.bf16.vlgmr.msra.gmra.mrb[8].mxu0 %vm453_vm2, %v1014_v22 }
 0x103   : > { %960 = vmatpush3.bf16.msra.mxu1 %v414_v26  ;;  %961 = vmatprep.mubr.msk.bf16.mxu1 %vm453_vm2, %v1013_v10 }
 0x10a   : > { %962 = vmatmul.mubr.msk.bf16.vlgmr.msra.gmra.mrb[8].mxu1 %vm453_vm2, %v1014_v22 }
 0x1cd   : > { %v945_v31 = vpop.f32.mrb[0].mxu1 }
 0x1ce   : > { %v503_v33 = vadd.f32 %v945_v31, %v1157_v29  ;;  %v494_v34 = vpop.f32.mrb[1].mxu1 }
 0x1cf   : > { %v495_v36 = vadd.f32 %v494_v34, %v1159_v30  ;;  %v946_v37 = vpop.f32.mrb[2].mxu1 }
 0x1d0   : > { %v658_v38 = vmax.f32 %v503_v33, 0.0  ;;  %v506_v39 = vadd.f32 %v946_v37, %v1162_v32  ;;  %v497_v40 = vpop.f32.mrb[3].mxu1 }
 0x1d1   : > { %v656_v41 = vmax.f32 %v495_v36, 0.0  ;;  %v498_v42 = vadd.f32 %v497_v40, %v1165_v35 }
 0x1d2   : > { %v900_v43 = vpack.c.bf16 %v658_v38, %v658_v38  ;;  %v659_v44 = vmax.f32 %v506_v39, 0.0 }
 0x1d3   : > { %v898_v45 = vpack.c.bf16 %v656_v41, %v656_v41  ;;  %v657_v46 = vmax.f32 %v498_v42, 0.0 }
 0x1d4   : > { %739 = vst.msk [vmem:[%s1172_s5 + $0x8] sm:$0xf] %vm736_vm3, %v900_v43  ;;  %v901_v47 = vpack.c.bf16 %v659_v44, %v659_v44 }
 0x1d5   : > { %737 = vst.msk [vmem:[%s1172_s5] sm:$0xf] %vm736_vm3, %v898_v45  ;;  %v899_v48 = vpack.c.bf16 %v657_v46, %v657_v46  ;;  %v951_v49 = vpop.f32.mrb[4].mxu1  ;;  %v957_v50 = vpop.f32.mrb[8].mxu0 }
 0x1d6   : > { %740 = vst.msk [vmem:[%s1172_s5 + $0xc] sm:$0xf] %vm736_vm3, %v901_v47  ;;  %v552_v51 = vadd.f32 %v951_v49, %v1157_v29  ;;  %v543_v52 = vpop.f32.mrb[5].mxu1  ;;  %v601_v53 = vadd.f32 %v957_v50, %v1157_v29  ;;  %v592_v54 = vpop.f32.mrb[9].mxu0 }
 0x1d7   : > { %738 = vst.msk [vmem:[%s1172_s5 + $0x4] sm:$0xf] %vm736_vm3, %v899_v48  ;;  %v544_v55 = vadd.f32 %v543_v52, %v1159_v30  ;;  %v952_v56 = vpop.f32.mrb[6].mxu1  ;;  %v593_v57 = vadd.f32 %v592_v54, %v1159_v30  ;;  %v958_v58 = vpop.f32.mrb[10].mxu0 }
 0x1d8   : > { %v662_v59 = vmax.f32 %v552_v51, 0.0  ;;  %v555_v60 = vadd.f32 %v952_v56, %v1162_v32  ;;  %v546_v61 = vpop.f32.mrb[7].mxu1  ;;  %v666_v62 = vmax.f32 %v601_v53, 0.0  ;;  %v604_v63 = vadd.f32 %v958_v58, %v1162_v32  ;;  %v595_v0 = vpop.f32.mrb[11].mxu0 }
 0x1d9   : > { %v660_v1 = vmax.f32 %v544_v55, 0.0  ;;  %v547_v2 = vadd.f32 %v546_v61, %v1165_v35  ;;  %v664_v3 = vmax.f32 %v593_v57, 0.0  ;;  %v596_v4 = vadd.f32 %v595_v0, %v1165_v35 }
 0x1da   : > { %v904_v5 = vpack.c.bf16 %v662_v59, %v662_v59  ;;  %v663_v6 = vmax.f32 %v555_v60, 0.0  ;;  %v908_v7 = vpack.c.bf16 %v666_v62, %v666_v62  ;;  %v667_v8 = vmax.f32 %v604_v63, 0.0 }
 0x1db   : > { %v902_v9 = vpack.c.bf16 %v660_v1, %v660_v1  ;;  %v661_v10 = vmax.f32 %v547_v2, 0.0  ;;  %v906_v11 = vpack.c.bf16 %v664_v3, %v664_v3  ;;  %v665_v12 = vmax.f32 %v596_v4, 0.0 }
 0x1dc   : > { %743 = vst.msk [vmem:[%s1172_s5 + $0x18] sm:$0xf] %vm736_vm3, %v904_v5  ;;  %v905_v13 = vpack.c.bf16 %v663_v6, %v663_v6  ;;  %747 = vst.msk [vmem:[%s1172_s5 + $0x28] sm:$0xf] %vm736_vm3, %v908_v7  ;;  %v909_v14 = vpack.c.bf16 %v667_v8, %v667_v8 }
 0x1dd   : > { %741 = vst.msk [vmem:[%s1172_s5 + $0x10] sm:$0xf] %vm736_vm3, %v902_v9  ;;  %v903_v15 = vpack.c.bf16 %v661_v10, %v661_v10  ;;  %v963_v16 = vpop.f32.mrb[8].mxu1  ;;  %745 = vst.msk [vmem:[%s1172_s5 + $0x20] sm:$0xf] %vm736_vm3, %v906_v11  ;;  %v907_v17 = vpack.c.bf16 %v665_v12, %v665_v12 }
 0x1de   : > { %744 = vst.msk [vmem:[%s1172_s5 + $0x1c] sm:$0xf] %vm736_vm3, %v905_v13  ;;  %v650_v18 = vadd.f32 %v963_v16, %v1157_v29  ;;  %v641_v19 = vpop.f32.mrb[9].mxu1  ;;  %748 = vst.msk [vmem:[%s1172_s5 + $0x2c] sm:$0xf] %vm736_vm3, %v909_v14 }
 0x1df   : > { %742 = vst.msk [vmem:[%s1172_s5 + $0x14] sm:$0xf] %vm736_vm3, %v903_v15  ;;  %v642_v20 = vadd.f32 %v641_v19, %v1159_v30  ;;  %v964_v21 = vpop.f32.mrb[10].mxu1  ;;  %746 = vst.msk [vmem:[%s1172_s5 + $0x24] sm:$0xf] %vm736_vm3, %v907_v17 }
 0x1e0   : > { %v670_v22 = vmax.f32 %v650_v18, 0.0  ;;  %v653_v23 = vadd.f32 %v964_v21, %v1162_v32  ;;  %v644_v24 = vpop.f32.mrb[11].mxu1 }
 0x1e1   : > { %v668_v25 = vmax.f32 %v642_v20, 0.0  ;;  %v645_v26 = vadd.f32 %v644_v24, %v1165_v35 }
 0x1e2   : > { %v912_v27 = vpack.c.bf16 %v670_v22, %v670_v22  ;;  %v671_v28 = vmax.f32 %v653_v23, 0.0 }
 0x1e3   : > { %v910_v29 = vpack.c.bf16 %v668_v25, %v668_v25  ;;  %v669_v31 = vmax.f32 %v645_v26, 0.0 }
 0x1e4   : > { %751 = vst.msk [vmem:[%s1172_s5 + $0x38] sm:$0xf] %vm736_vm3, %v912_v27  ;;  %v913_v33 = vpack.c.bf16 %v671_v28, %v671_v28 }
 0x1e5   : > { %749 = vst.msk [vmem:[%s1172_s5 + $0x30] sm:$0xf] %vm736_vm3, %v910_v29  ;;  %v911_v30 = vpack.c.bf16 %v669_v31, %v669_v31 }
 0x1e6   : > { %752 = vst.msk [vmem:[%s1172_s5 + $0x3c] sm:$0xf] %vm736_vm3, %v913_v33 }
 0x1e7   : > { %750 = vst.msk [vmem:[%s1172_s5 + $0x34] sm:$0xf] %vm736_vm3, %v911_v30 }
 0x1e8 PF: > { %s14_s19 = sadd.s32 1, %s1053_s19   ;;  %s1239_s15 = smov %s1041_s16 }
 0x1e9   : > { %p11_p10 = scmp.ge.s32.totalorder %s14_s19, 4   ;;  %s1240_s16 = smov %s1116_s23 }
 0x1ea   : > { %s1241_s17 = smov %s1049_s18  ;;  %s1242_s18 = smov %s1244_s20 }
 0x1eb   :  { %13 = sbr.rel (!%p11_p10) target bundleno = 3 (0x3), region = 112 }

// kernel: _lambda_.10
= control target key start
LH: loop header
LB: loop body
LE: loop exit
PB: predicated region body
PF: predicated region fallthrough
CT: control target
= control target key end

     0   :  { %s1628_s18 = smov 0   ;;  %s1630_s19 = smov 0   ;;  %s1843_s0 = inlined_call_operand.vmem [shape: bf16[2,8,16,8], index: 0, kind: input, shape index: {}]   ;;  %s1844_s1 = inlined_call_operand.vmem [shape: bf16[2,4,32,4], index: 1, kind: input, shape index: {}]   ;;  %s1845_s2 = inlined_call_operand.vmem [shape: bf16[4,8], index: 2, kind: input, shape index: {}]   ;;  %s1846_s3 = inlined_call_operand.vmem [shape: bf16[32,16], index: 3, kind: input, shape index: {}]   ;;  %s1847_s4 = inlined_call_operand.vmem [shape: f32[32,1], index: 4, kind: input, shape index: {}]   ;;  %s1848_s5 = inlined_call_operand.vmem [shape: bf16[2,8,32,8], index: 5, kind: output, shape index: {}]  }
   0x1   :  { %s1632_s20 = smov 0  }
   0x2 LB: > { %s27_s21 = sadd.s32 1, %s1591_s19  ;;  %p1307_p0 = scmp.ge.s32.totalorder %s1595_s20, 1  ;;  %s1595_s20 = sphi %s1632_s20, %s15_s20   ;;  %s1591_s19 = sphi %s1630_s19, %s1850_s19   ;;  %s1587_s18 = sphi %s1628_s18, %s1849_s18  }
   0x3   : > { %p29_p1 = scmp.ge.s32.totalorder %s27_s21, 2  ;;  %p227_p2 = scmp.lt.s32.totalorder %s1595_s20, 3 }
   0x5   : > { %s1852_s21 = smov (%p29_p1, %s27_s21), 0  ;;  %p228_p3 = pnand %p1307_p0, %p227_p2 }
   0x6   : > { %p276_p4 = scmp.lt.s32.totalorder (!%p228_p3), %s1587_s18, 1  ;;  %v1557_v0 = vld [vmem:[%s1846_s3] sm:$0xff] (!%p228_p3)   ;;  %vm369_vm0 = vcmask (!%p228_p3), 130048   ;;  %v1597_v1 = vmov (!%p228_p3), 0   ;;  %v331_v2 = vld [vmem:[%s1847_s4 + $0x10] sm:$0xff] (!%p228_p3)  ;;  %v332_v4 = vld [vmem:[%s1847_s4 + $0x18] sm:$0xff] (!%p228_p3) }
   0x7   : > { %231 = sbr.rel (%p228_p3) target bundleno = 288 (0x120), region = 40  ;;  %1460 = vmatprep.mubr.msk.bf16.mxu0 (!%p228_p3), %vm369_vm0, %v1557_v0  ;;  %1466 = vmatprep.mubr.msk.bf16.mxu1 (!%p228_p3), %vm369_vm0, %v1557_v0  ;;  %v329_v3 = vld [vmem:[%s1847_s4] sm:$0xff] (!%p228_p3)  ;;  %v1558_v6 = vld [vmem:[%s1846_s3 + $0x8] sm:$0xff] (!%p228_p3)   ;;  %vm892_vm1 = vcmask (!%p228_p3), 1041408   ;;  %vm867_vm2 = vcmask (!%p228_p3), 31744   ;;  %vm1153_vm3 = vcmask (!%p228_p3), 60416  }
   0x8   : > { %1554 = vset.pattern.permute.xlu1 (!%p228_p3), %v1597_v1  ;;  %1553 = vset.pattern.permute.xlu0 (!%p228_p3), %v1597_v1  ;;  %v330_v7 = vld [vmem:[%s1847_s4 + $0x8] sm:$0xff] (!%p228_p3)  ;;  %v826_v15 = vld [vmem:[%s1845_s2] sm:$0x3] (!%p228_p3) }
   0x9   : > { %345 = vperm.xlu1 (!%p228_p3), %1554, %v331_v2   ;;  %335 = vperm.xlu0 (!%p228_p3), %1553, %v329_v3   ;;  %v894_v16 = vsel (!%p228_p3), %vm892_vm1, %v826_v15, 0 }
   0xd   : > { %350 = vperm.xlu1 (!%p228_p3), %1554, %v332_v4   ;;  %340 = vperm.xlu0 (!%p228_p3), %1553, %v330_v7  }
   0xe   : > { %s1854_s18 = smov (!%p276_p4, %s1587_s18), 1 }
   0xf   : > { %s1390_s28 = sshll.u32 %s1854_s18, 6  ;;  %s1392_s22 = sshll.u32 %s1854_s18, 7 }
  0x10   : > { %s284_s6 = scalar_lea.vmem %s1843_s0, %s1390_s28  ;;  %s1676_s15 = scalar_lea.vmem %s1844_s1, %s1390_s28 }
  0x11   : > { %v1555_v5 = vld [vmem:[%s284_s6] sm:$0xff]   ;;  %v1556_v8 = vld [vmem:[%s284_s6 + $0x8] sm:$0xff]   ;;  %v1559_v9 = vld [vmem:[%s284_s6 + $0x10] sm:$0xff]   ;;  %s1750_s24 = scalar_lea.vmem %s1848_s5, %s1392_s22 }
  0x12   : > { %1458 = vmatprep.subr.bf16.mxu0 %v1555_v5  ;;  %1464 = vmatprep.subr.bf16.mxu1 %v1556_v8  ;;  %v1560_v10 = vld [vmem:[%s284_s6 + $0x18] sm:$0xff]   ;;  %v1561_v11 = vld [vmem:[%s284_s6 + $0x20] sm:$0xff]   ;;  %v1562_v12 = vld [vmem:[%s284_s6 + $0x28] sm:$0xff]  }
  0x13   : > { %1459 = vmatpush3.bf16.msra.mxu0 %v1555_v5  ;;  %1465 = vmatpush3.bf16.msra.mxu1 %v1556_v8  ;;  %v1563_v13 = vld [vmem:[%s284_s6 + $0x30] sm:$0xff]   ;;  %v1564_v14 = vld [vmem:[%s284_s6 + $0x38] sm:$0xff]   ;;  %v1565_v17 = vld [vmem:[%s1676_s15] sm:$0xff]  }
  0x14   : > { %1470 = vmatprep.subr.bf16.mxu0 %v1559_v9  ;;  %1476 = vmatprep.subr.bf16.mxu1 %v1560_v10  ;;  %v1566_v18 = vld [vmem:[%s1676_s15 + $0x20] sm:$0xff]   ;;  %v1567_v19 = vld [vmem:[%s1676_s15 + $0x8] sm:$0xff]   ;;  %v1569_v21 = vld [vmem:[%s1676_s15 + $0x10] sm:$0xff]  }
  0x15   : > { %v1568_v20 = vld [vmem:[%s1676_s15 + $0x28] sm:$0xff]   ;;  %v1570_v22 = vld [vmem:[%s1676_s15 + $0x30] sm:$0xff]   ;;  %v1571_v23 = vld [vmem:[%s1676_s15 + $0x18] sm:$0xff]  }
  0x16   : > { %1461 = vmatmul.mubr.msk.bf16.vlgmr.msra.gmra.mrb[0].mxu0 %vm369_vm0, %v1558_v6  ;;  %1467 = vmatmul.mubr.msk.bf16.vlgmr.msra.gmra.mrb[0].mxu1 %vm369_vm0, %v1558_v6  ;;  %v1572_v24 = vld [vmem:[%s1676_s15 + $0x38] sm:$0xff]  }
  0x17   : > { %1471 = vmatpush3.bf16.msra.mxu0 %v1559_v9  ;;  %1477 = vmatpush3.bf16.msra.mxu1 %v1560_v10 }
  0x18   : > { %1472 = vmatprep.mubr.msk.bf16.mxu0 %vm369_vm0, %v1557_v0  ;;  %1478 = vmatprep.mubr.msk.bf16.mxu1 %vm369_vm0, %v1557_v0 }
  0x19   : > { %1482 = vmatprep.subr.bf16.mxu0 %v1561_v11  ;;  %1488 = vmatprep.subr.bf16.mxu1 %v1562_v12 }
  0x1e   : > { %1473 = vmatmul.mubr.msk.bf16.vlgmr.msra.gmra.mrb[4].mxu0 %vm369_vm0, %v1558_v6  ;;  %1479 = vmatmul.mubr.msk.bf16.vlgmr.msra.gmra.mrb[4].mxu1 %vm369_vm0, %v1558_v6 }
  0x1f   : > { %1483 = vmatpush3.bf16.msra.mxu0 %v1561_v11  ;;  %1489 = vmatpush3.bf16.msra.mxu1 %v1562_v12 }
  0x20   : > { %1484 = vmatprep.mubr.msk.bf16.mxu0 %vm369_vm0, %v1557_v0  ;;  %1490 = vmatprep.mubr.msk.bf16.mxu1 %vm369_vm0, %v1557_v0 }
  0x21   : > { %1494 = vmatprep.subr.bf16.mxu0 %v1563_v13  ;;  %1500 = vmatprep.subr.bf16.mxu1 %v1564_v14 }
  0x26   : > { %1485 = vmatmul.mubr.msk.bf16.vlgmr.msra.gmra.mrb[8].mxu0 %vm369_vm0, %v1558_v6  ;;  %1491 = vmatmul.mubr.msk.bf16.vlgmr.msra.gmra.mrb[8].mxu1 %vm369_vm0, %v1558_v6 }
  0x27   : > { %1495 = vmatpush3.bf16.msra.mxu0 %v1563_v13  ;;  %1501 = vmatpush3.bf16.msra.mxu1 %v1564_v14 }
  0x28   : > { %1496 = vmatprep.mubr.msk.bf16.mxu0 %vm369_vm0, %v1557_v0  ;;  %1502 = vmatprep.mubr.msk.bf16.mxu1 %vm369_vm0, %v1557_v0 }
  0x29   : > { %1526 = vmatprep.subr.msk.bf16.mxu0 %vm892_vm1, %v826_v15  ;;  %1527 = vmatprep.subr.msk.bf16.mxu1 %vm892_vm1, %v826_v15 }
  0x2e   : > { %1497 = vmatmul.mubr.msk.bf16.vlgmr.msra.gmra.mrb[12].mxu0 %vm369_vm0, %v1558_v6  ;;  %1503 = vmatmul.mubr.msk.bf16.vlgmr.msra.gmra.mrb[12].mxu1 %vm369_vm0, %v1558_v6 }
  0x2f   : > { %1507 = vmatpush3.bf16.msra.mxu0 %v894_v16  ;;  %1525 = vmatpush3.bf16.msra.mxu1 %v894_v16 }
  0x30   : > { %1508 = vmatprep.mubr.msk.bf16.mxu0 %vm867_vm2, %v1565_v17  ;;  %1516 = vmatprep.mubr.msk.bf16.mxu1 %vm867_vm2, %v1566_v18 }
  0x36   : > { %1509 = vmatmul.mubr.msk.bf16.vlgmr.msra.gmra.mrb[16].mxu0 %vm867_vm2, %v1567_v19  ;;  %1517 = vmatmul.mubr.msk.bf16.vlgmr.msra.gmra.mrb[16].mxu1 %vm867_vm2, %v1568_v20 }
  0x37   : > { %1512 = vmatprep.mubr.msk.bf16.mxu0 %vm867_vm2, %v1569_v21  ;;  %1520 = vmatprep.mubr.msk.bf16.mxu1 %vm867_vm2, %v1570_v22 }
  0x3e   : > { %1513 = vmatmul.mubr.msk.bf16.gmra.mrb[20].mxu0 %vm867_vm2, %v1571_v23  ;;  %1521 = vmatmul.mubr.msk.bf16.gmra.mrb[20].mxu1 %vm867_vm2, %v1572_v24 }
  0x88   : > { %v346_v41 = vpop.permute.xlu1 %345  ;;  %v336_v42 = vpop.permute.xlu0 %335 }
  0x8c   : > { %v351_v51 = vpop.permute.xlu1 %350  ;;  %v341_v52 = vpop.permute.xlu0 %340 }
  0xe9   : > { %v1462_v25 = vpop.f32.mrb[0].mxu0  ;;  %v1468_v26 = vpop.f32.mrb[0].mxu1 }
  0xea   : > { %v410_v27 = vpop.f32.mrb[1].mxu0  ;;  %v465_v28 = vpop.f32.mrb[1].mxu1  ;;  %v419_v54 = vadd.f32 %v1462_v25, %v346_v41  ;;  %v474_v55 = vadd.f32 %v1468_v26, %v346_v41 }
  0xeb   : > { %v1463_v29 = vpop.f32.mrb[2].mxu0  ;;  %v1469_v30 = vpop.f32.mrb[2].mxu1  ;;  %v411_v58 = vadd.f32 %v410_v27, %v336_v42  ;;  %v466_v59 = vadd.f32 %v465_v28, %v336_v42 }
  0xec   : > { %v413_v31 = vpop.f32.mrb[3].mxu0  ;;  %v468_v32 = vpop.f32.mrb[3].mxu1  ;;  %v422_v60 = vadd.f32 %v1463_v29, %v351_v51  ;;  %v477_v61 = vadd.f32 %v1469_v30, %v351_v51 }
  0xed   : > { %v1710_v0 = vadd.f32 %v413_v31, %v341_v52  ;;  %v1712_v1 = vadd.f32 %v468_v32, %v341_v52 }
  0xf1   : > { %v1474_v33 = vpop.f32.mrb[4].mxu0  ;;  %v1480_v34 = vpop.f32.mrb[4].mxu1 }
  0xf2   : > { %v520_v35 = vpop.f32.mrb[5].mxu0  ;;  %v575_v36 = vpop.f32.mrb[5].mxu1  ;;  %v1714_v2 = vadd.f32 %v1474_v33, %v346_v41  ;;  %v1716_v3 = vadd.f32 %v1480_v34, %v346_v41 }
  0xf3   : > { %v1475_v37 = vpop.f32.mrb[6].mxu0  ;;  %v1481_v38 = vpop.f32.mrb[6].mxu1  ;;  %v1718_v6 = vadd.f32 %v520_v35, %v336_v42  ;;  %v1720_v7 = vadd.f32 %v575_v36, %v336_v42 }
  0xf4   : > { %v523_v39 = vpop.f32.mrb[7].mxu0  ;;  %v578_v40 = vpop.f32.mrb[7].mxu1  ;;  %v1722_v8 = vadd.f32 %v1475_v37, %v351_v51  ;;  %v1724_v9 = vadd.f32 %v1481_v38, %v351_v51 }
  0xf5   : > { %v1726_v11 = vadd.f32 %v523_v39, %v341_v52  ;;  %v1728_v12 = vadd.f32 %v578_v40, %v341_v52 }
  0xf9   : > { %v1486_v43 = vpop.f32.mrb[8].mxu0  ;;  %v1492_v44 = vpop.f32.mrb[8].mxu1 }
  0xfa   : > { %v630_v45 = vpop.f32.mrb[9].mxu0  ;;  %v685_v46 = vpop.f32.mrb[9].mxu1  ;;  %v639_v13 = vadd.f32 %v1486_v43, %v346_v41  ;;  %v694_v14 = vadd.f32 %v1492_v44, %v346_v41 }
  0xfb   : > { %v1487_v47 = vpop.f32.mrb[10].mxu0  ;;  %v1493_v48 = vpop.f32.mrb[10].mxu1  ;;  %v631_v15 = vadd.f32 %v630_v45, %v336_v42  ;;  %v686_v16 = vadd.f32 %v685_v46, %v336_v42 }
  0xfc   : > { %v633_v49 = vpop.f32.mrb[11].mxu0  ;;  %v688_v50 = vpop.f32.mrb[11].mxu1  ;;  %v642_v17 = vadd.f32 %v1487_v47, %v351_v51  ;;  %v697_v18 = vadd.f32 %v1493_v48, %v351_v51 }
  0xfd   : > { %v634_v19 = vadd.f32 %v633_v49, %v341_v52  ;;  %v689_v20 = vadd.f32 %v688_v50, %v341_v52 }
 0x101   : > { %v1498_v53 = vpop.f32.mrb[12].mxu0  ;;  %v1504_v56 = vpop.f32.mrb[12].mxu1 }
 0x102   : > { %v740_v57 = vpop.f32.mrb[13].mxu0  ;;  %v795_v62 = vpop.f32.mrb[13].mxu1  ;;  %v1731_v21 = vadd.f32 %v1498_v53, %v346_v41  ;;  %v1733_v22 = vadd.f32 %v1504_v56, %v346_v41 }
 0x103   : > { %v1499_v63 = vpop.f32.mrb[14].mxu0  ;;  %v1505_v4 = vpop.f32.mrb[14].mxu1  ;;  %v1735_v23 = vadd.f32 %v740_v57, %v336_v42  ;;  %v1737_v24 = vadd.f32 %v795_v62, %v336_v42 }
 0x104   : > { %v743_v5 = vpop.f32.mrb[15].mxu0  ;;  %v798_v10 = vpop.f32.mrb[15].mxu1  ;;  %v1739_v25 = vadd.f32 %v1499_v63, %v351_v51  ;;  %v1741_v26 = vadd.f32 %v1505_v4, %v351_v51 }
 0x105   : > { %v1743_v28 = vadd.f32 %v743_v5, %v341_v52  ;;  %v1745_v29 = vadd.f32 %v798_v10, %v341_v52 }
 0x109   : > { %v1510_v27 = vpop.f32.mrb[16].mxu0  ;;  %v1518_v32 = vpop.f32.mrb[16].mxu1 }
 0x10a   : > { %v995_v30 = vadd.f32 %v1510_v27, %v419_v54  ;;  %v999_v31 = vadd.f32 %v1510_v27, %v474_v55  ;;  %v930_v33 = vpop.f32.mrb[17].mxu0  ;;  %v1011_v34 = vadd.f32 %v1518_v32, %v639_v13  ;;  %v1015_v35 = vadd.f32 %v1518_v32, %v694_v14  ;;  %v962_v38 = vpop.f32.mrb[17].mxu1 }
 0x10b   : > { %v993_v36 = vadd.f32 %v930_v33, %v411_v58  ;;  %v997_v37 = vadd.f32 %v930_v33, %v466_v59  ;;  %v1511_v39 = vpop.f32.mrb[18].mxu0  ;;  %v1009_v42 = vadd.f32 %v962_v38, %v631_v15  ;;  %v1013_v43 = vadd.f32 %v962_v38, %v686_v16  ;;  %v1519_v44 = vpop.f32.mrb[18].mxu1 }
 0x10c   : > { %v1395_v40 = vpack.c.bf16 %v995_v30, %v995_v30  ;;  %v1399_v41 = vpack.c.bf16 %v999_v31, %v999_v31  ;;  %v933_v45 = vpop.f32.mrb[19].mxu0  ;;  %v1411_v46 = vpack.c.bf16 %v1011_v34, %v1011_v34  ;;  %v1415_v47 = vpack.c.bf16 %v1015_v35, %v1015_v35  ;;  %v965_v50 = vpop.f32.mrb[19].mxu1 }
 0x10d   : > { %v1393_v48 = vpack.c.bf16 %v993_v36, %v993_v36  ;;  %v1397_v49 = vpack.c.bf16 %v997_v37, %v997_v37  ;;  %v1409_v51 = vpack.c.bf16 %v1009_v42, %v1009_v42  ;;  %v1413_v52 = vpack.c.bf16 %v1013_v43, %v1013_v43 }
 0x10e   : > { %1156 = vst.msk [vmem:[%s1750_s24 + $0x8] sm:$0xf] %vm1153_vm3, %v1395_v40  ;;  %1160 = vst.msk [vmem:[%s1750_s24 + $0x18] sm:$0xf] %vm1153_vm3, %v1399_v41  ;;  %v996_v53 = vadd.f32 %v1511_v39, %v422_v60  ;;  %v1000_v54 = vadd.f32 %v1511_v39, %v477_v61  ;;  %v1012_v55 = vadd.f32 %v1519_v44, %v642_v17 }
 0x10f   : > { %1172 = vst.msk [vmem:[%s1750_s24 + $0x48] sm:$0xf] %vm1153_vm3, %v1411_v46  ;;  %1176 = vst.msk [vmem:[%s1750_s24 + $0x58] sm:$0xf] %vm1153_vm3, %v1415_v47  ;;  %v1016_v56 = vadd.f32 %v1519_v44, %v697_v18  ;;  %v994_v57 = vadd.f32 %v933_v45, %v1710_v0  ;;  %v998_v58 = vadd.f32 %v933_v45, %v1712_v1 }
 0x110   : > { %1154 = vst.msk [vmem:[%s1750_s24] sm:$0xf] %vm1153_vm3, %v1393_v48  ;;  %1158 = vst.msk [vmem:[%s1750_s24 + $0x10] sm:$0xf] %vm1153_vm3, %v1397_v49  ;;  %v1396_v59 = vpack.c.bf16 %v996_v53, %v996_v53  ;;  %v1400_v60 = vpack.c.bf16 %v1000_v54, %v1000_v54  ;;  %v1010_v61 = vadd.f32 %v965_v50, %v634_v19 }
 0x111   : > { %1170 = vst.msk [vmem:[%s1750_s24 + $0x40] sm:$0xf] %vm1153_vm3, %v1409_v51  ;;  %1174 = vst.msk [vmem:[%s1750_s24 + $0x50] sm:$0xf] %vm1153_vm3, %v1413_v52  ;;  %v1014_v62 = vadd.f32 %v965_v50, %v689_v20  ;;  %v1412_v63 = vpack.c.bf16 %v1012_v55, %v1012_v55  ;;  %v1416_v4 = vpack.c.bf16 %v1016_v56, %v1016_v56  ;;  %v1514_v13 = vpop.f32.mrb[20].mxu0  ;;  %v1522_v16 = vpop.f32.mrb[20].mxu1 }
 0x112   : > { %v1394_v5 = vpack.c.bf16 %v994_v57, %v994_v57  ;;  %v1398_v10 = vpack.c.bf16 %v998_v58, %v998_v58  ;;  %1157 = vst.msk [vmem:[%s1750_s24 + $0xc] sm:$0xf] %vm1153_vm3, %v1396_v59  ;;  %1161 = vst.msk [vmem:[%s1750_s24 + $0x1c] sm:$0xf] %vm1153_vm3, %v1400_v60  ;;  %v1410_v0 = vpack.c.bf16 %v1010_v61, %v1010_v61  ;;  %v946_v17 = vpop.f32.mrb[21].mxu0 }
 0x113   : > { %v1414_v1 = vpack.c.bf16 %v1014_v62, %v1014_v62  ;;  %v1003_v14 = vadd.f32 %v1514_v13, %v1714_v2  ;;  %v1007_v15 = vadd.f32 %v1514_v13, %v1716_v3  ;;  %1173 = vst.msk [vmem:[%s1750_s24 + $0x4c] sm:$0xf] %vm1153_vm3, %v1412_v63  ;;  %1177 = vst.msk [vmem:[%s1750_s24 + $0x5c] sm:$0xf] %vm1153_vm3, %v1416_v4  ;;  %v978_v3 = vpop.f32.mrb[21].mxu1  ;;  %v1515_v27 = vpop.f32.mrb[22].mxu0 }
 0x114   : > { %1155 = vst.msk [vmem:[%s1750_s24 + $0x4] sm:$0xf] %vm1153_vm3, %v1394_v5  ;;  %1159 = vst.msk [vmem:[%s1750_s24 + $0x14] sm:$0xf] %vm1153_vm3, %v1398_v10  ;;  %v1019_v18 = vadd.f32 %v1522_v16, %v1731_v21  ;;  %v1023_v19 = vadd.f32 %v1522_v16, %v1733_v22  ;;  %v1001_v20 = vadd.f32 %v946_v17, %v1718_v6  ;;  %v1523_v6 = vpop.f32.mrb[22].mxu1 }
 0x115   : > { %v1005_v2 = vadd.f32 %v946_v17, %v1720_v7  ;;  %1171 = vst.msk [vmem:[%s1750_s24 + $0x44] sm:$0xf] %vm1153_vm3, %v1410_v0  ;;  %1175 = vst.msk [vmem:[%s1750_s24 + $0x54] sm:$0xf] %vm1153_vm3, %v1414_v1  ;;  %v1403_v30 = vpack.c.bf16 %v1003_v14, %v1003_v14  ;;  %v1407_v31 = vpack.c.bf16 %v1007_v15, %v1007_v15  ;;  %v949_v7 = vpop.f32.mrb[23].mxu0  ;;  %v981_v36 = vpop.f32.mrb[23].mxu1 }
 0x116   : > { %v1017_v32 = vadd.f32 %v978_v3, %v1735_v23  ;;  %v1021_v21 = vadd.f32 %v978_v3, %v1737_v24  ;;  %v1419_v22 = vpack.c.bf16 %v1019_v18, %v1019_v18  ;;  %v1423_v33 = vpack.c.bf16 %v1023_v19, %v1023_v19 }
 0x117   : > { %v1401_v34 = vpack.c.bf16 %v1001_v20, %v1001_v20  ;;  %v1405_v35 = vpack.c.bf16 %v1005_v2, %v1005_v2  ;;  %1164 = vst.msk [vmem:[%s1750_s24 + $0x28] sm:$0xf] %vm1153_vm3, %v1403_v30  ;;  %1168 = vst.msk [vmem:[%s1750_s24 + $0x38] sm:$0xf] %vm1153_vm3, %v1407_v31  ;;  %v1004_v38 = vadd.f32 %v1515_v27, %v1722_v8 }
 0x118   : > { %v1417_v37 = vpack.c.bf16 %v1017_v32, %v1017_v32  ;;  %v1421_v23 = vpack.c.bf16 %v1021_v21, %v1021_v21  ;;  %v1008_v24 = vadd.f32 %v1515_v27, %v1724_v9  ;;  %1180 = vst.msk [vmem:[%s1750_s24 + $0x68] sm:$0xf] %vm1153_vm3, %v1419_v22  ;;  %1184 = vst.msk [vmem:[%s1750_s24 + $0x78] sm:$0xf] %vm1153_vm3, %v1423_v33 }
 0x119   : > { %1162 = vst.msk [vmem:[%s1750_s24 + $0x20] sm:$0xf] %vm1153_vm3, %v1401_v34  ;;  %1166 = vst.msk [vmem:[%s1750_s24 + $0x30] sm:$0xf] %vm1153_vm3, %v1405_v35  ;;  %v1020_v39 = vadd.f32 %v1523_v6, %v1739_v25  ;;  %v1024_v40 = vadd.f32 %v1523_v6, %v1741_v26  ;;  %v1002_v41 = vadd.f32 %v949_v7, %v1726_v11 }
 0x11a   : > { %v1006_v8 = vadd.f32 %v949_v7, %v1728_v12  ;;  %1178 = vst.msk [vmem:[%s1750_s24 + $0x60] sm:$0xf] %vm1153_vm3, %v1417_v37  ;;  %1182 = vst.msk [vmem:[%s1750_s24 + $0x70] sm:$0xf] %vm1153_vm3, %v1421_v23  ;;  %v1404_v9 = vpack.c.bf16 %v1004_v38, %v1004_v38  ;;  %v1408_v42 = vpack.c.bf16 %v1008_v24, %v1008_v24 }
 0x11b   : > { %v1018_v25 = vadd.f32 %v981_v36, %v1743_v28  ;;  %v1022_v26 = vadd.f32 %v981_v36, %v1745_v29  ;;  %v1420_v43 = vpack.c.bf16 %v1020_v39, %v1020_v39  ;;  %v1424_v11 = vpack.c.bf16 %v1024_v40, %v1024_v40 }
 0x11c   : > { %v1402_v44 = vpack.c.bf16 %v1002_v41, %v1002_v41  ;;  %v1406_v45 = vpack.c.bf16 %v1006_v8, %v1006_v8  ;;  %1165 = vst.msk [vmem:[%s1750_s24 + $0x2c] sm:$0xf] %vm1153_vm3, %v1404_v9  ;;  %1169 = vst.msk [vmem:[%s1750_s24 + $0x3c] sm:$0xf] %vm1153_vm3, %v1408_v42 }
 0x11d   : > { %v1418_v12 = vpack.c.bf16 %v1018_v25, %v1018_v25  ;;  %v1422_v46 = vpack.c.bf16 %v1022_v26, %v1022_v26  ;;  %1181 = vst.msk [vmem:[%s1750_s24 + $0x6c] sm:$0xf] %vm1153_vm3, %v1420_v43  ;;  %1185 = vst.msk [vmem:[%s1750_s24 + $0x7c] sm:$0xf] %vm1153_vm3, %v1424_v11 }
 0x11e   : > { %1163 = vst.msk [vmem:[%s1750_s24 + $0x24] sm:$0xf] %vm1153_vm3, %v1402_v44  ;;  %1167 = vst.msk [vmem:[%s1750_s24 + $0x34] sm:$0xf] %vm1153_vm3, %v1406_v45 }
 0x11f   : > { %1179 = vst.msk [vmem:[%s1750_s24 + $0x64] sm:$0xf] %vm1153_vm3, %v1418_v12  ;;  %1183 = vst.msk [vmem:[%s1750_s24 + $0x74] sm:$0xf] %vm1153_vm3, %v1422_v46 }
 0x120 PF: > { %s15_s20 = sadd.s32 1, %s1595_s20   ;;  %s1849_s18 = smov %s1591_s19 }
 0x121   : > { %p12_p5 = scmp.ge.s32.totalorder %s15_s20, 4   ;;  %s1850_s19 = smov %s1852_s21 }
 0x123   :  { %14 = sbr.rel (!%p12_p5) target bundleno = 2 (0x2), region = 73 }

// kernel: _lambda_.11
= control target key start
LH: loop header
LB: loop body
LE: loop exit
PB: predicated region body
PF: predicated region fallthrough
CT: control target
= control target key end

     0   :  { %s3248_s24 = smov 0   ;;  %s3250_s25 = smov 0   ;;  %s4108_s0 = inlined_call_operand.vmem [shape: bf16[2,16,8,16], index: 0, kind: input, shape index: {}]   ;;  %s4109_s1 = inlined_call_operand.vmem [shape: bf16[2,8,32,8], index: 1, kind: input, shape index: {}]   ;;  %s4110_s2 = inlined_call_operand.vmem [shape: bf16[8,16], index: 2, kind: input, shape index: {}]   ;;  %s4111_s3 = inlined_call_operand.vmem [shape: bf16[32,8], index: 3, kind: input, shape index: {}]   ;;  %s4112_s4 = inlined_call_operand.vmem [shape: f32[32,1], index: 4, kind: input, shape index: {}]   ;;  %s4113_s5 = inlined_call_operand.vmem [shape: bf16[6,32], index: 5, kind: input, shape index: {}]   ;;  %s4114_s6 = inlined_call_operand.vmem [shape: f32[6,1], index: 6, kind: input, shape index: {}]   ;;  %s4115_s7 = inlined_call_operand.vmem [shape: f32[2,16,6,16], index: 7, kind: output, shape index: {}]  }
   0x1   :  { %s3252_s26 = smov 0  }
   0x2 LB: > { %s29_s27 = sadd.s32 1, %s3199_s25  ;;  %p2572_p0 = scmp.ge.s32.totalorder %s3203_s26, 1  ;;  %s3203_s26 = sphi %s3252_s26, %s17_s26   ;;  %s3199_s25 = sphi %s3250_s25, %s4160_s25   ;;  %s3195_s24 = sphi %s3248_s24, %s4159_s24  }
   0x3   : > { %p31_p1 = scmp.ge.s32.totalorder %s29_s27, 2  ;;  %p276_p2 = scmp.lt.s32.totalorder %s3203_s26, 3 }
   0x5   : > { %s4162_s27 = smov (%p31_p1, %s29_s27), 0  ;;  %p277_p3 = pnand %p2572_p0, %p276_p2 }
   0x7   : > { %280 = sbr.rel (%p277_p3) target bundleno = 644 (0x284), region = 48 }
   0xe   : > { %p327_p4 = scmp.lt.s32.totalorder %s3195_s24, 1  ;;  %v3269_v0 = vld [vmem:[%s4111_s3] sm:$0xff]   ;;  %vm412_vm0 = vcmask 64512   ;;  %v380_v1 = vld [vmem:[%s4112_s4 + $0x10] sm:$0xff]  ;;  %vm419_vm1 = vcmask 1043456   ;;  %v3205_v3 = vmov 0  }
   0xf   : > { %2797 = vmatprep.mubr.msk.bf16.mxu0 %vm412_vm0, %v3269_v0  ;;  %2803 = vmatprep.mubr.msk.bf16.mxu1 %vm412_vm0, %v3269_v0  ;;  %v378_v2 = vld [vmem:[%s4112_s4] sm:$0xff]  ;;  %v3296_v7 = vld [vmem:[%s4111_s3 + $0x8] sm:$0xff]   ;;  %v381_v8 = vld [vmem:[%s4112_s4 + $0x18] sm:$0xff]  ;;  %v4116_v58 = vmov 0.0   ;;  %vm3207_vm2 = vmmov 0   ;;  %vm1680_vm3 = vcmask 261120  }
  0x10   : > { %s4164_s24 = smov (!%p327_p4, %s3195_s24), 1  ;;  %3098 = vset.pattern.permute.xlu1 %v3205_v3  ;;  %3097 = vset.pattern.permute.xlu0 %v3205_v3  ;;  %v379_v16 = vld [vmem:[%s4112_s4 + $0x8] sm:$0xff]  ;;  %v1674_v17 = vld [vmem:[%s4114_s6] sm:$0x3f]  ;;  %vm2443_vm5 = vcmask 128000  }
  0x11   : > { %s2679_s11 = sshll.u32 %s4164_s24, 6  ;;  %394 = vperm.xlu1 %3098, %v380_v1   ;;  %384 = vperm.xlu0 %3097, %v378_v2   ;;  %s2680_s19 = sshll.u32 %s4164_s24, 7  ;;  %v1284_v39 = vld [vmem:[%s4110_s2] sm:$0xf] }
  0x12   : > { %s3287_s14 = scalar_lea.vmem %s4108_s0, %s2679_s11  ;;  %s3318_s22 = scalar_lea.vmem %s4109_s1, %s2680_s19  ;;  %v1414_v42 = vsel %vm419_vm1, %v1284_v39, 0 }
  0x13   : > { %v358_v4 = vld [vmem:[%s3287_s14] sm:$0xf]  ;;  %v360_v5 = vld [vmem:[%s3287_s14 + $0x8] sm:$0xf]  ;;  %v359_v9 = vld [vmem:[%s3287_s14 + $0x4] sm:$0xf] }
  0x14   : > { %3053 = vmatprep.subr.msk.bf16.mxu0 %vm419_vm1, %v358_v4  ;;  %v421_v6 = vsel %vm419_vm1, %v358_v4, 0  ;;  %v525_v10 = vsel %vm419_vm1, %v360_v5, 0  ;;  %3054 = vmatprep.subr.msk.bf16.mxu1 %vm419_vm1, %v359_v9  ;;  %v473_v11 = vsel %vm419_vm1, %v359_v9, 0  ;;  %v361_v12 = vld [vmem:[%s3287_s14 + $0xc] sm:$0xf]  ;;  %v3101_v41 = vld [vmem:[%s3318_s22] sm:$0xff]  }
  0x15   : > { %2796 = vmatpush3.bf16.msra.mxu0 %v421_v6  ;;  %v362_v13 = vld [vmem:[%s3287_s14 + $0x10] sm:$0xf]  ;;  %2802 = vmatpush3.bf16.msra.mxu1 %v473_v11  ;;  %v577_v14 = vsel %vm419_vm1, %v361_v12, 0  ;;  %v363_v15 = vld [vmem:[%s3287_s14 + $0x14] sm:$0xf]  ;;  %v3102_v43 = vld [vmem:[%s3318_s22 + $0x8] sm:$0xff]  }
  0x16   : > { %3055 = vmatprep.subr.msk.bf16.mxu0 %vm419_vm1, %v360_v5  ;;  %399 = vperm.xlu1 %3098, %v381_v8   ;;  %v629_v18 = vsel %vm419_vm1, %v362_v13, 0  ;;  %v364_v19 = vld [vmem:[%s3287_s14 + $0x18] sm:$0xf]  ;;  %v681_v20 = vsel %vm419_vm1, %v363_v15, 0  ;;  %v365_v21 = vld [vmem:[%s3287_s14 + $0x1c] sm:$0xf] }
  0x17   : > { %3056 = vmatprep.subr.msk.bf16.mxu1 %vm419_vm1, %v361_v12  ;;  %389 = vperm.xlu0 %3097, %v379_v16   ;;  %v733_v22 = vsel %vm419_vm1, %v364_v19, 0  ;;  %v366_v23 = vld [vmem:[%s3287_s14 + $0x20] sm:$0xf]  ;;  %v785_v24 = vsel %vm419_vm1, %v365_v21, 0  ;;  %v367_v25 = vld [vmem:[%s3287_s14 + $0x24] sm:$0xf] }
  0x18   : > { %2798 = vmatmul.mubr.msk.bf16.vlgmr.msra.gmra.mrb[0].mxu0 %vm412_vm0, %v3296_v7  ;;  %2804 = vmatmul.mubr.msk.bf16.vlgmr.msra.gmra.mrb[0].mxu1 %vm412_vm0, %v3296_v7  ;;  %v837_v26 = vsel %vm419_vm1, %v366_v23, 0  ;;  %v368_v27 = vld [vmem:[%s3287_s14 + $0x28] sm:$0xf]  ;;  %v889_v28 = vsel %vm419_vm1, %v367_v25, 0  ;;  %v369_v29 = vld [vmem:[%s3287_s14 + $0x2c] sm:$0xf] }
  0x19   : > { %2808 = vmatpush3.bf16.msra.mxu0 %v525_v10  ;;  %2809 = vmatprep.mubr.msk.bf16.mxu0 %vm412_vm0, %v3269_v0  ;;  %v941_v30 = vsel %vm419_vm1, %v368_v27, 0  ;;  %v370_v31 = vld [vmem:[%s3287_s14 + $0x30] sm:$0xf]  ;;  %v993_v32 = vsel %vm419_vm1, %v369_v29, 0  ;;  %v371_v33 = vld [vmem:[%s3287_s14 + $0x34] sm:$0xf] }
  0x1a   : > { %3057 = vmatprep.subr.msk.bf16.mxu0 %vm419_vm1, %v362_v13  ;;  %2814 = vmatpush3.bf16.msra.mxu1 %v577_v14  ;;  %v1045_v34 = vsel %vm419_vm1, %v370_v31, 0  ;;  %v372_v35 = vld [vmem:[%s3287_s14 + $0x38] sm:$0xf]  ;;  %v1097_v36 = vsel %vm419_vm1, %v371_v33, 0  ;;  %v373_v37 = vld [vmem:[%s3287_s14 + $0x3c] sm:$0xf]  ;;  %s3987_s14 = scalar_lea.vmem %s4115_s7, %s2680_s19 }
  0x1b   : > { %2815 = vmatprep.mubr.msk.bf16.mxu1 %vm412_vm0, %v3269_v0  ;;  %3058 = vmatprep.subr.msk.bf16.mxu1 %vm419_vm1, %v363_v15  ;;  %v1149_v38 = vsel %vm419_vm1, %v372_v35, 0  ;;  %v1201_v40 = vsel %vm419_vm1, %v373_v37, 0  ;;  %v3103_v44 = vld [vmem:[%s3318_s22 + $0x10] sm:$0xff]   ;;  %v3104_v45 = vld [vmem:[%s3318_s22 + $0x18] sm:$0xff]   ;;  %v3105_v46 = vld [vmem:[%s3318_s22 + $0x20] sm:$0xff]  }
  0x1c   : > { %1677 = vperm.xlu0 %3097, %v1674_v17   ;;  %v3106_v47 = vld [vmem:[%s3318_s22 + $0x28] sm:$0xff]   ;;  %v3107_v48 = vld [vmem:[%s3318_s22 + $0x30] sm:$0xff]   ;;  %v3108_v49 = vld [vmem:[%s3318_s22 + $0x38] sm:$0xff]  }
  0x1d   : > { %v3109_v50 = vld [vmem:[%s3318_s22 + $0x40] sm:$0xff]   ;;  %v3110_v51 = vld [vmem:[%s3318_s22 + $0x48] sm:$0xff]   ;;  %v3111_v52 = vld [vmem:[%s3318_s22 + $0x50] sm:$0xff]  }
  0x1e   : > { %v3112_v53 = vld [vmem:[%s3318_s22 + $0x58] sm:$0xff]   ;;  %v3113_v54 = vld [vmem:[%s3318_s22 + $0x60] sm:$0xff]   ;;  %v3114_v55 = vld [vmem:[%s3318_s22 + $0x68] sm:$0xff]  }
  0x1f   : > { %v3115_v56 = vld [vmem:[%s3318_s22 + $0x70] sm:$0xff]   ;;  %v3116_v57 = vld [vmem:[%s3318_s22 + $0x78] sm:$0xff]  }
  0x20   : > { %2810 = vmatmul.mubr.msk.bf16.vlgmr.msra.gmra.mrb[4].mxu0 %vm412_vm0, %v3296_v7  ;;  %2816 = vmatmul.mubr.msk.bf16.vlgmr.msra.gmra.mrb[4].mxu1 %vm412_vm0, %v3296_v7 }
  0x21   : > { %2820 = vmatpush3.bf16.msra.mxu0 %v629_v18  ;;  %2821 = vmatprep.mubr.msk.bf16.mxu0 %vm412_vm0, %v3269_v0 }
  0x22   : > { %3059 = vmatprep.subr.msk.bf16.mxu0 %vm419_vm1, %v364_v19  ;;  %2826 = vmatpush3.bf16.msra.mxu1 %v681_v20 }
  0x23   : > { %2827 = vmatprep.mubr.msk.bf16.mxu1 %vm412_vm0, %v3269_v0  ;;  %3060 = vmatprep.subr.msk.bf16.mxu1 %vm419_vm1, %v365_v21 }
  0x28   : > { %2822 = vmatmul.mubr.msk.bf16.vlgmr.msra.gmra.mrb[8].mxu0 %vm412_vm0, %v3296_v7  ;;  %2828 = vmatmul.mubr.msk.bf16.vlgmr.msra.gmra.mrb[8].mxu1 %vm412_vm0, %v3296_v7 }
  0x29   : > { %2832 = vmatpush3.bf16.msra.mxu0 %v733_v22  ;;  %2833 = vmatprep.mubr.msk.bf16.mxu0 %vm412_vm0, %v3269_v0 }
  0x2a   : > { %3061 = vmatprep.subr.msk.bf16.mxu0 %vm419_vm1, %v366_v23  ;;  %2838 = vmatpush3.bf16.msra.mxu1 %v785_v24 }
  0x2b   : > { %2839 = vmatprep.mubr.msk.bf16.mxu1 %vm412_vm0, %v3269_v0  ;;  %3062 = vmatprep.subr.msk.bf16.mxu1 %vm419_vm1, %v367_v25 }
  0x30   : > { %2834 = vmatmul.mubr.msk.bf16.vlgmr.msra.gmra.mrb[12].mxu0 %vm412_vm0, %v3296_v7  ;;  %2840 = vmatmul.mubr.msk.bf16.vlgmr.msra.gmra.mrb[12].mxu1 %vm412_vm0, %v3296_v7 }
  0x31   : > { %2844 = vmatpush3.bf16.msra.mxu0 %v837_v26  ;;  %2845 = vmatprep.mubr.msk.bf16.mxu0 %vm412_vm0, %v3269_v0 }
  0x32   : > { %3063 = vmatprep.subr.msk.bf16.mxu0 %vm419_vm1, %v368_v27  ;;  %2850 = vmatpush3.bf16.msra.mxu1 %v889_v28 }
  0x33   : > { %2851 = vmatprep.mubr.msk.bf16.mxu1 %vm412_vm0, %v3269_v0  ;;  %3064 = vmatprep.subr.msk.bf16.mxu1 %vm419_vm1, %v369_v29 }
  0x38   : > { %2846 = vmatmul.mubr.msk.bf16.vlgmr.msra.gmra.mrb[16].mxu0 %vm412_vm0, %v3296_v7  ;;  %2852 = vmatmul.mubr.msk.bf16.vlgmr.msra.gmra.mrb[16].mxu1 %vm412_vm0, %v3296_v7 }
  0x39   : > { %2856 = vmatpush3.bf16.msra.mxu0 %v941_v30  ;;  %2857 = vmatprep.mubr.msk.bf16.mxu0 %vm412_vm0, %v3269_v0 }
  0x3a   : > { %3065 = vmatprep.subr.msk.bf16.mxu0 %vm419_vm1, %v370_v31  ;;  %2862 = vmatpush3.bf16.msra.mxu1 %v993_v32 }
  0x3b   : > { %2863 = vmatprep.mubr.msk.bf16.mxu1 %vm412_vm0, %v3269_v0  ;;  %3066 = vmatprep.subr.msk.bf16.mxu1 %vm419_vm1, %v371_v33 }
  0x40   : > { %2858 = vmatmul.mubr.msk.bf16.vlgmr.msra.gmra.mrb[20].mxu0 %vm412_vm0, %v3296_v7  ;;  %2864 = vmatmul.mubr.msk.bf16.vlgmr.msra.gmra.mrb[20].mxu1 %vm412_vm0, %v3296_v7 }
  0x41   : > { %2868 = vmatpush3.bf16.msra.mxu0 %v1045_v34  ;;  %2869 = vmatprep.mubr.msk.bf16.mxu0 %vm412_vm0, %v3269_v0 }
  0x42   : > { %3067 = vmatprep.subr.msk.bf16.mxu0 %vm419_vm1, %v372_v35  ;;  %2874 = vmatpush3.bf16.msra.mxu1 %v1097_v36 }
  0x43   : > { %2875 = vmatprep.mubr.msk.bf16.mxu1 %vm412_vm0, %v3269_v0  ;;  %3068 = vmatprep.subr.msk.bf16.mxu1 %vm419_vm1, %v373_v37 }
  0x48   : > { %2870 = vmatmul.mubr.msk.bf16.vlgmr.msra.gmra.mrb[24].mxu0 %vm412_vm0, %v3296_v7  ;;  %2876 = vmatmul.mubr.msk.bf16.vlgmr.msra.gmra.mrb[24].mxu1 %vm412_vm0, %v3296_v7 }
  0x49   : > { %2880 = vmatpush3.bf16.msra.mxu0 %v1149_v38  ;;  %2881 = vmatprep.mubr.msk.bf16.mxu0 %vm412_vm0, %v3269_v0 }
  0x4a   : > { %3069 = vmatprep.subr.msk.bf16.mxu0 %vm419_vm1, %v1284_v39  ;;  %2886 = vmatpush3.bf16.msra.mxu1 %v1201_v40 }
  0x4b   : > { %2887 = vmatprep.mubr.msk.bf16.mxu1 %vm412_vm0, %v3269_v0  ;;  %2925 = vmatprep.subr.bf16.mxu1 %v4116_v58 }
  0x50   : > { %2882 = vmatmul.mubr.msk.bf16.vlgmr.msra.gmra.mrb[28].mxu0 %vm412_vm0, %v3296_v7  ;;  %2888 = vmatmul.mubr.msk.bf16.vlgmr.msra.gmra.mrb[28].mxu1 %vm412_vm0, %v3296_v7 }
  0x51   : > { %2892 = vmatpush3.bf16.msra.mxu0 %v1414_v42  ;;  %2893 = vmatprep.mubr.msk.bf16.mxu0 %vm412_vm0, %v3101_v41 }
  0x52   : > { %2989 = vmatprep.subr.bf16.mxu0 %v4116_v58  ;;  %2929 = vmatprep.mubr.msk.bf16.mxu1 %vm3207_vm2, %v4116_v58 }
  0x58   : > { %2894 = vmatmul.mubr.msk.bf16.vlgmr.msra.gmra.mrb[32].mxu0 %vm412_vm0, %v3102_v43 }
  0x59   : > { %2897 = vmatprep.mubr.msk.bf16.mxu0 %vm412_vm0, %v3103_v44 }
  0x60   : > { %2898 = vmatmul.mubr.msk.bf16.gmra.mrb[36].mxu0 %vm412_vm0, %v3104_v45 }
  0x61   : > { %2901 = vmatprep.mubr.msk.bf16.mxu0 %vm412_vm0, %v3105_v46 }
  0x68   : > { %2902 = vmatmul.mubr.msk.bf16.gmra.mrb[40].mxu0 %vm412_vm0, %v3106_v47 }
  0x69   : > { %2905 = vmatprep.mubr.msk.bf16.mxu0 %vm412_vm0, %v3107_v48 }
  0x70   : > { %2906 = vmatmul.mubr.msk.bf16.gmra.mrb[44].mxu0 %vm412_vm0, %v3108_v49 }
  0x71   : > { %2909 = vmatprep.mubr.msk.bf16.mxu0 %vm412_vm0, %v3109_v50 }
  0x78   : > { %2910 = vmatmul.mubr.msk.bf16.gmra.mrb[48].mxu0 %vm412_vm0, %v3110_v51 }
  0x79   : > { %2913 = vmatprep.mubr.msk.bf16.mxu0 %vm412_vm0, %v3111_v52 }
  0x80   : > { %2914 = vmatmul.mubr.msk.bf16.gmra.mrb[52].mxu0 %vm412_vm0, %v3112_v53 }
  0x81   : > { %2917 = vmatprep.mubr.msk.bf16.mxu0 %vm412_vm0, %v3113_v54 }
  0x88   : > { %2918 = vmatmul.mubr.msk.bf16.gmra.mrb[56].mxu0 %vm412_vm0, %v3114_v55 }
  0x89   : > { %2921 = vmatprep.mubr.msk.bf16.mxu0 %vm412_vm0, %v3115_v56 }
  0x90   : > { %2922 = vmatmul.mubr.msk.bf16.gmra.mrb[60].mxu0 %vm412_vm0, %v3116_v57  ;;  %v3526_v27 = vpop.permute.xlu1 %394  ;;  %v3583_v57 = vpop.permute.xlu0 %384 }
  0x91   : > { %2993 = vmatprep.mubr.msk.bf16.mxu0 %vm3207_vm2, %v4116_v58 }
  0x95   : > { %v3540_v34 = vpop.permute.xlu1 %399 }
  0xeb   : > { %v3462_v59 = vpop.f32.mrb[0].mxu0  ;;  %v3468_v62 = vpop.f32.mrb[0].mxu1 }
  0xec   : > { %v3464_v60 = vpop.f32.mrb[1].mxu0  ;;  %v3472_v0 = vpop.f32.mrb[1].mxu1 }
  0xed   : > { %v3466_v61 = vpop.f32.mrb[2].mxu0  ;;  %v3474_v1 = vpop.f32.mrb[2].mxu1 }
  0xee   : > { %v3470_v63 = vpop.f32.mrb[3].mxu0  ;;  %v3476_v2 = vpop.f32.mrb[3].mxu1 }
  0xf3   : > { %v3478_v3 = vpop.f32.mrb[4].mxu0  ;;  %v3484_v6 = vpop.f32.mrb[4].mxu1 }
  0xf4   : > { %v3480_v4 = vpop.f32.mrb[5].mxu0  ;;  %v3488_v8 = vpop.f32.mrb[5].mxu1 }
  0xf5   : > { %v3482_v5 = vpop.f32.mrb[6].mxu0  ;;  %v3490_v9 = vpop.f32.mrb[6].mxu1 }
  0xf6   : > { %v3486_v7 = vpop.f32.mrb[7].mxu0  ;;  %v3492_v10 = vpop.f32.mrb[7].mxu1 }
  0xfb   : > { %v3494_v11 = vpop.f32.mrb[8].mxu0  ;;  %v3500_v14 = vpop.f32.mrb[8].mxu1 }
  0xfc   : > { %v3496_v12 = vpop.f32.mrb[9].mxu0  ;;  %v3504_v16 = vpop.f32.mrb[9].mxu1 }
  0xfd   : > { %v3498_v13 = vpop.f32.mrb[10].mxu0  ;;  %v3506_v17 = vpop.f32.mrb[10].mxu1 }
  0xfe   : > { %v3502_v15 = vpop.f32.mrb[11].mxu0  ;;  %v3508_v18 = vpop.f32.mrb[11].mxu1 }
 0x103   : > { %v3510_v19 = vpop.f32.mrb[12].mxu0  ;;  %v3516_v22 = vpop.f32.mrb[12].mxu1 }
 0x104   : > { %v3512_v20 = vpop.f32.mrb[13].mxu0  ;;  %v3520_v24 = vpop.f32.mrb[13].mxu1 }
 0x105   : > { %v3514_v21 = vpop.f32.mrb[14].mxu0  ;;  %v3522_v25 = vpop.f32.mrb[14].mxu1 }
 0x106   : > { %v3518_v23 = vpop.f32.mrb[15].mxu0  ;;  %v3524_v26 = vpop.f32.mrb[15].mxu1 }
 0x10b   : > { %v3528_v28 = vpop.f32.mrb[16].mxu0  ;;  %v3534_v31 = vpop.f32.mrb[16].mxu1 }
 0x10c   : > { %v3530_v29 = vpop.f32.mrb[17].mxu0  ;;  %v3538_v33 = vpop.f32.mrb[17].mxu1 }
 0x10d   : > { %v3532_v30 = vpop.f32.mrb[18].mxu0  ;;  %v2854_v35 = vpop.f32.mrb[18].mxu1 }
 0x10e   : > { %v3536_v32 = vpop.f32.mrb[19].mxu0  ;;  %v3543_v36 = vadd.f32 %v2854_v35, %v3540_v34  ;;  %v3545_v37 = vpop.f32.mrb[19].mxu1 }
 0x113   : > { %v3547_v38 = vpop.f32.mrb[20].mxu0  ;;  %v3553_v41 = vpop.f32.mrb[20].mxu1 }
 0x114   : > { %v3549_v39 = vpop.f32.mrb[21].mxu0  ;;  %v3557_v43 = vpop.f32.mrb[21].mxu1 }
 0x115   : > { %v3551_v40 = vpop.f32.mrb[22].mxu0  ;;  %v2866_v44 = vpop.f32.mrb[22].mxu1 }
 0x116   : > { %4118 = vst [vmem:[#allocation2_spill] sm:$0xff] %v3551_v40  ;;  %v3555_v42 = vpop.f32.mrb[23].mxu0  ;;  %v3560_v45 = vadd.f32 %v2866_v44, %v3540_v34  ;;  %v3562_v46 = vpop.f32.mrb[23].mxu1 }
 0x117   : > { %4119 = vst [vmem:[#allocation3_spill] sm:$0xff] %v3555_v42  ;;  %4121 = vst [vmem:[#allocation5_spill] sm:$0xff] %v3562_v46 }
 0x118   : > { %4120 = vst [vmem:[#allocation4_spill] sm:$0xff] %v3560_v45 }
 0x11b   : > { %v3564_v47 = vpop.f32.mrb[24].mxu0  ;;  %v3570_v50 = vpop.f32.mrb[24].mxu1 }
 0x11c   : > { %4122 = vst [vmem:[#allocation6_spill] sm:$0xff] %v3564_v47  ;;  %v3566_v48 = vpop.f32.mrb[25].mxu0  ;;  %4125 = vst [vmem:[#allocation9_spill] sm:$0xff] %v3570_v50  ;;  %v3574_v52 = vpop.f32.mrb[25].mxu1 }
 0x11d   : > { %4123 = vst [vmem:[#allocation7_spill] sm:$0xff] %v3566_v48  ;;  %v3568_v49 = vpop.f32.mrb[26].mxu0  ;;  %4127 = vst [vmem:[#allocation11_spill] sm:$0xff] %v3574_v52  ;;  %v2878_v53 = vpop.f32.mrb[26].mxu1 }
 0x11e   : > { %4124 = vst [vmem:[#allocation8_spill] sm:$0xff] %v3568_v49  ;;  %v3572_v51 = vpop.f32.mrb[27].mxu0  ;;  %v3577_v54 = vadd.f32 %v2878_v53, %v3540_v34  ;;  %v3579_v55 = vpop.f32.mrb[27].mxu1  ;;  %v518_v53 = vadd.f32 %v3468_v62, %v3526_v27 }
 0x11f   : > { %4126 = vst [vmem:[#allocation10_spill] sm:$0xff] %v3572_v51  ;;  %4129 = vst [vmem:[#allocation13_spill] sm:$0xff] %v3579_v55  ;;  %v3604_v55 = vpop.permute.xlu0 %389 }
 0x120   : > { %4128 = vst [vmem:[#allocation12_spill] sm:$0xff] %v3577_v54 }
 0x123   : > { %v3581_v56 = vpop.f32.mrb[28].mxu0  ;;  %v3589_v58 = vpop.f32.mrb[28].mxu1 }
 0x124   : > { %4130 = vst [vmem:[#allocation14_spill] sm:$0xff] %v3581_v56  ;;  %v3585_v35 = vpop.f32.mrb[29].mxu0  ;;  %4133 = vst [vmem:[#allocation17_spill] sm:$0xff] %v3589_v58  ;;  %v3593_v51 = vpop.f32.mrb[29].mxu1 }
 0x125   : > { %4131 = vst [vmem:[#allocation15_spill] sm:$0xff] %v3585_v35  ;;  %v3587_v44 = vpop.f32.mrb[30].mxu0  ;;  %4135 = vst [vmem:[#allocation19_spill] sm:$0xff] %v3593_v51  ;;  %v2890_v52 = vpop.f32.mrb[30].mxu1  ;;  %v466_v35 = vadd.f32 %v3462_v59, %v3526_v27  ;;  %v510_v51 = vadd.f32 %v3472_v0, %v3583_v57  ;;  %v461_v59 = vadd.f32 %v3470_v63, %v3604_v55 }
 0x126   : > { %4132 = vst [vmem:[#allocation16_spill] sm:$0xff] %v3587_v44  ;;  %v3591_v49 = vpop.f32.mrb[31].mxu0  ;;  %v3598_v54 = vadd.f32 %v2890_v52, %v3540_v34  ;;  %v3600_v56 = vpop.f32.mrb[31].mxu1  ;;  %v521_v44 = vadd.f32 %v3474_v1, %v3540_v34  ;;  %v469_v52 = vadd.f32 %v3466_v61, %v3540_v34  ;;  %v513_v1 = vadd.f32 %v3476_v2, %v3604_v55 }
 0x127   : > { %4134 = vst [vmem:[#allocation18_spill] sm:$0xff] %v3591_v49  ;;  %4137 = vst [vmem:[#allocation21_spill] sm:$0xff] %v3600_v56  ;;  %v458_v49 = vadd.f32 %v3464_v60, %v3583_v57  ;;  %v622_v63 = vadd.f32 %v3484_v6, %v3526_v27  ;;  %v614_v2 = vadd.f32 %v3488_v8, %v3583_v57  ;;  %v4138_v6 = vmov 0.0  }
 0x128   : > { %4136 = vst [vmem:[#allocation20_spill] sm:$0xff] %v3598_v54  ;;  %v617_v8 = vadd.f32 %v3492_v10, %v3604_v55 }
 0x12b   : > { %v2895_v62 = vpop.f32.mrb[32].mxu0 }
 0x12c   : > { %v1579_v54 = vadd.f32 %v2895_v62, %v466_v35  ;;  %v3614_v56 = vadd.f32 %v2895_v62, %v518_v53  ;;  %v1450_v58 = vpop.f32.mrb[33].mxu0  ;;  %v570_v62 = vadd.f32 %v3478_v3, %v3526_v27 }
 0x12d   : > { %v1577_v48 = vadd.f32 %v1450_v58, %v458_v49  ;;  %v1581_v50 = vadd.f32 %v1450_v58, %v510_v51  ;;  %v2896_v60 = vpop.f32.mrb[34].mxu0  ;;  %v562_v58 = vadd.f32 %v3480_v4, %v3583_v57  ;;  %v565_v4 = vadd.f32 %v3486_v7, %v3604_v55  ;;  %v3653_v7 = vld [vmem:[%s4113_s5] sm:$0x7] }
 0x12e   : > { %v1580_v47 = vadd.f32 %v2896_v60, %v469_v52  ;;  %v1584_v45 = vadd.f32 %v2896_v60, %v521_v44  ;;  %v1453_v0 = vpop.f32.mrb[35].mxu0  ;;  %v726_v60 = vadd.f32 %v3500_v14, %v3526_v27  ;;  %v729_v14 = vadd.f32 %v3506_v17, %v3540_v34 }
 0x12f   : > { %v1578_v46 = vadd.f32 %v1453_v0, %v461_v59  ;;  %v1582_v42 = vadd.f32 %v1453_v0, %v513_v1  ;;  %v666_v0 = vadd.f32 %v3496_v12, %v3583_v57  ;;  %v669_v12 = vadd.f32 %v3502_v15, %v3604_v55 }
 0x130   : > { %v1643_v40 = vpack.c.bf16 %v1580_v47, %v1579_v54  ;;  %v1645_v61 = vpack.c.bf16 %v1584_v45, %v3614_v56  ;;  %v573_v47 = vadd.f32 %v3482_v5, %v3540_v34 }
 0x131   : > { %v1642_v35 = vpack.c.bf16 %v1578_v46, %v1577_v48  ;;  %v1644_v53 = vpack.c.bf16 %v1582_v42, %v1581_v50  ;;  %v625_v42 = vadd.f32 %v3490_v9, %v3540_v34 }
 0x133   : > { %v2899_v49 = vpop.f32.mrb[36].mxu0  ;;  %2926 = vmatpush3.bf16.msra.mxu1 %v1642_v35  ;;  %v718_v35 = vadd.f32 %v3504_v16, %v3583_v57  ;;  %v721_v16 = vadd.f32 %v3508_v18, %v3604_v55 }
 0x134   : > { %v3633_v45 = vadd.f32 %v2899_v49, %v570_v62  ;;  %v3635_v3 = vadd.f32 %v2899_v49, %v622_v63  ;;  %v1466_v46 = vpop.f32.mrb[37].mxu0  ;;  %2927 = vmatprep.subr.bf16.mxu1 %v4138_v6 }
 0x135   : > { %v1585_v48 = vadd.f32 %v1466_v46, %v562_v58  ;;  %v3642_v50 = vadd.f32 %v1466_v46, %v614_v2  ;;  %v2900_v5 = vpop.f32.mrb[38].mxu0 }
 0x136   : > { %v3644_v51 = vadd.f32 %v2900_v5, %v573_v47  ;;  %v3646_v9 = vadd.f32 %v2900_v5, %v625_v42  ;;  %v1469_v54 = vpop.f32.mrb[39].mxu0  ;;  %v770_v5 = vadd.f32 %v3512_v20, %v3583_v57  ;;  %v773_v20 = vadd.f32 %v3518_v23, %v3604_v55 }
 0x137   : > { %v1586_v56 = vadd.f32 %v1469_v54, %v565_v4  ;;  %v3648_v44 = vadd.f32 %v1469_v54, %v617_v8  ;;  %2928 = vmatpush3.bf16.msra.mxu1 %v1643_v40  ;;  %v674_v40 = vadd.f32 %v3494_v11, %v3526_v27  ;;  %v677_v11 = vadd.f32 %v3498_v13, %v3540_v34 }
 0x138   : > { %v1647_v10 = vpack.c.bf16 %v3644_v51, %v3633_v45  ;;  %v1649_v52 = vpack.c.bf16 %v3646_v9, %v3635_v3  ;;  %2933 = vmatprep.subr.bf16.mxu1 %v4138_v6  ;;  %v822_v51 = vadd.f32 %v3520_v24, %v3583_v57  ;;  %v825_v24 = vadd.f32 %v3524_v26, %v3604_v55 }
 0x139   : > { %v1646_v59 = vpack.c.bf16 %v1586_v56, %v1585_v48  ;;  %v1648_v1 = vpack.c.bf16 %v3648_v44, %v3642_v50  ;;  %v778_v48 = vadd.f32 %v3510_v19, %v3526_v27  ;;  %v781_v19 = vadd.f32 %v3514_v21, %v3540_v34 }
 0x13a   : > { %2930 = vmatmul.mubr.msk.bf16.vlgmr.msra.gmra.mrb[32].mxu1 %vm1680_vm3, %v3653_v7  ;;  %v978_v3 = vadd.f32 %v3549_v39, %v3583_v57  ;;  %v1030_v9 = vadd.f32 %v3557_v43, %v3583_v57  ;;  %v4140_v39 = vld [vmem:[#allocation3_spill] sm:$0xff] }
 0x13b   : > { %v2903_v62 = vpop.f32.mrb[40].mxu0  ;;  %2934 = vmatpush3.bf16.msra.mxu1 %v1644_v53  ;;  %2937 = vmatprep.mubr.msk.bf16.mxu1 %vm3207_vm2, %v4138_v6  ;;  %v981_v43 = vadd.f32 %v4140_v39, %v3604_v55  ;;  %v4149_v39 = vld [vmem:[#allocation13_spill] sm:$0xff] }
 0x13c   : > { %v3678_v63 = vadd.f32 %v2903_v62, %v674_v40  ;;  %v3680_v58 = vadd.f32 %v2903_v62, %v726_v60  ;;  %v1482_v2 = vpop.f32.mrb[41].mxu0  ;;  %2935 = vmatprep.subr.bf16.mxu1 %v4138_v6 }
 0x13d   : > { %v3687_v53 = vadd.f32 %v1482_v2, %v666_v0  ;;  %v3689_v49 = vadd.f32 %v1482_v2, %v718_v35  ;;  %v2904_v13 = vpop.f32.mrb[42].mxu0 }
 0x13e   : > { %v3691_v47 = vadd.f32 %v2904_v13, %v677_v11  ;;  %v3693_v17 = vadd.f32 %v2904_v13, %v729_v14  ;;  %v1485_v42 = vpop.f32.mrb[43].mxu0  ;;  %v874_v13 = vadd.f32 %v3530_v29, %v3583_v57  ;;  %v877_v29 = vadd.f32 %v3536_v32, %v3604_v55 }
 0x13f   : > { %v3695_v45 = vadd.f32 %v1485_v42, %v669_v12  ;;  %v3697_v46 = vadd.f32 %v1485_v42, %v721_v16  ;;  %2936 = vmatpush3.bf16.msra.mxu1 %v1645_v61  ;;  %v830_v61 = vadd.f32 %v3516_v22, %v3526_v27  ;;  %v833_v22 = vadd.f32 %v3522_v25, %v3540_v34 }
 0x140   : > { %v1651_v15 = vpack.c.bf16 %v3691_v47, %v3678_v63  ;;  %v1653_v18 = vpack.c.bf16 %v3693_v17, %v3680_v58  ;;  %2941 = vmatprep.subr.bf16.mxu1 %v4138_v6  ;;  %v882_v16 = vadd.f32 %v3528_v28, %v3526_v27  ;;  %v926_v42 = vadd.f32 %v3538_v33, %v3583_v57  ;;  %v4145_v47 = vld [vmem:[#allocation7_spill] sm:$0xff] }
 0x141   : > { %v1650_v4 = vpack.c.bf16 %v3695_v45, %v3687_v53  ;;  %v1652_v8 = vpack.c.bf16 %v3697_v46, %v3689_v49  ;;  %v885_v28 = vadd.f32 %v3532_v30, %v3540_v34  ;;  %v929_v33 = vadd.f32 %v3545_v37, %v3604_v55  ;;  %v4153_v17 = vld [vmem:[#allocation15_spill] sm:$0xff] }
 0x142   : > { %2938 = vmatmul.mubr.msk.bf16.vlgmr.msra.gmra.mrb[36].mxu1 %vm1680_vm3, %v3653_v7 }
 0x143   : > { %v2907_v54 = vpop.f32.mrb[44].mxu0  ;;  %2942 = vmatpush3.bf16.msra.mxu1 %v1646_v59  ;;  %2945 = vmatprep.mubr.msk.bf16.mxu1 %vm3207_vm2, %v4138_v6 }
 0x144   : > { %v3724_v56 = vadd.f32 %v2907_v54, %v778_v48  ;;  %v3726_v40 = vadd.f32 %v2907_v54, %v830_v61  ;;  %v1498_v60 = vpop.f32.mrb[45].mxu0  ;;  %2943 = vmatprep.subr.bf16.mxu1 %v4138_v6 }
 0x145   : > { %v3733_v59 = vadd.f32 %v1498_v60, %v770_v5  ;;  %v3735_v0 = vadd.f32 %v1498_v60, %v822_v51  ;;  %v2908_v21 = vpop.f32.mrb[46].mxu0 }
 0x146   : > { %v3737_v35 = vadd.f32 %v2908_v21, %v781_v19  ;;  %v3739_v25 = vadd.f32 %v2908_v21, %v833_v22  ;;  %v1501_v62 = vpop.f32.mrb[47].mxu0 }
 0x147   : > { %v3741_v11 = vadd.f32 %v1501_v62, %v773_v20  ;;  %v3743_v14 = vadd.f32 %v1501_v62, %v825_v24  ;;  %2944 = vmatpush3.bf16.msra.mxu1 %v1647_v10  ;;  %v934_v10 = vadd.f32 %v3534_v31, %v3526_v27  ;;  %v1038_v24 = vadd.f32 %v3553_v41, %v3526_v27 }
 0x148   : > { %v1655_v23 = vpack.c.bf16 %v3737_v35, %v3724_v56  ;;  %v1657_v26 = vpack.c.bf16 %v3739_v25, %v3726_v40  ;;  %2949 = vmatprep.subr.bf16.mxu1 %v4138_v6  ;;  %v3971_v56 = vpop.permute.xlu0 %1677 }
 0x149   : > { %v1654_v2 = vpack.c.bf16 %v3741_v11, %v3733_v59  ;;  %v1656_v12 = vpack.c.bf16 %v3743_v14, %v3735_v0  ;;  %v4158_v11 = vld [vmem:[#allocation20_spill] sm:$0xff] }
 0x14a   : > { %2946 = vmatmul.mubr.msk.bf16.vlgmr.msra.gmra.mrb[40].mxu1 %vm1680_vm3, %v3653_v7 }
 0x14b   : > { %v2911_v48 = vpop.f32.mrb[48].mxu0  ;;  %2950 = vmatpush3.bf16.msra.mxu1 %v1648_v1  ;;  %2953 = vmatprep.mubr.msk.bf16.mxu1 %vm3207_vm2, %v4138_v6 }
 0x14c   : > { %v1611_v31 = vadd.f32 %v2911_v48, %v882_v16  ;;  %v3771_v61 = vadd.f32 %v2911_v48, %v934_v10  ;;  %v1514_v5 = vpop.f32.mrb[49].mxu0  ;;  %2951 = vmatprep.subr.bf16.mxu1 %v4138_v6  ;;  %v4141_v10 = vld [vmem:[#allocation5_spill] sm:$0xff]  ;;  %v4142_v48 = vld [vmem:[#allocation4_spill] sm:$0xff] }
 0x14d   : > { %v1609_v50 = vadd.f32 %v1514_v5, %v874_v13  ;;  %v3778_v44 = vadd.f32 %v1514_v5, %v926_v42  ;;  %v2912_v1 = vpop.f32.mrb[50].mxu0  ;;  %v1033_v13 = vadd.f32 %v4141_v10, %v3604_v55 }
 0x14e   : > { %v1612_v51 = vadd.f32 %v2912_v1, %v885_v28  ;;  %v3781_v54 = vadd.f32 %v2912_v1, %v3543_v36  ;;  %v1517_v30 = vpop.f32.mrb[51].mxu0  ;;  %v986_v36 = vadd.f32 %v3547_v38, %v3526_v27  ;;  %v4139_v38 = vld [vmem:[#allocation2_spill] sm:$0xff] }
 0x14f   : > { %v1610_v19 = vadd.f32 %v1517_v30, %v877_v29  ;;  %v3783_v22 = vadd.f32 %v1517_v30, %v929_v33  ;;  %2952 = vmatpush3.bf16.msra.mxu1 %v1649_v52  ;;  %v989_v21 = vadd.f32 %v4139_v38, %v3540_v34  ;;  %v4143_v30 = vld [vmem:[#allocation6_spill] sm:$0xff] }
 0x150   : > { %v1659_v32 = vpack.c.bf16 %v1612_v51, %v1611_v31  ;;  %v1661_v37 = vpack.c.bf16 %v3781_v54, %v3771_v61  ;;  %2957 = vmatprep.subr.bf16.mxu1 %v4138_v6 }
 0x151   : > { %v1658_v60 = vpack.c.bf16 %v1610_v19, %v1609_v50  ;;  %v1660_v20 = vpack.c.bf16 %v3783_v22, %v3778_v44  ;;  %v1090_v19 = vadd.f32 %v4143_v30, %v3526_v27 }
 0x152   : > { %2954 = vmatmul.mubr.msk.bf16.vlgmr.msra.gmra.mrb[44].mxu1 %vm1680_vm3, %v3653_v7 }
 0x153   : > { %v2915_v52 = vpop.f32.mrb[52].mxu0  ;;  %2958 = vmatpush3.bf16.msra.mxu1 %v1650_v4  ;;  %2990 = vmatpush3.bf16.msra.mxu0 %v1658_v60  ;;  %v4144_v60 = vld [vmem:[#allocation9_spill] sm:$0xff] }
 0x154   : > { %v1619_v62 = vadd.f32 %v2915_v52, %v986_v36  ;;  %v3808_v41 = vadd.f32 %v2915_v52, %v1038_v24  ;;  %v1530_v16 = vpop.f32.mrb[53].mxu0  ;;  %2959 = vmatprep.subr.bf16.mxu1 %v4138_v6  ;;  %2991 = vmatprep.subr.bf16.mxu0 %v4138_v6  ;;  %v1142_v63 = vadd.f32 %v4144_v60, %v3526_v27  ;;  %v4147_v24 = vld [vmem:[#allocation11_spill] sm:$0xff]  ;;  %v4148_v52 = vld [vmem:[#allocation10_spill] sm:$0xff] }
 0x155   : > { %v1617_v53 = vadd.f32 %v1530_v16, %v978_v3  ;;  %v3816_v45 = vadd.f32 %v1530_v16, %v1030_v9  ;;  %v2916_v4 = vpop.f32.mrb[54].mxu0  ;;  %2961 = vmatprep.mubr.msk.bf16.mxu1 %vm3207_vm2, %v4138_v6  ;;  %v1134_v3 = vadd.f32 %v4147_v24, %v3583_v57  ;;  %v1085_v38 = vadd.f32 %v4148_v52, %v3604_v55 }
 0x156   : > { %v1620_v42 = vadd.f32 %v2916_v4, %v989_v21  ;;  %v3821_v28 = vadd.f32 %v2916_v4, %v4142_v48  ;;  %v1533_v31 = vpop.f32.mrb[55].mxu0 }
 0x157   : > { %v1618_v5 = vadd.f32 %v1533_v31, %v981_v43  ;;  %v3823_v29 = vadd.f32 %v1533_v31, %v1033_v13  ;;  %2960 = vmatpush3.bf16.msra.mxu1 %v1651_v15  ;;  %2992 = vmatpush3.bf16.msra.mxu0 %v1659_v32  ;;  %v1082_v15 = vadd.f32 %v4145_v47, %v3583_v57  ;;  %v4146_v32 = vld [vmem:[#allocation8_spill] sm:$0xff] }
 0x158   : > { %v1663_v33 = vpack.c.bf16 %v1620_v42, %v1619_v62  ;;  %v1665_v50 = vpack.c.bf16 %v3821_v28, %v3808_v41  ;;  %2965 = vmatprep.subr.bf16.mxu1 %v4138_v6  ;;  %3005 = vmatprep.subr.bf16.mxu0 %v4138_v6  ;;  %v1093_v36 = vadd.f32 %v4146_v32, %v3540_v34 }
 0x159   : > { %v1662_v1 = vpack.c.bf16 %v1618_v5, %v1617_v53  ;;  %v1664_v51 = vpack.c.bf16 %v3823_v29, %v3816_v45  ;;  %v1137_v43 = vadd.f32 %v4149_v39, %v3604_v55  ;;  %v2324_v45 = vlaneseq }
 0x15a   : > { %2962 = vmatmul.mubr.msk.bf16.vlgmr.msra.gmra.mrb[48].mxu1 %vm1680_vm3, %v3653_v7  ;;  %2994 = vmatmul.mubr.msk.bf16.vlgmr.msra.gmra.mrb[64].mxu0 %vm1680_vm3, %v3653_v7 }
 0x15b   : > { %v2919_v9 = vpop.f32.mrb[56].mxu0  ;;  %2966 = vmatpush3.bf16.msra.mxu1 %v1652_v8  ;;  %3006 = vmatpush3.bf16.msra.mxu0 %v1662_v1  ;;  %v4150_v8 = vld [vmem:[#allocation12_spill] sm:$0xff] }
 0x15c   : > { %v1627_v21 = vadd.f32 %v2919_v9, %v1090_v19  ;;  %v3853_v62 = vadd.f32 %v2919_v9, %v1142_v63  ;;  %v1546_v16 = vpop.f32.mrb[57].mxu0  ;;  %2967 = vmatprep.subr.bf16.mxu1 %v4138_v6  ;;  %3007 = vmatprep.subr.bf16.mxu0 %v4138_v6  ;;  %v4151_v19 = vld [vmem:[#allocation14_spill] sm:$0xff]  ;;  %v4152_v63 = vld [vmem:[#allocation17_spill] sm:$0xff] }
 0x15d   : > { %v1625_v10 = vadd.f32 %v1546_v16, %v1082_v15  ;;  %v3859_v13 = vadd.f32 %v1546_v16, %v1134_v3  ;;  %v2920_v49 = vpop.f32.mrb[58].mxu0  ;;  %2969 = vmatprep.mubr.msk.bf16.mxu1 %vm3207_vm2, %v4138_v6  ;;  %3009 = vmatprep.mubr.msk.bf16.mxu0 %vm3207_vm2, %v4138_v6  ;;  %v1194_v60 = vadd.f32 %v4151_v19, %v3526_v27  ;;  %v4155_v15 = vld [vmem:[#allocation19_spill] sm:$0xff] }
 0x15e   : > { %v1628_v46 = vadd.f32 %v2920_v49, %v1093_v36  ;;  %v3866_v53 = vadd.f32 %v2920_v49, %v4150_v8  ;;  %v1549_v4 = vpop.f32.mrb[59].mxu0  ;;  %v1246_v58 = vadd.f32 %v4152_v63, %v3526_v27  ;;  %v1238_v32 = vadd.f32 %v4155_v15, %v3583_v57  ;;  %v4156_v27 = vld [vmem:[#allocation18_spill] sm:$0xff] }
 0x15f   : > { %v1626_v42 = vadd.f32 %v1549_v4, %v1085_v38  ;;  %v3868_v48 = vadd.f32 %v1549_v4, %v1137_v43  ;;  %2968 = vmatpush3.bf16.msra.mxu1 %v1653_v18  ;;  %3008 = vmatpush3.bf16.msra.mxu0 %v1663_v33  ;;  %v1186_v18 = vadd.f32 %v4153_v17, %v3583_v57  ;;  %v4154_v33 = vld [vmem:[#allocation16_spill] sm:$0xff] }
 0x160   : > { %v1667_v31 = vpack.c.bf16 %v1628_v46, %v1627_v21  ;;  %v1669_v5 = vpack.c.bf16 %v3866_v53, %v3853_v62  ;;  %2973 = vmatprep.subr.bf16.mxu1 %v4138_v6  ;;  %3021 = vmatprep.subr.bf16.mxu0 %v4138_v6  ;;  %v1197_v47 = vadd.f32 %v4154_v33, %v3540_v34  ;;  %v4157_v34 = vld [vmem:[#allocation21_spill] sm:$0xff] }
 0x161   : > { %v1666_v1 = vpack.c.bf16 %v1626_v42, %v1625_v10  ;;  %v1668_v30 = vpack.c.bf16 %v3868_v48, %v3859_v13  ;;  %v1189_v24 = vadd.f32 %v4156_v27, %v3604_v55  ;;  %v1241_v38 = vadd.f32 %v4157_v34, %v3604_v55 }
 0x162   : > { %2970 = vmatmul.mubr.msk.bf16.vlgmr.msra.gmra.mrb[52].mxu1 %vm1680_vm3, %v3653_v7  ;;  %3010 = vmatmul.mubr.msk.bf16.vlgmr.msra.gmra.mrb[68].mxu0 %vm1680_vm3, %v3653_v7 }
 0x163   : > { %v2923_v36 = vpop.f32.mrb[60].mxu0  ;;  %2974 = vmatpush3.bf16.msra.mxu1 %v1654_v2  ;;  %3022 = vmatpush3.bf16.msra.mxu0 %v1666_v1 }
 0x164   : > { %v1635_v3 = vadd.f32 %v2923_v36, %v1194_v60  ;;  %v1639_v9 = vadd.f32 %v2923_v36, %v1246_v58  ;;  %v1562_v52 = vpop.f32.mrb[61].mxu0  ;;  %2975 = vmatprep.subr.bf16.mxu1 %v4138_v6  ;;  %3023 = vmatprep.subr.bf16.mxu0 %v4138_v6 }
 0x165   : > { %v1633_v57 = vadd.f32 %v1562_v52, %v1186_v18  ;;  %v1637_v21 = vadd.f32 %v1562_v52, %v1238_v32  ;;  %v2924_v16 = vpop.f32.mrb[62].mxu0  ;;  %2977 = vmatprep.mubr.msk.bf16.mxu1 %vm3207_vm2, %v4138_v6  ;;  %3025 = vmatprep.mubr.msk.bf16.mxu0 %vm3207_vm2, %v4138_v6 }
 0x166   : > { %v1636_v59 = vadd.f32 %v2924_v16, %v1197_v47  ;;  %v1640_v2 = vadd.f32 %v2924_v16, %v4158_v11  ;;  %v1565_v39 = vpop.f32.mrb[63].mxu0 }
 0x167   : > { %v1634_v43 = vadd.f32 %v1565_v39, %v1189_v24  ;;  %v1638_v10 = vadd.f32 %v1565_v39, %v1241_v38  ;;  %2976 = vmatpush3.bf16.msra.mxu1 %v1655_v23  ;;  %3024 = vmatpush3.bf16.msra.mxu0 %v1667_v31 }
 0x168   : > { %v1671_v55 = vpack.c.bf16 %v1636_v59, %v1635_v3  ;;  %v1673_v13 = vpack.c.bf16 %v1640_v2, %v1639_v9  ;;  %2981 = vmatprep.subr.bf16.mxu1 %v4138_v6  ;;  %3037 = vmatprep.subr.bf16.mxu0 %v4138_v6 }
 0x169   : > { %v1670_v49 = vpack.c.bf16 %v1634_v43, %v1633_v57  ;;  %v1672_v46 = vpack.c.bf16 %v1638_v10, %v1637_v21 }
 0x16a   : > { %2978 = vmatmul.mubr.msk.bf16.vlgmr.msra.gmra.mrb[56].mxu1 %vm1680_vm3, %v3653_v7  ;;  %3026 = vmatmul.mubr.msk.bf16.vlgmr.msra.gmra.mrb[72].mxu0 %vm1680_vm3, %v3653_v7 }
 0x16b   : > { %2982 = vmatpush3.bf16.msra.mxu1 %v1656_v12  ;;  %3038 = vmatpush3.bf16.msra.mxu0 %v1670_v49 }
 0x16c   : > { %2983 = vmatprep.subr.bf16.mxu1 %v4138_v6  ;;  %3039 = vmatprep.subr.bf16.mxu0 %v4138_v6 }
 0x16d   : > { %2985 = vmatprep.mubr.msk.bf16.mxu1 %vm3207_vm2, %v4138_v6  ;;  %3041 = vmatprep.mubr.msk.bf16.mxu0 %vm3207_vm2, %v4138_v6 }
 0x16f   : > { %2984 = vmatpush3.bf16.msra.mxu1 %v1657_v26  ;;  %3040 = vmatpush3.bf16.msra.mxu0 %v1671_v55 }
 0x170   : > { %2997 = vmatprep.subr.bf16.mxu1 %v4138_v6 }
 0x172   : > { %2986 = vmatmul.mubr.msk.bf16.vlgmr.msra.gmra.mrb[60].mxu1 %vm1680_vm3, %v3653_v7  ;;  %3042 = vmatmul.mubr.msk.bf16.vlgmr.msra.gmra.mrb[76].mxu0 %vm1680_vm3, %v3653_v7 }
 0x173   : > { %2998 = vmatpush3.bf16.msra.mxu1 %v1660_v20  ;;  %3001 = vmatprep.mubr.msk.bf16.mxu1 %vm3207_vm2, %v4138_v6 }
 0x174   : > { %2999 = vmatprep.subr.bf16.mxu1 %v4138_v6 }
 0x177   : > { %3000 = vmatpush3.bf16.msra.mxu1 %v1661_v37 }
 0x178   : > { %3013 = vmatprep.subr.bf16.mxu1 %v4138_v6 }
 0x17a   : > { %3002 = vmatmul.mubr.msk.bf16.vlgmr.msra.gmra.mrb[64].mxu1 %vm1680_vm3, %v3653_v7 }
 0x17b   : > { %3014 = vmatpush3.bf16.msra.mxu1 %v1664_v51  ;;  %3017 = vmatprep.mubr.msk.bf16.mxu1 %vm3207_vm2, %v4138_v6  ;;  %v3976_v51 = vshrl.u32 %v2324_v45, 7 }
 0x17c   : > { %3015 = vmatprep.subr.bf16.mxu1 %v4138_v6 }
 0x17d   : > { %vm2327_vm4 = vcmp.lt.s32.totalorder %v3976_v51, 2 }
 0x17f   : > { %3016 = vmatpush3.bf16.msra.mxu1 %v1665_v50 }
 0x180   : > { %3029 = vmatprep.subr.bf16.mxu1 %v4138_v6 }
 0x182   : > { %3018 = vmatmul.mubr.msk.bf16.vlgmr.msra.gmra.mrb[68].mxu1 %vm1680_vm3, %v3653_v7 }
 0x183   : > { %3030 = vmatpush3.bf16.msra.mxu1 %v1668_v30  ;;  %3033 = vmatprep.mubr.msk.bf16.mxu1 %vm3207_vm2, %v4138_v6 }
 0x184   : > { %3031 = vmatprep.subr.bf16.mxu1 %v4138_v6 }
 0x187   : > { %3032 = vmatpush3.bf16.msra.mxu1 %v1669_v5 }
 0x188   : > { %3045 = vmatprep.subr.bf16.mxu1 %v4138_v6 }
 0x18a   : > { %3034 = vmatmul.mubr.msk.bf16.vlgmr.msra.gmra.mrb[72].mxu1 %vm1680_vm3, %v3653_v7 }
 0x18b   : > { %3046 = vmatpush3.bf16.msra.mxu1 %v1672_v46  ;;  %3049 = vmatprep.mubr.msk.bf16.mxu1 %vm3207_vm2, %v4138_v6 }
 0x18c   : > { %3047 = vmatprep.subr.bf16.mxu1 %v4138_v6 }
 0x18f   : > { %3048 = vmatpush3.bf16.msra.mxu1 %v1673_v13 }
 0x192   : > { %3050 = vmatmul.mubr.msk.bf16.vlgmr.msra.gmra.mrb[76].mxu1 %vm1680_vm3, %v3653_v7 }
 0x20d   : > { %v1718_v40 = vpop.f32.mrb[32].mxu1 }
 0x20e   : > { %v1719_v0 = vadd.f32 %v1718_v40, %v3971_v56  ;;  %v2931_v35 = vpop.f32.mrb[33].mxu1 }
 0x20f   : > { %v1721_v25 = vpop.f32.mrb[34].mxu1 }
 0x210   : > { %v2661_v14 = vmul.f32 -1.442695, %v1719_v0  ;;  %v2932_v23 = vpop.f32.mrb[35].mxu1 }
 0x212   : > { %3117 = vpow2.f32 %v2661_v14 }
 0x215   : > { %v1758_v26 = vpop.f32.mrb[36].mxu1 }
 0x216   : > { %v1759_v12 = vadd.f32 %v1758_v26, %v3971_v56  ;;  %v2939_v61 = vpop.f32.mrb[37].mxu1 }
 0x217   : > { %v1761_v44 = vpop.f32.mrb[38].mxu1 }
 0x218   : > { %v2662_v6 = vmul.f32 -1.442695, %v1759_v12  ;;  %v2940_v54 = vpop.f32.mrb[39].mxu1 }
 0x21a   : > { %3119 = vpow2.f32 %v2662_v6 }
 0x21c   : > { %v3118_v22 = vpop.eup %3117 }
 0x21d   : > { %v2377_v7 = vadd.f32 1.0, %v3118_v22  ;;  %v1798_v37 = vpop.f32.mrb[40].mxu1 }
 0x21e   : > { %v1799_v20 = vadd.f32 %v1798_v37, %v3971_v56  ;;  %v2947_v41 = vpop.f32.mrb[41].mxu1 }
 0x21f   : > { %3121 = vrcp.f32 %v2377_v7  ;;  %v1801_v28 = vpop.f32.mrb[42].mxu1 }
 0x220   : > { %v2663_v29 = vmul.f32 -1.442695, %v1799_v20  ;;  %v2948_v50 = vpop.f32.mrb[43].mxu1 }
 0x222   : > { %3123 = vpow2.f32 %v2663_v29 }
 0x224   : > { %v3120_v62 = vpop.eup %3119 }
 0x225   : > { %v2378_v8 = vadd.f32 1.0, %v3120_v62  ;;  %v1838_v53 = vpop.f32.mrb[44].mxu1 }
 0x226   : > { %v3979_v4 = vadd.f32 %v1838_v53, %v3971_v56  ;;  %v2955_v42 = vpop.f32.mrb[45].mxu1 }
 0x227   : > { %3125 = vrcp.f32 %v2378_v8  ;;  %v1841_v48 = vpop.f32.mrb[46].mxu1 }
 0x228   : > { %v2664_v31 = vmul.f32 -1.442695, %v3979_v4  ;;  %v2956_v5 = vpop.f32.mrb[47].mxu1 }
 0x229   : > { %v3122_v1 = vpop.eup %3121 }
 0x22a   : > { %v2427_v30 = vsel %vm2327_vm4, %v3122_v1, %v1719_v0  ;;  %3127 = vpow2.f32 %v2664_v31 }
 0x22b   : > { %2444 = vst.msk [vmem:[%s3987_s14] sm:$0x3f] %vm2443_vm5, %v2427_v30 }
 0x22c   : > { %v3124_v19 = vpop.eup %3123 }
 0x22d   : > { %v2379_v60 = vadd.f32 1.0, %v3124_v19  ;;  %v1878_v63 = vpop.f32.mrb[48].mxu1  ;;  %v2038_v58 = vpop.f32.mrb[64].mxu0 }
 0x22e   : > { %v3995_v17 = vadd.f32 %v1878_v63, %v3971_v56  ;;  %v3998_v18 = vadd.f32 %v2038_v58, %v3971_v56  ;;  %v2963_v33 = vpop.f32.mrb[49].mxu1  ;;  %v2995_v47 = vpop.f32.mrb[65].mxu0 }
 0x22f   : > { %3129 = vrcp.f32 %v2379_v60  ;;  %v1881_v15 = vpop.f32.mrb[50].mxu1  ;;  %v2041_v32 = vpop.f32.mrb[66].mxu0 }
 0x230   : > { %v2665_v36 = vmul.f32 -1.442695, %v3995_v17  ;;  %v2669_v27 = vmul.f32 -1.442695, %v3998_v18  ;;  %v2964_v24 = vpop.f32.mrb[51].mxu1  ;;  %v2996_v3 = vpop.f32.mrb[67].mxu0 }
 0x231   : > { %v3126_v9 = vpop.eup %3125 }
 0x232   : > { %v2428_v52 = vsel %vm2327_vm4, %v3126_v9, %v1759_v12  ;;  %3131 = vpow2.f32 %v2665_v36 }
 0x233   : > { %2445 = vst.msk [vmem:[%s3987_s14 + $0x8] sm:$0x3f] %vm2443_vm5, %v2428_v52  ;;  %3133 = vpow2.f32 %v2669_v27 }
 0x234   : > { %v3128_v34 = vpop.eup %3127 }
 0x235   : > { %v2380_v38 = vadd.f32 1.0, %v3128_v34  ;;  %v1918_v57 = vpop.f32.mrb[52].mxu1  ;;  %v2118_v21 = vpop.f32.mrb[68].mxu0 }
 0x236   : > { %v4007_v16 = vadd.f32 %v1918_v57, %v3971_v56  ;;  %v4010_v59 = vadd.f32 %v2118_v21, %v3971_v56  ;;  %v2971_v11 = vpop.f32.mrb[53].mxu1  ;;  %v3011_v2 = vpop.f32.mrb[69].mxu0 }
 0x237   : > { %3135 = vrcp.f32 %v2380_v38  ;;  %v1921_v39 = vpop.f32.mrb[54].mxu1  ;;  %v2121_v43 = vpop.f32.mrb[70].mxu0 }
 0x238   : > { %v2666_v10 = vmul.f32 -1.442695, %v4007_v16  ;;  %v2671_v55 = vmul.f32 -1.442695, %v4010_v59  ;;  %v2972_v13 = vpop.f32.mrb[55].mxu1  ;;  %v3012_v49 = vpop.f32.mrb[71].mxu0 }
 0x239   : > { %v3130_v46 = vpop.eup %3129 }
 0x23a   : > { %v2429_v40 = vsel %vm2327_vm4, %v3130_v46, %v1799_v20  ;;  %3137 = vpow2.f32 %v2666_v10 }
 0x23b   : > { %2446 = vst.msk [vmem:[%s3987_s14 + $0x10] sm:$0x3f] %vm2443_vm5, %v2429_v40  ;;  %3139 = vpow2.f32 %v2671_v55 }
 0x23c   : > { %v3132_v0 = vpop.eup %3131 }
 0x23d   : > { %v3134_v35 = vpop.eup %3133  ;;  %v2381_v25 = vadd.f32 1.0, %v3132_v0  ;;  %v1958_v14 = vpop.f32.mrb[56].mxu1 }
 0x23e   : > { %v2198_v23 = vpop.f32.mrb[72].mxu0  ;;  %v2385_v26 = vadd.f32 1.0, %v3134_v35  ;;  %v4019_v12 = vadd.f32 %v1958_v14, %v3971_v56  ;;  %v2979_v44 = vpop.f32.mrb[57].mxu1 }
 0x23f   : > { %v4022_v61 = vadd.f32 %v2198_v23, %v3971_v56  ;;  %v3027_v6 = vpop.f32.mrb[73].mxu0  ;;  %3141 = vrcp.f32 %v2381_v25  ;;  %v1961_v54 = vpop.f32.mrb[58].mxu1 }
 0x240   : > { %v2201_v22 = vpop.f32.mrb[74].mxu0  ;;  %3143 = vrcp.f32 %v2385_v26  ;;  %v2667_v7 = vmul.f32 -1.442695, %v4019_v12  ;;  %v2980_v20 = vpop.f32.mrb[59].mxu1 }
 0x241   : > { %v2673_v37 = vmul.f32 -1.442695, %v4022_v61  ;;  %v3028_v41 = vpop.f32.mrb[75].mxu0  ;;  %v3136_v45 = vpop.eup %3135 }
 0x242   : > { %v2430_v28 = vsel %vm2327_vm4, %v3136_v45, %v3979_v4  ;;  %3145 = vpow2.f32 %v2667_v7 }
 0x243   : > { %2447 = vst.msk [vmem:[%s3987_s14 + $0x18] sm:$0x3f] %vm2443_vm5, %v2430_v28  ;;  %3147 = vpow2.f32 %v2673_v37 }
 0x244   : > { %v3138_v29 = vpop.eup %3137 }
 0x245   : > { %v3140_v50 = vpop.eup %3139  ;;  %v2382_v62 = vadd.f32 1.0, %v3138_v29  ;;  %v1998_v8 = vpop.f32.mrb[60].mxu1 }
 0x246   : > { %v2278_v53 = vpop.f32.mrb[76].mxu0  ;;  %v2387_v42 = vadd.f32 1.0, %v3140_v50  ;;  %v4032_v48 = vadd.f32 %v1998_v8, %v3971_v56  ;;  %v2987_v5 = vpop.f32.mrb[61].mxu1 }
 0x247   : > { %v4035_v31 = vadd.f32 %v2278_v53, %v3971_v56  ;;  %v3043_v1 = vpop.f32.mrb[77].mxu0  ;;  %3149 = vrcp.f32 %v2382_v62  ;;  %v2001_v4 = vpop.f32.mrb[62].mxu1 }
 0x248   : > { %v2281_v30 = vpop.f32.mrb[78].mxu0  ;;  %3151 = vrcp.f32 %v2387_v42  ;;  %v2668_v19 = vmul.f32 -1.442695, %v4032_v48  ;;  %v2988_v63 = vpop.f32.mrb[63].mxu1 }
 0x249   : > { %v2675_v60 = vmul.f32 -1.442695, %v4035_v31  ;;  %v3044_v58 = vpop.f32.mrb[79].mxu0  ;;  %v3142_v33 = vpop.eup %3141 }
 0x24a   : > { %v3144_v47 = vpop.eup %3143  ;;  %v2431_v15 = vsel %vm2327_vm4, %v3142_v33, %v3995_v17  ;;  %3153 = vpow2.f32 %v2668_v19 }
 0x24b   : > { %2448 = vst.msk [vmem:[%s3987_s14 + $0x20] sm:$0x3f] %vm2443_vm5, %v2431_v15  ;;  %v2435_v32 = vsel %vm2327_vm4, %v3144_v47, %v3998_v18  ;;  %3155 = vpow2.f32 %v2675_v60 }
 0x24c   : > { %v3146_v36 = vpop.eup %3145  ;;  %2452 = vst.msk [vmem:[%s3987_s14 + $0x40] sm:$0x3f] %vm2443_vm5, %v2435_v32 }
 0x24d   : > { %v3148_v27 = vpop.eup %3147  ;;  %v2383_v24 = vadd.f32 1.0, %v3146_v36  ;;  %v2078_v3 = vpop.f32.mrb[64].mxu1 }
 0x24e   : > { %v2389_v9 = vadd.f32 1.0, %v3148_v27  ;;  %v2079_v52 = vadd.f32 %v2078_v3, %v3971_v56  ;;  %v3003_v17 = vpop.f32.mrb[65].mxu1 }
 0x24f   : > { %3157 = vrcp.f32 %v2383_v24  ;;  %v2081_v34 = vpop.f32.mrb[66].mxu1 }
 0x250   : > { %3159 = vrcp.f32 %v2389_v9  ;;  %v2670_v38 = vmul.f32 -1.442695, %v2079_v52  ;;  %v3004_v57 = vpop.f32.mrb[67].mxu1 }
 0x251   : > { %v3150_v21 = vpop.eup %3149 }
 0x252   : > { %v3152_v18 = vpop.eup %3151  ;;  %v2432_v11 = vsel %vm2327_vm4, %v3150_v21, %v4007_v16  ;;  %3161 = vpow2.f32 %v2670_v38 }
 0x253   : > { %2449 = vst.msk [vmem:[%s3987_s14 + $0x28] sm:$0x3f] %vm2443_vm5, %v2432_v11  ;;  %v2437_v2 = vsel %vm2327_vm4, %v3152_v18, %v4010_v59 }
 0x254   : > { %v3154_v39 = vpop.eup %3153  ;;  %2454 = vst.msk [vmem:[%s3987_s14 + $0x50] sm:$0x3f] %vm2443_vm5, %v2437_v2 }
 0x255   : > { %v3156_v43 = vpop.eup %3155  ;;  %v2384_v10 = vadd.f32 1.0, %v3154_v39  ;;  %v2158_v55 = vpop.f32.mrb[68].mxu1 }
 0x256   : > { %v2391_v13 = vadd.f32 1.0, %v3156_v43  ;;  %v2159_v49 = vadd.f32 %v2158_v55, %v3971_v56  ;;  %v3019_v46 = vpop.f32.mrb[69].mxu1 }
 0x257   : > { %3163 = vrcp.f32 %v2384_v10  ;;  %v2161_v16 = vpop.f32.mrb[70].mxu1 }
 0x258   : > { %3165 = vrcp.f32 %v2391_v13  ;;  %v2672_v40 = vmul.f32 -1.442695, %v2159_v49  ;;  %v3020_v0 = vpop.f32.mrb[71].mxu1 }
 0x259   : > { %v3158_v35 = vpop.eup %3157 }
 0x25a   : > { %v3160_v25 = vpop.eup %3159  ;;  %v2433_v59 = vsel %vm2327_vm4, %v3158_v35, %v4019_v12  ;;  %3167 = vpow2.f32 %v2672_v40 }
 0x25b   : > { %2450 = vst.msk [vmem:[%s3987_s14 + $0x30] sm:$0x3f] %vm2443_vm5, %v2433_v59  ;;  %v2439_v14 = vsel %vm2327_vm4, %v3160_v25, %v4022_v61 }
 0x25c   : > { %v3162_v23 = vpop.eup %3161  ;;  %2456 = vst.msk [vmem:[%s3987_s14 + $0x60] sm:$0x3f] %vm2443_vm5, %v2439_v14 }
 0x25d   : > { %v2386_v26 = vadd.f32 1.0, %v3162_v23  ;;  %v2238_v44 = vpop.f32.mrb[72].mxu1 }
 0x25e   : > { %v2239_v6 = vadd.f32 %v2238_v44, %v3971_v56  ;;  %v3035_v54 = vpop.f32.mrb[73].mxu1 }
 0x25f   : > { %3169 = vrcp.f32 %v2386_v26  ;;  %v2241_v22 = vpop.f32.mrb[74].mxu1 }
 0x260   : > { %v2674_v12 = vmul.f32 -1.442695, %v2239_v6  ;;  %v3036_v7 = vpop.f32.mrb[75].mxu1 }
 0x261   : > { %v3164_v37 = vpop.eup %3163 }
 0x262   : > { %v3166_v20 = vpop.eup %3165  ;;  %v2434_v41 = vsel %vm2327_vm4, %v3164_v37, %v4032_v48  ;;  %3171 = vpow2.f32 %v2674_v12 }
 0x263   : > { %2451 = vst.msk [vmem:[%s3987_s14 + $0x38] sm:$0x3f] %vm2443_vm5, %v2434_v41  ;;  %v2441_v61 = vsel %vm2327_vm4, %v3166_v20, %v4035_v31 }
 0x264   : > { %v3168_v45 = vpop.eup %3167  ;;  %2458 = vst.msk [vmem:[%s3987_s14 + $0x70] sm:$0x3f] %vm2443_vm5, %v2441_v61 }
 0x265   : > { %v2388_v28 = vadd.f32 1.0, %v3168_v45  ;;  %v2318_v29 = vpop.f32.mrb[76].mxu1 }
 0x266   : > { %v2319_v50 = vadd.f32 %v2318_v29, %v3971_v56  ;;  %v3051_v62 = vpop.f32.mrb[77].mxu1 }
 0x267   : > { %3173 = vrcp.f32 %v2388_v28  ;;  %v2321_v8 = vpop.f32.mrb[78].mxu1 }
 0x268   : > { %v2676_v53 = vmul.f32 -1.442695, %v2319_v50  ;;  %v3052_v42 = vpop.f32.mrb[79].mxu1 }
 0x269   : > { %v3170_v48 = vpop.eup %3169 }
 0x26a   : > { %v2436_v5 = vsel %vm2327_vm4, %v3170_v48, %v2079_v52  ;;  %3175 = vpow2.f32 %v2676_v53 }
 0x26b   : > { %2453 = vst.msk [vmem:[%s3987_s14 + $0x48] sm:$0x3f] %vm2443_vm5, %v2436_v5 }
 0x26c   : > { %v3172_v31 = vpop.eup %3171 }
 0x26d   : > { %v2390_v1 = vadd.f32 1.0, %v3172_v31 }
 0x26f   : > { %3177 = vrcp.f32 %v2390_v1 }
 0x271   : > { %v3174_v4 = vpop.eup %3173 }
 0x272   : > { %v2438_v56 = vsel %vm2327_vm4, %v3174_v4, %v2159_v49 }
 0x273   : > { %2455 = vst.msk [vmem:[%s3987_s14 + $0x58] sm:$0x3f] %vm2443_vm5, %v2438_v56 }
 0x274   : > { %v3176_v30 = vpop.eup %3175 }
 0x275   : > { %v2392_v19 = vadd.f32 1.0, %v3176_v30 }
 0x277   : > { %3179 = vrcp.f32 %v2392_v19 }
 0x279   : > { %v3178_v60 = vpop.eup %3177 }
 0x27a   : > { %v2440_v63 = vsel %vm2327_vm4, %v3178_v60, %v2239_v6 }
 0x27b   : > { %2457 = vst.msk [vmem:[%s3987_s14 + $0x68] sm:$0x3f] %vm2443_vm5, %v2440_v63 }
 0x281   : > { %v3180_v58 = vpop.eup %3179 }
 0x282   : > { %v2442_v33 = vsel %vm2327_vm4, %v3180_v58, %v2319_v50 }
 0x283   : > { %2459 = vst.msk [vmem:[%s3987_s14 + $0x78] sm:$0x3f] %vm2443_vm5, %v2442_v33 }
 0x284 PF: > { %s17_s26 = sadd.s32 1, %s3203_s26   ;;  %s4159_s24 = smov %s3199_s25 }
 0x285   : > { %p14_p5 = scmp.ge.s32.totalorder %s17_s26, 4   ;;  %s4160_s25 = smov %s4162_s27 }
 0x287   :  { %16 = sbr.rel (!%p14_p5) target bundleno = 2 (0x2), region = 81 }

</bundles_post_ra>
